<compile_context>
chip_gen: v7x
topology: tpu7x:2x2x1
jax: 0.10.0
libtpu: 0.0.40
codegen_flags: <defaults>
</compile_context>

<pallas_src>
import math
from functools import partial

import jax
import jax.numpy as jnp
from jax.experimental import pallas as pl
from jax.experimental.pallas import tpu as pltpu

# ----------------------------- config ---------------------------------------
C = 32          # gomme_boyutu (embedding dim)
D = 32          # d_latent (== gomme_boyutu per spec)
L = 8           # num_latents
H = 4           # dikkat_buyuklugu (num heads), D % H == 0
HD = D // H     # head dim
T = 8           # pencere (window) -- Block requires T == pencere
N_LAYERS = 2    # katman_sayisi
VOCAB = 32      # sozluk_boyutu
B = 2           # batch
FF = 4 * C      # FFN hidden
EPS = 1e-5      # LayerNorm eps (PyTorch default)

assert D == C, "spec has d_latent == gomme_boyutu"
assert D % H == 0

# Lane offsets (in units of C) inside the packed per-layer vector slab.
# Each 32-wide slice stays inside a 128-lane tile (C divides 128).
V_LN1G, V_LN1B, V_BQ, V_BK, V_BV, V_BO, V_LN2G, V_LN2B, V_B2 = range(9)
VEC_W = 9 * C                       # width of the small-vector slab
# Wide-bias slab: b1 at lanes [0, FF), bop at [FF, FF+T*C).  FF = 4*C is a
# multiple of 128, so both slices are 128-lane aligned.
WBIAS_W = FF + T * C
# Head vector slab: ln_f gamma [0,C), ln_f beta [C,2C), lm_head bias [2C,2C+V)
HVEC_W = 2 * C + VOCAB


# ----------------------------- kernel helpers --------------------------------
def _layer_norm(v, g, b):
    # v: (rows, C), g/b: (1, C).  PyTorch LayerNorm (biased variance, eps=1e-5)
    mu = jnp.mean(v, axis=-1, keepdims=True)
    var = jnp.mean((v - mu) ** 2, axis=-1, keepdims=True)
    return (v - mu) * jax.lax.rsqrt(var + EPS) * g + b


def _softmax_last(s):
    # Exact division (review correctness note: approx reciprocal breaks tight
    # parity with the PyTorch reference; VPU/EUP have ample slack here).
    s = s - jnp.max(s, axis=-1, keepdims=True)
    p = jnp.exp(s)
    return p / jnp.sum(p, axis=-1, keepdims=True)


def _tree_sum(xs):
    # Pairwise-tree reduction (avoid a serial accumulate chain).
    xs = list(xs)
    while len(xs) > 1:
        nxt = [xs[i] + xs[i + 1] for i in range(0, len(xs) - 1, 2)]
        if len(xs) % 2:
            nxt.append(xs[-1])
        xs = nxt
    return xs[0]


# ----------------------------- fused kernel ----------------------------------
def fused_forward_kernel(bsz,
                         x_ref, vecs_ref, wbias_ref, lat_ref, wqkvo_ref,
                         wop_ref, w1_ref, w2_ref, hvec_ref, lmw_ref,
                         out_ref,
                         flatlat_ref, flatout_ref, xrows_ref):
    """All N_LAYERS blocks + final ln_f/lm_head for the WHOLE folded batch.

    x (bsz*T, C) stays resident across layers.  Per-layer weights are indexed
    from stacked/packed arrays with static Python loops (everything fits in
    VMEM at these sizes; no grid, no pipelining, single-buffered)."""
    x = x_ref[...]                                     # (bsz*T, C)

    scale = 1.0 / math.sqrt(HD)
    # Per-head channel masks (1, D), built once.  scaled_masks fold 1/sqrt(HD)
    # into the Q masking so the score tiles are never rescaled.
    lane = jax.lax.broadcasted_iota(jnp.int32, (1, D), 1)
    head_masks = [((lane >= h * HD) & (lane < (h + 1) * HD)).astype(jnp.float32)
                  for h in range(H)]
    scaled_masks = [m * scale for m in head_masks]

    for layer in range(N_LAYERS):
        # ---- packed per-layer vectors (lane slices of one slab) -------------
        ln1_g = vecs_ref[layer, :, V_LN1G * C:(V_LN1G + 1) * C]
        ln1_b = vecs_ref[layer, :, V_LN1B * C:(V_LN1B + 1) * C]
        bq = vecs_ref[layer, :, V_BQ * C:(V_BQ + 1) * C]
        bk = vecs_ref[layer, :, V_BK * C:(V_BK + 1) * C]
        bv = vecs_ref[layer, :, V_BV * C:(V_BV + 1) * C]
        bo = vecs_ref[layer, :, V_BO * C:(V_BO + 1) * C]
        ln2_g = vecs_ref[layer, :, V_LN2G * C:(V_LN2G + 1) * C]
        ln2_b = vecs_ref[layer, :, V_LN2B * C:(V_LN2B + 1) * C]
        b2 = vecs_ref[layer, :, V_B2 * C:(V_B2 + 1) * C]
        b1 = wbias_ref[layer, :, 0:FF]                 # (1, FF)
        bop = wbias_ref[layer, :, FF:FF + T * C]       # (1, T*C)

        wq = wqkvo_ref[layer, 0]                       # (D, D)
        wk = wqkvo_ref[layer, 1]                       # (C, D)
        wv = wqkvo_ref[layer, 2]                       # (C, D)
        wo = wqkvo_ref[layer, 3]                       # (D, D)

        # ---- ln1 + Perceiver cross-attention ---------------------------------
        xn = _layer_norm(x, ln1_g, ln1_b)              # (bsz*T, C), full batch
        lat = lat_ref[layer]                           # (L, D) learned latents

        # Batch-independent: q computed ONCE per layer; heads stacked along
        # sublanes with channel mask + 1/sqrt(HD) folded in -> (H*L, D).
        q = jnp.dot(lat, wq, preferred_element_type=jnp.float32) + bq
        q_stack = jnp.concatenate([q * sm for sm in scaled_masks], axis=0)

        # Batch-dependent projections on the whole folded batch (16 sublanes).
        k = jnp.dot(xn, wk, preferred_element_type=jnp.float32) + bk   # (bsz*T, D)
        v = jnp.dot(xn, wv, preferred_element_type=jnp.float32) + bv   # (bsz*T, D)

        for b in range(bsz):
            k_b = k[b * T:(b + 1) * T, :]              # (T, D)
            v_b = v[b * T:(b + 1) * T, :]              # (T, D)
            # Scores for ALL heads at once: (H*L, T); ONE softmax per batch
            # element per layer instead of one per head.
            s = jax.lax.dot_general(q_stack, k_b, (((1,), (1,)), ((), ())),
                                    preferred_element_type=jnp.float32)
            p = _softmax_last(s)                       # (H*L, T)
            o_all = jnp.dot(p, v_b, preferred_element_type=jnp.float32)  # (H*L, D)
            # Merge heads: disjoint channel masks, pairwise tree (no serial
            # chain through the MXU result FIFO).
            parts = [o_all[h * L:(h + 1) * L, :] * head_masks[h] for h in range(H)]
            o = _tree_sum(parts)                       # (L, D)
            lat_out = jnp.dot(o, wo, preferred_element_type=jnp.float32) + bo   # (L, D)
            # Flatten (L, D) -> one lane-dense row of the (bsz, L*D) scratch
            # (row-major, matches torch .reshape(B, -1)).
            for l in range(L):
                flatlat_ref[b:b + 1, l * D:(l + 1) * D] = lat_out[l:l + 1, :]

        # ---- output_proj: ONE (bsz, L*D) @ (L*D, T*C) matmul -----------------
        out_flat = jnp.dot(flatlat_ref[...], wop_ref[layer],
                           preferred_element_type=jnp.float32) + bop   # (bsz, T*C)
        flatout_ref[...] = out_flat
        # Unflatten (bsz, T*C) -> (bsz*T, C) row-major (torch .reshape(B,T,C))
        # via direct row stores into a VMEM scratch -- no concat/XLU merge tree.
        for b in range(bsz):
            for t in range(T):
                r = b * T + t
                xrows_ref[r:r + 1, :] = flatout_ref[b:b + 1, t * C:(t + 1) * C]
        x = x + xrows_ref[...]                         # residual 1

        # ---- FeedForward: Linear(C,4C) -> ReLU -> Linear(4C,C) -> Dropout(id)
        xn2 = _layer_norm(x, ln2_g, ln2_b)
        h1 = jnp.maximum(
            jnp.dot(xn2, w1_ref[layer], preferred_element_type=jnp.float32) + b1,
            0.0)
        ff = jnp.dot(h1, w2_ref[layer], preferred_element_type=jnp.float32) + b2
        x = x + ff                                     # residual 2

    # ---- final ln_f + lm_head -------------------------------------------------
    lnf_g = hvec_ref[:, 0:C]
    lnf_b = hvec_ref[:, C:2 * C]
    lm_b = hvec_ref[:, 2 * C:2 * C + VOCAB]
    xn = _layer_norm(x, lnf_g, lnf_b)
    # Single block store; lane-dense flat repack would cost bsz*T extra masked
    # lane-slice stores here, so the direct (bsz*T, VOCAB) store is cheaper.
    out_ref[...] = jnp.dot(xn, lmw_ref[...],
                           preferred_element_type=jnp.float32) + lm_b


# ----------------------------- wrapper ---------------------------------------
def eksigpt_forward(idx, params):
    """idx: (B, T) int32 token ids.  Returns logits (B, T, VOCAB)."""
    Bsz, Tt = idx.shape
    assert Tt == T, "Block's output_proj requires T == pencere"
    tok_emb = jnp.take(params["tok_emb"], idx, axis=0)           # (B, T, C)
    x = (tok_emb + params["pos_emb"][:Tt]).astype(jnp.float32)
    x = x.reshape(Bsz * Tt, C)                                   # fold the batch

    args = (x, params["vecs"], params["wbias"], params["latents"],
            params["wqkvo"], params["wop"], params["w1"], params["w2"],
            params["hvec"], params["lm_w"])

    logits_flat = pl.pallas_call(
        partial(fused_forward_kernel, Bsz),
        out_shape=jax.ShapeDtypeStruct((Bsz * Tt, VOCAB), jnp.float32),
        # No grid: single invocation, every operand fully VMEM-resident and
        # single-buffered; batch parallelism is not worth the per-TC weight
        # duplication at this size (see review v7x note).
        scratch_shapes=[
            pltpu.VMEM((Bsz, L * D), jnp.float32),     # flattened latents
            pltpu.VMEM((Bsz, Tt * C), jnp.float32),    # flat output_proj rows
            pltpu.VMEM((Bsz * Tt, C), jnp.float32),    # unflattened output rows
        ],
    )(*args)
    return logits_flat.reshape(Bsz, Tt, VOCAB)


# ----------------------------- parameter init --------------------------------
def init_params(key):
    """Random params in kernel layout (mirrors PyTorch _init_weights).

    Mapping from the PyTorch module (per layer l):
      vecs[l, 0, i*C:(i+1)*C]  for i in (ln1.g, ln1.b, q_proj.b, k_proj.b,
                                         v_proj.b, out_proj.b, ln2.g, ln2.b,
                                         ffwd.net[2].bias)
      wbias[l, 0, :FF]   = ffwd.net[0].bias ;  wbias[l, 0, FF:] = output_proj.bias
      wqkvo[l, 0..3]     = {q,k,v,out}_proj.weight.T   (shape (in, out))
      wop[l]             = output_proj.weight.T        (shape (L*D, T*C))
      w1[l]/w2[l]        = ffwd.net[0].weight.T / ffwd.net[2].weight.T
      hvec               = [ln_f.g, ln_f.b, lm_head.bias] ;  lm_w = lm_head.weight.T
    """
    def nrm(k, shape, std=0.02):
        return (std * jax.random.normal(k, shape)).astype(jnp.float32)

    ks = iter(jax.random.split(key, 12))

    vecs = jnp.zeros((N_LAYERS, 1, VEC_W), jnp.float32)          # biases = 0
    vecs = vecs.at[:, :, V_LN1G * C:(V_LN1G + 1) * C].set(1.0)   # LN gammas = 1
    vecs = vecs.at[:, :, V_LN2G * C:(V_LN2G + 1) * C].set(1.0)

    hvec = jnp.zeros((1, HVEC_W), jnp.float32).at[:, 0:C].set(1.0)   # ln_f gamma

    params = {
        "tok_emb": nrm(next(ks), (VOCAB, C)),
        "pos_emb": nrm(next(ks), (T, C)),
        "vecs": vecs,
        "wbias": jnp.zeros((N_LAYERS, 1, WBIAS_W), jnp.float32),
        "latents": jax.random.normal(next(ks), (N_LAYERS, L, D)).astype(jnp.float32),
        "wqkvo": nrm(next(ks), (N_LAYERS, 4, C, D)),
        "wop": nrm(next(ks), (N_LAYERS, L * D, T * C)),
        "w1": nrm(next(ks), (N_LAYERS, C, FF)),
        "w2": nrm(next(ks), (N_LAYERS, FF, C)),
        "hvec": hvec,
        "lm_w": nrm(next(ks), (C, VOCAB)),
    }
    return params


# ----------------------------- main -------------------------------------------
if __name__ == "__main__":
    key = jax.random.PRNGKey(0)
    pkey, ikey = jax.random.split(key)
    params = init_params(pkey)
    idx = jax.random.randint(ikey, (B, T), 0, VOCAB, dtype=jnp.int32)

    logits = jax.block_until_ready(eksigpt_forward(idx, params))

    assert logits.shape == (B, T, VOCAB), logits.shape
    assert bool(jnp.all(jnp.isfinite(logits)))
    print("KERNEL_OK")
</pallas_src>

<mosaic_0001>
module attributes {stable_mosaic.version = 11 : i64} {
  func.func @fused_forward_kernel(%arg0: memref<16x32xf32, #tpu.memory_space<vmem>>, %arg1: memref<2x1x288xf32, #tpu.memory_space<vmem>>, %arg2: memref<2x1x384xf32, #tpu.memory_space<vmem>>, %arg3: memref<2x8x32xf32, #tpu.memory_space<vmem>>, %arg4: memref<2x4x32x32xf32, #tpu.memory_space<vmem>>, %arg5: memref<2x256x256xf32, #tpu.memory_space<vmem>>, %arg6: memref<2x32x128xf32, #tpu.memory_space<vmem>>, %arg7: memref<2x128x32xf32, #tpu.memory_space<vmem>>, %arg8: memref<1x96xf32, #tpu.memory_space<vmem>>, %arg9: memref<32x32xf32, #tpu.memory_space<vmem>>, %arg10: memref<16x32xf32, #tpu.memory_space<vmem>>, %arg11: memref<2x256xf32, #tpu.memory_space<vmem>>, %arg12: memref<2x256xf32, #tpu.memory_space<vmem>>, %arg13: memref<16x32xf32, #tpu.memory_space<vmem>>) attributes {dimension_semantics = [], scalar_prefetch = 0 : i64, scratch_operands = 3 : i64, tpu.core_type = #tpu.core_type<tc>} {
    %c0 = arith.constant 0 : index
    %c0_0 = arith.constant 0 : index
    %0 = vector.load %arg0[%c0, %c0_0] : memref<16x32xf32, #tpu.memory_space<vmem>>, vector<16x32xf32>
    %1 = tpu.iota {dimensions = array<i32: 1>} : vector<1x32xi32>
    %c0_i32 = arith.constant 0 : i32
    %2 = vector.broadcast %c0_i32 : i32 to vector<1x32xi32>
    %3 = arith.cmpi sge, %1, %2 : vector<1x32xi32>
    %c8_i32 = arith.constant 8 : i32
    %4 = vector.broadcast %c8_i32 : i32 to vector<1x32xi32>
    %5 = arith.cmpi slt, %1, %4 : vector<1x32xi32>
    %6 = arith.andi %3, %5 : vector<1x32xi1>
    %7 = arith.extui %6 : vector<1x32xi1> to vector<1x32xi32>
    %8 = arith.sitofp %7 : vector<1x32xi32> to vector<1x32xf32>
    %c8_i32_1 = arith.constant 8 : i32
    %9 = vector.broadcast %c8_i32_1 : i32 to vector<1x32xi32>
    %10 = arith.cmpi sge, %1, %9 : vector<1x32xi32>
    %c16_i32 = arith.constant 16 : i32
    %11 = vector.broadcast %c16_i32 : i32 to vector<1x32xi32>
    %12 = arith.cmpi slt, %1, %11 : vector<1x32xi32>
    %13 = arith.andi %10, %12 : vector<1x32xi1>
    %14 = arith.extui %13 : vector<1x32xi1> to vector<1x32xi32>
    %15 = arith.sitofp %14 : vector<1x32xi32> to vector<1x32xf32>
    %c16_i32_2 = arith.constant 16 : i32
    %16 = vector.broadcast %c16_i32_2 : i32 to vector<1x32xi32>
    %17 = arith.cmpi sge, %1, %16 : vector<1x32xi32>
    %c24_i32 = arith.constant 24 : i32
    %18 = vector.broadcast %c24_i32 : i32 to vector<1x32xi32>
    %19 = arith.cmpi slt, %1, %18 : vector<1x32xi32>
    %20 = arith.andi %17, %19 : vector<1x32xi1>
    %21 = arith.extui %20 : vector<1x32xi1> to vector<1x32xi32>
    %22 = arith.sitofp %21 : vector<1x32xi32> to vector<1x32xf32>
    %c24_i32_3 = arith.constant 24 : i32
    %23 = vector.broadcast %c24_i32_3 : i32 to vector<1x32xi32>
    %24 = arith.cmpi sge, %1, %23 : vector<1x32xi32>
    %c32_i32 = arith.constant 32 : i32
    %25 = vector.broadcast %c32_i32 : i32 to vector<1x32xi32>
    %26 = arith.cmpi slt, %1, %25 : vector<1x32xi32>
    %27 = arith.andi %24, %26 : vector<1x32xi1>
    %28 = arith.extui %27 : vector<1x32xi1> to vector<1x32xi32>
    %29 = arith.sitofp %28 : vector<1x32xi32> to vector<1x32xf32>
    %cst = arith.constant 0.353553385 : f32
    %30 = vector.broadcast %cst : f32 to vector<1x32xf32>
    %31 = arith.mulf %8, %30 : vector<1x32xf32>
    %cst_4 = arith.constant 0.353553385 : f32
    %32 = vector.broadcast %cst_4 : f32 to vector<1x32xf32>
    %33 = arith.mulf %15, %32 : vector<1x32xf32>
    %cst_5 = arith.constant 0.353553385 : f32
    %34 = vector.broadcast %cst_5 : f32 to vector<1x32xf32>
    %35 = arith.mulf %22, %34 : vector<1x32xf32>
    %cst_6 = arith.constant 0.353553385 : f32
    %36 = vector.broadcast %cst_6 : f32 to vector<1x32xf32>
    %37 = arith.mulf %29, %36 : vector<1x32xf32>
    %c0_7 = arith.constant 0 : index
    %c0_8 = arith.constant 0 : index
    %c0_9 = arith.constant 0 : index
    %38 = vector.load %arg1[%c0_7, %c0_8, %c0_9] : memref<2x1x288xf32, #tpu.memory_space<vmem>>, vector<1x1x32xf32>
    %39 = vector.shape_cast %38 : vector<1x1x32xf32> to vector<1x32xf32>
    %c0_10 = arith.constant 0 : index
    %c0_11 = arith.constant 0 : index
    %c32 = arith.constant 32 : index
    %40 = vector.load %arg1[%c0_10, %c0_11, %c32] : memref<2x1x288xf32, #tpu.memory_space<vmem>>, vector<1x1x32xf32>
    %41 = vector.shape_cast %40 : vector<1x1x32xf32> to vector<1x32xf32>
    %c0_12 = arith.constant 0 : index
    %c0_13 = arith.constant 0 : index
    %c64 = arith.constant 64 : index
    %42 = vector.load %arg1[%c0_12, %c0_13, %c64] : memref<2x1x288xf32, #tpu.memory_space<vmem>>, vector<1x1x32xf32>
    %43 = vector.shape_cast %42 : vector<1x1x32xf32> to vector<1x32xf32>
    %c0_14 = arith.constant 0 : index
    %c0_15 = arith.constant 0 : index
    %c96 = arith.constant 96 : index
    %44 = vector.load %arg1[%c0_14, %c0_15, %c96] : memref<2x1x288xf32, #tpu.memory_space<vmem>>, vector<1x1x32xf32>
    %45 = vector.shape_cast %44 : vector<1x1x32xf32> to vector<1x32xf32>
    %c0_16 = arith.constant 0 : index
    %c0_17 = arith.constant 0 : index
    %c128 = arith.constant 128 : index
    %46 = vector.load %arg1[%c0_16, %c0_17, %c128] : memref<2x1x288xf32, #tpu.memory_space<vmem>>, vector<1x1x32xf32>
    %47 = vector.shape_cast %46 : vector<1x1x32xf32> to vector<1x32xf32>
    %c0_18 = arith.constant 0 : index
    %c0_19 = arith.constant 0 : index
    %c160 = arith.constant 160 : index
    %48 = vector.load %arg1[%c0_18, %c0_19, %c160] : memref<2x1x288xf32, #tpu.memory_space<vmem>>, vector<1x1x32xf32>
    %49 = vector.shape_cast %48 : vector<1x1x32xf32> to vector<1x32xf32>
    %c0_20 = arith.constant 0 : index
    %c0_21 = arith.constant 0 : index
    %c192 = arith.constant 192 : index
    %50 = vector.load %arg1[%c0_20, %c0_21, %c192] : memref<2x1x288xf32, #tpu.memory_space<vmem>>, vector<1x1x32xf32>
    %51 = vector.shape_cast %50 : vector<1x1x32xf32> to vector<1x32xf32>
    %c0_22 = arith.constant 0 : index
    %c0_23 = arith.constant 0 : index
    %c224 = arith.constant 224 : index
    %52 = vector.load %arg1[%c0_22, %c0_23, %c224] : memref<2x1x288xf32, #tpu.memory_space<vmem>>, vector<1x1x32xf32>
    %53 = vector.shape_cast %52 : vector<1x1x32xf32> to vector<1x32xf32>
    %c0_24 = arith.constant 0 : index
    %c0_25 = arith.constant 0 : index
    %c256 = arith.constant 256 : index
    %54 = vector.load %arg1[%c0_24, %c0_25, %c256] : memref<2x1x288xf32, #tpu.memory_space<vmem>>, vector<1x1x32xf32>
    %55 = vector.shape_cast %54 : vector<1x1x32xf32> to vector<1x32xf32>
    %c0_26 = arith.constant 0 : index
    %c0_27 = arith.constant 0 : index
    %c0_28 = arith.constant 0 : index
    %56 = vector.load %arg2[%c0_26, %c0_27, %c0_28] : memref<2x1x384xf32, #tpu.memory_space<vmem>>, vector<1x1x128xf32>
    %57 = vector.shape_cast %56 : vector<1x1x128xf32> to vector<1x128xf32>
    %c0_29 = arith.constant 0 : index
    %c0_30 = arith.constant 0 : index
    %c128_31 = arith.constant 128 : index
    %58 = vector.load %arg2[%c0_29, %c0_30, %c128_31] : memref<2x1x384xf32, #tpu.memory_space<vmem>>, vector<1x1x256xf32>
    %59 = vector.shape_cast %58 : vector<1x1x256xf32> to vector<1x256xf32>
    %c0_32 = arith.constant 0 : index
    %c0_33 = arith.constant 0 : index
    %c0_34 = arith.constant 0 : index
    %c0_35 = arith.constant 0 : index
    %60 = vector.load %arg4[%c0_32, %c0_33, %c0_34, %c0_35] : memref<2x4x32x32xf32, #tpu.memory_space<vmem>>, vector<1x1x32x32xf32>
    %61 = vector.shape_cast %60 : vector<1x1x32x32xf32> to vector<32x32xf32>
    %c0_36 = arith.constant 0 : index
    %c1 = arith.constant 1 : index
    %c0_37 = arith.constant 0 : index
    %c0_38 = arith.constant 0 : index
    %62 = vector.load %arg4[%c0_36, %c1, %c0_37, %c0_38] : memref<2x4x32x32xf32, #tpu.memory_space<vmem>>, vector<1x1x32x32xf32>
    %63 = vector.shape_cast %62 : vector<1x1x32x32xf32> to vector<32x32xf32>
    %c0_39 = arith.constant 0 : index
    %c2 = arith.constant 2 : index
    %c0_40 = arith.constant 0 : index
    %c0_41 = arith.constant 0 : index
    %64 = vector.load %arg4[%c0_39, %c2, %c0_40, %c0_41] : memref<2x4x32x32xf32, #tpu.memory_space<vmem>>, vector<1x1x32x32xf32>
    %65 = vector.shape_cast %64 : vector<1x1x32x32xf32> to vector<32x32xf32>
    %c0_42 = arith.constant 0 : index
    %c3 = arith.constant 3 : index
    %c0_43 = arith.constant 0 : index
    %c0_44 = arith.constant 0 : index
    %66 = vector.load %arg4[%c0_42, %c3, %c0_43, %c0_44] : memref<2x4x32x32xf32, #tpu.memory_space<vmem>>, vector<1x1x32x32xf32>
    %67 = vector.shape_cast %66 : vector<1x1x32x32xf32> to vector<32x32xf32>
    %cst_45 = arith.constant dense<0.000000e+00> : vector<16xf32>
    %68 = vector.multi_reduction <add>, %0, %cst_45 [1] : vector<16x32xf32> to vector<16xf32>
    %69 = vector.shape_cast %68 : vector<16xf32> to vector<16x1xf32>
    %cst_46 = arith.constant 3.200000e+01 : f32
    %70 = vector.broadcast %cst_46 : f32 to vector<16x1xf32>
    %71 = arith.divf %69, %70 : vector<16x1xf32>
    %72 = vector.broadcast %71 : vector<16x1xf32> to vector<16x32xf32>
    %73 = arith.subf %0, %72 : vector<16x32xf32>
    %74 = arith.mulf %73, %73 : vector<16x32xf32>
    %cst_47 = arith.constant dense<0.000000e+00> : vector<16xf32>
    %75 = vector.multi_reduction <add>, %74, %cst_47 [1] : vector<16x32xf32> to vector<16xf32>
    %76 = vector.shape_cast %75 : vector<16xf32> to vector<16x1xf32>
    %cst_48 = arith.constant 3.200000e+01 : f32
    %77 = vector.broadcast %cst_48 : f32 to vector<16x1xf32>
    %78 = arith.divf %76, %77 : vector<16x1xf32>
    %79 = vector.broadcast %71 : vector<16x1xf32> to vector<16x32xf32>
    %80 = arith.subf %0, %79 : vector<16x32xf32>
    %cst_49 = arith.constant 9.99999974E-6 : f32
    %81 = vector.broadcast %cst_49 : f32 to vector<16x1xf32>
    %82 = arith.addf %78, %81 : vector<16x1xf32>
    %83 = math.rsqrt %82 : vector<16x1xf32>
    %84 = vector.broadcast %83 : vector<16x1xf32> to vector<16x32xf32>
    %85 = arith.mulf %80, %84 : vector<16x32xf32>
    %86 = vector.broadcast %39 : vector<1x32xf32> to vector<16x32xf32>
    %87 = arith.mulf %85, %86 : vector<16x32xf32>
    %88 = vector.broadcast %41 : vector<1x32xf32> to vector<16x32xf32>
    %89 = arith.addf %87, %88 : vector<16x32xf32>
    %c0_50 = arith.constant 0 : index
    %c0_51 = arith.constant 0 : index
    %c0_52 = arith.constant 0 : index
    %90 = vector.load %arg3[%c0_50, %c0_51, %c0_52] : memref<2x8x32xf32, #tpu.memory_space<vmem>>, vector<1x8x32xf32>
    %91 = vector.shape_cast %90 : vector<1x8x32xf32> to vector<8x32xf32>
    %cst_53 = arith.constant dense<0.000000e+00> : vector<8x32xf32>
    %92 = tpu.matmul %91, %61, %cst_53 {dimension_numbers = #tpu.dot_dimension_numbers<[1], [0], [0], [1], [0, 0, 1, 1], [], []>} : vector<8x32xf32>, vector<32x32xf32>, vector<8x32xf32> -> vector<8x32xf32>
    %93 = vector.broadcast %43 : vector<1x32xf32> to vector<8x32xf32>
    %94 = arith.addf %92, %93 : vector<8x32xf32>
    %95 = vector.broadcast %31 : vector<1x32xf32> to vector<8x32xf32>
    %96 = arith.mulf %94, %95 : vector<8x32xf32>
    %97 = vector.broadcast %33 : vector<1x32xf32> to vector<8x32xf32>
    %98 = arith.mulf %94, %97 : vector<8x32xf32>
    %99 = vector.broadcast %35 : vector<1x32xf32> to vector<8x32xf32>
    %100 = arith.mulf %94, %99 : vector<8x32xf32>
    %101 = vector.broadcast %37 : vector<1x32xf32> to vector<8x32xf32>
    %102 = arith.mulf %94, %101 : vector<8x32xf32>
    %103 = tpu.concatenate %96, %98, %100, %102 in 0 : vector<8x32xf32>, vector<8x32xf32>, vector<8x32xf32>, vector<8x32xf32> -> vector<32x32xf32>
    %cst_54 = arith.constant dense<0.000000e+00> : vector<16x32xf32>
    %104 = tpu.matmul %89, %63, %cst_54 {dimension_numbers = #tpu.dot_dimension_numbers<[1], [0], [0], [1], [0, 0, 1, 1], [], []>} : vector<16x32xf32>, vector<32x32xf32>, vector<16x32xf32> -> vector<16x32xf32>
    %105 = vector.broadcast %45 : vector<1x32xf32> to vector<16x32xf32>
    %106 = arith.addf %104, %105 : vector<16x32xf32>
    %cst_55 = arith.constant dense<0.000000e+00> : vector<16x32xf32>
    %107 = tpu.matmul %89, %65, %cst_55 {dimension_numbers = #tpu.dot_dimension_numbers<[1], [0], [0], [1], [0, 0, 1, 1], [], []>} : vector<16x32xf32>, vector<32x32xf32>, vector<16x32xf32> -> vector<16x32xf32>
    %108 = vector.broadcast %47 : vector<1x32xf32> to vector<16x32xf32>
    %109 = arith.addf %107, %108 : vector<16x32xf32>
    %110 = vector.extract_strided_slice %106 {offsets = [0, 0], sizes = [8, 32], strides = [1, 1]} : vector<16x32xf32> to vector<8x32xf32>
    %111 = vector.extract_strided_slice %109 {offsets = [0, 0], sizes = [8, 32], strides = [1, 1]} : vector<16x32xf32> to vector<8x32xf32>
    %cst_56 = arith.constant dense<0.000000e+00> : vector<32x8xf32>
    %112 = tpu.matmul %103, %110, %cst_56 {dimension_numbers = #tpu.dot_dimension_numbers<[1], [1], [0], [0], [0, 0, 1, 0], [], []>} : vector<32x32xf32>, vector<8x32xf32>, vector<32x8xf32> -> vector<32x8xf32>
    %cst_57 = arith.constant dense<0xFF800000> : vector<32xf32>
    %113 = vector.multi_reduction <maximumf>, %112, %cst_57 [1] : vector<32x8xf32> to vector<32xf32>
    %114 = vector.shape_cast %113 : vector<32xf32> to vector<32x1xf32>
    %115 = vector.broadcast %114 : vector<32x1xf32> to vector<32x8xf32>
    %116 = arith.subf %112, %115 : vector<32x8xf32>
    %117 = math.exp %116 : vector<32x8xf32>
    %cst_58 = arith.constant dense<0.000000e+00> : vector<32xf32>
    %118 = vector.multi_reduction <add>, %117, %cst_58 [1] : vector<32x8xf32> to vector<32xf32>
    %119 = vector.shape_cast %118 : vector<32xf32> to vector<32x1xf32>
    %120 = vector.broadcast %119 : vector<32x1xf32> to vector<32x8xf32>
    %121 = arith.divf %117, %120 : vector<32x8xf32>
    %cst_59 = arith.constant dense<0.000000e+00> : vector<32x32xf32>
    %122 = tpu.matmul %121, %111, %cst_59 {dimension_numbers = #tpu.dot_dimension_numbers<[1], [0], [0], [1], [0, 0, 1, 1], [], []>} : vector<32x8xf32>, vector<8x32xf32>, vector<32x32xf32> -> vector<32x32xf32>
    %123 = vector.extract_strided_slice %122 {offsets = [0, 0], sizes = [8, 32], strides = [1, 1]} : vector<32x32xf32> to vector<8x32xf32>
    %124 = vector.broadcast %8 : vector<1x32xf32> to vector<8x32xf32>
    %125 = arith.mulf %123, %124 : vector<8x32xf32>
    %126 = vector.extract_strided_slice %122 {offsets = [8, 0], sizes = [8, 32], strides = [1, 1]} : vector<32x32xf32> to vector<8x32xf32>
    %127 = vector.broadcast %15 : vector<1x32xf32> to vector<8x32xf32>
    %128 = arith.mulf %126, %127 : vector<8x32xf32>
    %129 = vector.extract_strided_slice %122 {offsets = [16, 0], sizes = [8, 32], strides = [1, 1]} : vector<32x32xf32> to vector<8x32xf32>
    %130 = vector.broadcast %22 : vector<1x32xf32> to vector<8x32xf32>
    %131 = arith.mulf %129, %130 : vector<8x32xf32>
    %132 = vector.extract_strided_slice %122 {offsets = [24, 0], sizes = [8, 32], strides = [1, 1]} : vector<32x32xf32> to vector<8x32xf32>
    %133 = vector.broadcast %29 : vector<1x32xf32> to vector<8x32xf32>
    %134 = arith.mulf %132, %133 : vector<8x32xf32>
    %135 = arith.addf %125, %128 : vector<8x32xf32>
    %136 = arith.addf %131, %134 : vector<8x32xf32>
    %137 = arith.addf %135, %136 : vector<8x32xf32>
    %cst_60 = arith.constant dense<0.000000e+00> : vector<8x32xf32>
    %138 = tpu.matmul %137, %67, %cst_60 {dimension_numbers = #tpu.dot_dimension_numbers<[1], [0], [0], [1], [0, 0, 1, 1], [], []>} : vector<8x32xf32>, vector<32x32xf32>, vector<8x32xf32> -> vector<8x32xf32>
    %139 = vector.broadcast %49 : vector<1x32xf32> to vector<8x32xf32>
    %140 = arith.addf %138, %139 : vector<8x32xf32>
    %141 = vector.extract_strided_slice %140 {offsets = [0, 0], sizes = [1, 32], strides = [1, 1]} : vector<8x32xf32> to vector<1x32xf32>
    %c0_61 = arith.constant 0 : index
    %c0_62 = arith.constant 0 : index
    %142 = vector.load %arg11[%c0_61, %c0_62] : memref<2x256xf32, #tpu.memory_space<vmem>>, vector<1x32xf32>
    tpu.vector_store %arg11[%c0_61, %c0_62], %141 {strides = array<i32>} : memref<2x256xf32, #tpu.memory_space<vmem>>, vector<1x32xf32>,
    %143 = vector.extract_strided_slice %140 {offsets = [1, 0], sizes = [1, 32], strides = [1, 1]} : vector<8x32xf32> to vector<1x32xf32>
    %c0_63 = arith.constant 0 : index
    %c32_64 = arith.constant 32 : index
    %144 = vector.load %arg11[%c0_63, %c32_64] : memref<2x256xf32, #tpu.memory_space<vmem>>, vector<1x32xf32>
    tpu.vector_store %arg11[%c0_63, %c32_64], %143 {strides = array<i32>} : memref<2x256xf32, #tpu.memory_space<vmem>>, vector<1x32xf32>,
    %145 = vector.extract_strided_slice %140 {offsets = [2, 0], sizes = [1, 32], strides = [1, 1]} : vector<8x32xf32> to vector<1x32xf32>
    %c0_65 = arith.constant 0 : index
    %c64_66 = arith.constant 64 : index
    %146 = vector.load %arg11[%c0_65, %c64_66] : memref<2x256xf32, #tpu.memory_space<vmem>>, vector<1x32xf32>
    tpu.vector_store %arg11[%c0_65, %c64_66], %145 {strides = array<i32>} : memref<2x256xf32, #tpu.memory_space<vmem>>, vector<1x32xf32>,
    %147 = vector.extract_strided_slice %140 {offsets = [3, 0], sizes = [1, 32], strides = [1, 1]} : vector<8x32xf32> to vector<1x32xf32>
    %c0_67 = arith.constant 0 : index
    %c96_68 = arith.constant 96 : index
    %148 = vector.load %arg11[%c0_67, %c96_68] : memref<2x256xf32, #tpu.memory_space<vmem>>, vector<1x32xf32>
    tpu.vector_store %arg11[%c0_67, %c96_68], %147 {strides = array<i32>} : memref<2x256xf32, #tpu.memory_space<vmem>>, vector<1x32xf32>,
    %149 = vector.extract_strided_slice %140 {offsets = [4, 0], sizes = [1, 32], strides = [1, 1]} : vector<8x32xf32> to vector<1x32xf32>
    %c0_69 = arith.constant 0 : index
    %c128_70 = arith.constant 128 : index
    %150 = vector.load %arg11[%c0_69, %c128_70] : memref<2x256xf32, #tpu.memory_space<vmem>>, vector<1x32xf32>
    tpu.vector_store %arg11[%c0_69, %c128_70], %149 {strides = array<i32>} : memref<2x256xf32, #tpu.memory_space<vmem>>, vector<1x32xf32>,
    %151 = vector.extract_strided_slice %140 {offsets = [5, 0], sizes = [1, 32], strides = [1, 1]} : vector<8x32xf32> to vector<1x32xf32>
    %c0_71 = arith.constant 0 : index
    %c160_72 = arith.constant 160 : index
    %152 = vector.load %arg11[%c0_71, %c160_72] : memref<2x256xf32, #tpu.memory_space<vmem>>, vector<1x32xf32>
    tpu.vector_store %arg11[%c0_71, %c160_72], %151 {strides = array<i32>} : memref<2x256xf32, #tpu.memory_space<vmem>>, vector<1x32xf32>,
    %153 = vector.extract_strided_slice %140 {offsets = [6, 0], sizes = [1, 32], strides = [1, 1]} : vector<8x32xf32> to vector<1x32xf32>
    %c0_73 = arith.constant 0 : index
    %c192_74 = arith.constant 192 : index
    %154 = vector.load %arg11[%c0_73, %c192_74] : memref<2x256xf32, #tpu.memory_space<vmem>>, vector<1x32xf32>
    tpu.vector_store %arg11[%c0_73, %c192_74], %153 {strides = array<i32>} : memref<2x256xf32, #tpu.memory_space<vmem>>, vector<1x32xf32>,
    %155 = vector.extract_strided_slice %140 {offsets = [7, 0], sizes = [1, 32], strides = [1, 1]} : vector<8x32xf32> to vector<1x32xf32>
    %c0_75 = arith.constant 0 : index
    %c224_76 = arith.constant 224 : index
    %156 = vector.load %arg11[%c0_75, %c224_76] : memref<2x256xf32, #tpu.memory_space<vmem>>, vector<1x32xf32>
    tpu.vector_store %arg11[%c0_75, %c224_76], %155 {strides = array<i32>} : memref<2x256xf32, #tpu.memory_space<vmem>>, vector<1x32xf32>,
    %157 = vector.extract_strided_slice %106 {offsets = [8, 0], sizes = [8, 32], strides = [1, 1]} : vector<16x32xf32> to vector<8x32xf32>
    %158 = vector.extract_strided_slice %109 {offsets = [8, 0], sizes = [8, 32], strides = [1, 1]} : vector<16x32xf32> to vector<8x32xf32>
    %cst_77 = arith.constant dense<0.000000e+00> : vector<32x8xf32>
    %159 = tpu.matmul %103, %157, %cst_77 {dimension_numbers = #tpu.dot_dimension_numbers<[1], [1], [0], [0], [0, 0, 1, 0], [], []>} : vector<32x32xf32>, vector<8x32xf32>, vector<32x8xf32> -> vector<32x8xf32>
    %cst_78 = arith.constant dense<0xFF800000> : vector<32xf32>
    %160 = vector.multi_reduction <maximumf>, %159, %cst_78 [1] : vector<32x8xf32> to vector<32xf32>
    %161 = vector.shape_cast %160 : vector<32xf32> to vector<32x1xf32>
    %162 = vector.broadcast %161 : vector<32x1xf32> to vector<32x8xf32>
    %163 = arith.subf %159, %162 : vector<32x8xf32>
    %164 = math.exp %163 : vector<32x8xf32>
    %cst_79 = arith.constant dense<0.000000e+00> : vector<32xf32>
    %165 = vector.multi_reduction <add>, %164, %cst_79 [1] : vector<32x8xf32> to vector<32xf32>
    %166 = vector.shape_cast %165 : vector<32xf32> to vector<32x1xf32>
    %167 = vector.broadcast %166 : vector<32x1xf32> to vector<32x8xf32>
    %168 = arith.divf %164, %167 : vector<32x8xf32>
    %cst_80 = arith.constant dense<0.000000e+00> : vector<32x32xf32>
    %169 = tpu.matmul %168, %158, %cst_80 {dimension_numbers = #tpu.dot_dimension_numbers<[1], [0], [0], [1], [0, 0, 1, 1], [], []>} : vector<32x8xf32>, vector<8x32xf32>, vector<32x32xf32> -> vector<32x32xf32>
    %170 = vector.extract_strided_slice %169 {offsets = [0, 0], sizes = [8, 32], strides = [1, 1]} : vector<32x32xf32> to vector<8x32xf32>
    %171 = vector.broadcast %8 : vector<1x32xf32> to vector<8x32xf32>
    %172 = arith.mulf %170, %171 : vector<8x32xf32>
    %173 = vector.extract_strided_slice %169 {offsets = [8, 0], sizes = [8, 32], strides = [1, 1]} : vector<32x32xf32> to vector<8x32xf32>
    %174 = vector.broadcast %15 : vector<1x32xf32> to vector<8x32xf32>
    %175 = arith.mulf %173, %174 : vector<8x32xf32>
    %176 = vector.extract_strided_slice %169 {offsets = [16, 0], sizes = [8, 32], strides = [1, 1]} : vector<32x32xf32> to vector<8x32xf32>
    %177 = vector.broadcast %22 : vector<1x32xf32> to vector<8x32xf32>
    %178 = arith.mulf %176, %177 : vector<8x32xf32>
    %179 = vector.extract_strided_slice %169 {offsets = [24, 0], sizes = [8, 32], strides = [1, 1]} : vector<32x32xf32> to vector<8x32xf32>
    %180 = vector.broadcast %29 : vector<1x32xf32> to vector<8x32xf32>
    %181 = arith.mulf %179, %180 : vector<8x32xf32>
    %182 = arith.addf %172, %175 : vector<8x32xf32>
    %183 = arith.addf %178, %181 : vector<8x32xf32>
    %184 = arith.addf %182, %183 : vector<8x32xf32>
    %cst_81 = arith.constant dense<0.000000e+00> : vector<8x32xf32>
    %185 = tpu.matmul %184, %67, %cst_81 {dimension_numbers = #tpu.dot_dimension_numbers<[1], [0], [0], [1], [0, 0, 1, 1], [], []>} : vector<8x32xf32>, vector<32x32xf32>, vector<8x32xf32> -> vector<8x32xf32>
    %186 = vector.broadcast %49 : vector<1x32xf32> to vector<8x32xf32>
    %187 = arith.addf %185, %186 : vector<8x32xf32>
    %188 = vector.extract_strided_slice %187 {offsets = [0, 0], sizes = [1, 32], strides = [1, 1]} : vector<8x32xf32> to vector<1x32xf32>
    %c1_82 = arith.constant 1 : index
    %c0_83 = arith.constant 0 : index
    %189 = vector.load %arg11[%c1_82, %c0_83] : memref<2x256xf32, #tpu.memory_space<vmem>>, vector<1x32xf32>
    tpu.vector_store %arg11[%c1_82, %c0_83], %188 {strides = array<i32>} : memref<2x256xf32, #tpu.memory_space<vmem>>, vector<1x32xf32>,
    %190 = vector.extract_strided_slice %187 {offsets = [1, 0], sizes = [1, 32], strides = [1, 1]} : vector<8x32xf32> to vector<1x32xf32>
    %c1_84 = arith.constant 1 : index
    %c32_85 = arith.constant 32 : index
    %191 = vector.load %arg11[%c1_84, %c32_85] : memref<2x256xf32, #tpu.memory_space<vmem>>, vector<1x32xf32>
    tpu.vector_store %arg11[%c1_84, %c32_85], %190 {strides = array<i32>} : memref<2x256xf32, #tpu.memory_space<vmem>>, vector<1x32xf32>,
    %192 = vector.extract_strided_slice %187 {offsets = [2, 0], sizes = [1, 32], strides = [1, 1]} : vector<8x32xf32> to vector<1x32xf32>
    %c1_86 = arith.constant 1 : index
    %c64_87 = arith.constant 64 : index
    %193 = vector.load %arg11[%c1_86, %c64_87] : memref<2x256xf32, #tpu.memory_space<vmem>>, vector<1x32xf32>
    tpu.vector_store %arg11[%c1_86, %c64_87], %192 {strides = array<i32>} : memref<2x256xf32, #tpu.memory_space<vmem>>, vector<1x32xf32>,
    %194 = vector.extract_strided_slice %187 {offsets = [3, 0], sizes = [1, 32], strides = [1, 1]} : vector<8x32xf32> to vector<1x32xf32>
    %c1_88 = arith.constant 1 : index
    %c96_89 = arith.constant 96 : index
    %195 = vector.load %arg11[%c1_88, %c96_89] : memref<2x256xf32, #tpu.memory_space<vmem>>, vector<1x32xf32>
    tpu.vector_store %arg11[%c1_88, %c96_89], %194 {strides = array<i32>} : memref<2x256xf32, #tpu.memory_space<vmem>>, vector<1x32xf32>,
    %196 = vector.extract_strided_slice %187 {offsets = [4, 0], sizes = [1, 32], strides = [1, 1]} : vector<8x32xf32> to vector<1x32xf32>
    %c1_90 = arith.constant 1 : index
    %c128_91 = arith.constant 128 : index
    %197 = vector.load %arg11[%c1_90, %c128_91] : memref<2x256xf32, #tpu.memory_space<vmem>>, vector<1x32xf32>
    tpu.vector_store %arg11[%c1_90, %c128_91], %196 {strides = array<i32>} : memref<2x256xf32, #tpu.memory_space<vmem>>, vector<1x32xf32>,
    %198 = vector.extract_strided_slice %187 {offsets = [5, 0], sizes = [1, 32], strides = [1, 1]} : vector<8x32xf32> to vector<1x32xf32>
    %c1_92 = arith.constant 1 : index
    %c160_93 = arith.constant 160 : index
    %199 = vector.load %arg11[%c1_92, %c160_93] : memref<2x256xf32, #tpu.memory_space<vmem>>, vector<1x32xf32>
    tpu.vector_store %arg11[%c1_92, %c160_93], %198 {strides = array<i32>} : memref<2x256xf32, #tpu.memory_space<vmem>>, vector<1x32xf32>,
    %200 = vector.extract_strided_slice %187 {offsets = [6, 0], sizes = [1, 32], strides = [1, 1]} : vector<8x32xf32> to vector<1x32xf32>
    %c1_94 = arith.constant 1 : index
    %c192_95 = arith.constant 192 : index
    %201 = vector.load %arg11[%c1_94, %c192_95] : memref<2x256xf32, #tpu.memory_space<vmem>>, vector<1x32xf32>
    tpu.vector_store %arg11[%c1_94, %c192_95], %200 {strides = array<i32>} : memref<2x256xf32, #tpu.memory_space<vmem>>, vector<1x32xf32>,
    %202 = vector.extract_strided_slice %187 {offsets = [7, 0], sizes = [1, 32], strides = [1, 1]} : vector<8x32xf32> to vector<1x32xf32>
    %c1_96 = arith.constant 1 : index
    %c224_97 = arith.constant 224 : index
    %203 = vector.load %arg11[%c1_96, %c224_97] : memref<2x256xf32, #tpu.memory_space<vmem>>, vector<1x32xf32>
    tpu.vector_store %arg11[%c1_96, %c224_97], %202 {strides = array<i32>} : memref<2x256xf32, #tpu.memory_space<vmem>>, vector<1x32xf32>,
    %c0_98 = arith.constant 0 : index
    %c0_99 = arith.constant 0 : index
    %204 = vector.load %arg11[%c0_98, %c0_99] : memref<2x256xf32, #tpu.memory_space<vmem>>, vector<2x256xf32>
    %c0_100 = arith.constant 0 : index
    %c0_101 = arith.constant 0 : index
    %c0_102 = arith.constant 0 : index
    %205 = vector.load %arg5[%c0_100, %c0_101, %c0_102] : memref<2x256x256xf32, #tpu.memory_space<vmem>>, vector<1x256x256xf32>
    %206 = vector.shape_cast %205 : vector<1x256x256xf32> to vector<256x256xf32>
    %cst_103 = arith.constant dense<0.000000e+00> : vector<2x256xf32>
    %207 = tpu.matmul %204, %206, %cst_103 {dimension_numbers = #tpu.dot_dimension_numbers<[1], [0], [0], [1], [0, 0, 1, 1], [], []>} : vector<2x256xf32>, vector<256x256xf32>, vector<2x256xf32> -> vector<2x256xf32>
    %208 = vector.broadcast %59 : vector<1x256xf32> to vector<2x256xf32>
    %209 = arith.addf %207, %208 : vector<2x256xf32>
    %c0_104 = arith.constant 0 : index
    %c0_105 = arith.constant 0 : index
    %210 = vector.load %arg12[%c0_104, %c0_105] : memref<2x256xf32, #tpu.memory_space<vmem>>, vector<2x256xf32>
    tpu.vector_store %arg12[%c0_104, %c0_105], %209 {strides = array<i32>} : memref<2x256xf32, #tpu.memory_space<vmem>>, vector<2x256xf32>,
    %c0_106 = arith.constant 0 : index
    %c0_107 = arith.constant 0 : index
    %211 = vector.load %arg12[%c0_106, %c0_107] : memref<2x256xf32, #tpu.memory_space<vmem>>, vector<1x32xf32>
    %c0_108 = arith.constant 0 : index
    %c0_109 = arith.constant 0 : index
    %212 = vector.load %arg13[%c0_108, %c0_109] : memref<16x32xf32, #tpu.memory_space<vmem>>, vector<1x32xf32>
    tpu.vector_store %arg13[%c0_108, %c0_109], %211 {strides = array<i32>} : memref<16x32xf32, #tpu.memory_space<vmem>>, vector<1x32xf32>,
    %c0_110 = arith.constant 0 : index
    %c32_111 = arith.constant 32 : index
    %213 = vector.load %arg12[%c0_110, %c32_111] : memref<2x256xf32, #tpu.memory_space<vmem>>, vector<1x32xf32>
    %c1_112 = arith.constant 1 : index
    %c0_113 = arith.constant 0 : index
    %214 = vector.load %arg13[%c1_112, %c0_113] : memref<16x32xf32, #tpu.memory_space<vmem>>, vector<1x32xf32>
    tpu.vector_store %arg13[%c1_112, %c0_113], %213 {strides = array<i32>} : memref<16x32xf32, #tpu.memory_space<vmem>>, vector<1x32xf32>,
    %c0_114 = arith.constant 0 : index
    %c64_115 = arith.constant 64 : index
    %215 = vector.load %arg12[%c0_114, %c64_115] : memref<2x256xf32, #tpu.memory_space<vmem>>, vector<1x32xf32>
    %c2_116 = arith.constant 2 : index
    %c0_117 = arith.constant 0 : index
    %216 = vector.load %arg13[%c2_116, %c0_117] : memref<16x32xf32, #tpu.memory_space<vmem>>, vector<1x32xf32>
    tpu.vector_store %arg13[%c2_116, %c0_117], %215 {strides = array<i32>} : memref<16x32xf32, #tpu.memory_space<vmem>>, vector<1x32xf32>,
    %c0_118 = arith.constant 0 : index
    %c96_119 = arith.constant 96 : index
    %217 = vector.load %arg12[%c0_118, %c96_119] : memref<2x256xf32, #tpu.memory_space<vmem>>, vector<1x32xf32>
    %c3_120 = arith.constant 3 : index
    %c0_121 = arith.constant 0 : index
    %218 = vector.load %arg13[%c3_120, %c0_121] : memref<16x32xf32, #tpu.memory_space<vmem>>, vector<1x32xf32>
    tpu.vector_store %arg13[%c3_120, %c0_121], %217 {strides = array<i32>} : memref<16x32xf32, #tpu.memory_space<vmem>>, vector<1x32xf32>,
    %c0_122 = arith.constant 0 : index
    %c128_123 = arith.constant 128 : index
    %219 = vector.load %arg12[%c0_122, %c128_123] : memref<2x256xf32, #tpu.memory_space<vmem>>, vector<1x32xf32>
    %c4 = arith.constant 4 : index
    %c0_124 = arith.constant 0 : index
    %220 = vector.load %arg13[%c4, %c0_124] : memref<16x32xf32, #tpu.memory_space<vmem>>, vector<1x32xf32>
    tpu.vector_store %arg13[%c4, %c0_124], %219 {strides = array<i32>} : memref<16x32xf32, #tpu.memory_space<vmem>>, vector<1x32xf32>,
    %c0_125 = arith.constant 0 : index
    %c160_126 = arith.constant 160 : index
    %221 = vector.load %arg12[%c0_125, %c160_126] : memref<2x256xf32, #tpu.memory_space<vmem>>, vector<1x32xf32>
    %c5 = arith.constant 5 : index
    %c0_127 = arith.constant 0 : index
    %222 = vector.load %arg13[%c5, %c0_127] : memref<16x32xf32, #tpu.memory_space<vmem>>, vector<1x32xf32>
    tpu.vector_store %arg13[%c5, %c0_127], %221 {strides = array<i32>} : memref<16x32xf32, #tpu.memory_space<vmem>>, vector<1x32xf32>,
    %c0_128 = arith.constant 0 : index
    %c192_129 = arith.constant 192 : index
    %223 = vector.load %arg12[%c0_128, %c192_129] : memref<2x256xf32, #tpu.memory_space<vmem>>, vector<1x32xf32>
    %c6 = arith.constant 6 : index
    %c0_130 = arith.constant 0 : index
    %224 = vector.load %arg13[%c6, %c0_130] : memref<16x32xf32, #tpu.memory_space<vmem>>, vector<1x32xf32>
    tpu.vector_store %arg13[%c6, %c0_130], %223 {strides = array<i32>} : memref<16x32xf32, #tpu.memory_space<vmem>>, vector<1x32xf32>,
    %c0_131 = arith.constant 0 : index
    %c224_132 = arith.constant 224 : index
    %225 = vector.load %arg12[%c0_131, %c224_132] : memref<2x256xf32, #tpu.memory_space<vmem>>, vector<1x32xf32>
    %c7 = arith.constant 7 : index
    %c0_133 = arith.constant 0 : index
    %226 = vector.load %arg13[%c7, %c0_133] : memref<16x32xf32, #tpu.memory_space<vmem>>, vector<1x32xf32>
    tpu.vector_store %arg13[%c7, %c0_133], %225 {strides = array<i32>} : memref<16x32xf32, #tpu.memory_space<vmem>>, vector<1x32xf32>,
    %c1_134 = arith.constant 1 : index
    %c0_135 = arith.constant 0 : index
    %227 = vector.load %arg12[%c1_134, %c0_135] : memref<2x256xf32, #tpu.memory_space<vmem>>, vector<1x32xf32>
    %c8 = arith.constant 8 : index
    %c0_136 = arith.constant 0 : index
    %228 = vector.load %arg13[%c8, %c0_136] : memref<16x32xf32, #tpu.memory_space<vmem>>, vector<1x32xf32>
    tpu.vector_store %arg13[%c8, %c0_136], %227 {strides = array<i32>} : memref<16x32xf32, #tpu.memory_space<vmem>>, vector<1x32xf32>,
    %c1_137 = arith.constant 1 : index
    %c32_138 = arith.constant 32 : index
    %229 = vector.load %arg12[%c1_137, %c32_138] : memref<2x256xf32, #tpu.memory_space<vmem>>, vector<1x32xf32>
    %c9 = arith.constant 9 : index
    %c0_139 = arith.constant 0 : index
    %230 = vector.load %arg13[%c9, %c0_139] : memref<16x32xf32, #tpu.memory_space<vmem>>, vector<1x32xf32>
    tpu.vector_store %arg13[%c9, %c0_139], %229 {strides = array<i32>} : memref<16x32xf32, #tpu.memory_space<vmem>>, vector<1x32xf32>,
    %c1_140 = arith.constant 1 : index
    %c64_141 = arith.constant 64 : index
    %231 = vector.load %arg12[%c1_140, %c64_141] : memref<2x256xf32, #tpu.memory_space<vmem>>, vector<1x32xf32>
    %c10 = arith.constant 10 : index
    %c0_142 = arith.constant 0 : index
    %232 = vector.load %arg13[%c10, %c0_142] : memref<16x32xf32, #tpu.memory_space<vmem>>, vector<1x32xf32>
    tpu.vector_store %arg13[%c10, %c0_142], %231 {strides = array<i32>} : memref<16x32xf32, #tpu.memory_space<vmem>>, vector<1x32xf32>,
    %c1_143 = arith.constant 1 : index
    %c96_144 = arith.constant 96 : index
    %233 = vector.load %arg12[%c1_143, %c96_144] : memref<2x256xf32, #tpu.memory_space<vmem>>, vector<1x32xf32>
    %c11 = arith.constant 11 : index
    %c0_145 = arith.constant 0 : index
    %234 = vector.load %arg13[%c11, %c0_145] : memref<16x32xf32, #tpu.memory_space<vmem>>, vector<1x32xf32>
    tpu.vector_store %arg13[%c11, %c0_145], %233 {strides = array<i32>} : memref<16x32xf32, #tpu.memory_space<vmem>>, vector<1x32xf32>,
    %c1_146 = arith.constant 1 : index
    %c128_147 = arith.constant 128 : index
    %235 = vector.load %arg12[%c1_146, %c128_147] : memref<2x256xf32, #tpu.memory_space<vmem>>, vector<1x32xf32>
    %c12 = arith.constant 12 : index
    %c0_148 = arith.constant 0 : index
    %236 = vector.load %arg13[%c12, %c0_148] : memref<16x32xf32, #tpu.memory_space<vmem>>, vector<1x32xf32>
    tpu.vector_store %arg13[%c12, %c0_148], %235 {strides = array<i32>} : memref<16x32xf32, #tpu.memory_space<vmem>>, vector<1x32xf32>,
    %c1_149 = arith.constant 1 : index
    %c160_150 = arith.constant 160 : index
    %237 = vector.load %arg12[%c1_149, %c160_150] : memref<2x256xf32, #tpu.memory_space<vmem>>, vector<1x32xf32>
    %c13 = arith.constant 13 : index
    %c0_151 = arith.constant 0 : index
    %238 = vector.load %arg13[%c13, %c0_151] : memref<16x32xf32, #tpu.memory_space<vmem>>, vector<1x32xf32>
    tpu.vector_store %arg13[%c13, %c0_151], %237 {strides = array<i32>} : memref<16x32xf32, #tpu.memory_space<vmem>>, vector<1x32xf32>,
    %c1_152 = arith.constant 1 : index
    %c192_153 = arith.constant 192 : index
    %239 = vector.load %arg12[%c1_152, %c192_153] : memref<2x256xf32, #tpu.memory_space<vmem>>, vector<1x32xf32>
    %c14 = arith.constant 14 : index
    %c0_154 = arith.constant 0 : index
    %240 = vector.load %arg13[%c14, %c0_154] : memref<16x32xf32, #tpu.memory_space<vmem>>, vector<1x32xf32>
    tpu.vector_store %arg13[%c14, %c0_154], %239 {strides = array<i32>} : memref<16x32xf32, #tpu.memory_space<vmem>>, vector<1x32xf32>,
    %c1_155 = arith.constant 1 : index
    %c224_156 = arith.constant 224 : index
    %241 = vector.load %arg12[%c1_155, %c224_156] : memref<2x256xf32, #tpu.memory_space<vmem>>, vector<1x32xf32>
    %c15 = arith.constant 15 : index
    %c0_157 = arith.constant 0 : index
    %242 = vector.load %arg13[%c15, %c0_157] : memref<16x32xf32, #tpu.memory_space<vmem>>, vector<1x32xf32>
    tpu.vector_store %arg13[%c15, %c0_157], %241 {strides = array<i32>} : memref<16x32xf32, #tpu.memory_space<vmem>>, vector<1x32xf32>,
    %c0_158 = arith.constant 0 : index
    %c0_159 = arith.constant 0 : index
    %243 = vector.load %arg13[%c0_158, %c0_159] : memref<16x32xf32, #tpu.memory_space<vmem>>, vector<16x32xf32>
    %244 = arith.addf %0, %243 : vector<16x32xf32>
    %cst_160 = arith.constant dense<0.000000e+00> : vector<16xf32>
    %245 = vector.multi_reduction <add>, %244, %cst_160 [1] : vector<16x32xf32> to vector<16xf32>
    %246 = vector.shape_cast %245 : vector<16xf32> to vector<16x1xf32>
    %cst_161 = arith.constant 3.200000e+01 : f32
    %247 = vector.broadcast %cst_161 : f32 to vector<16x1xf32>
    %248 = arith.divf %246, %247 : vector<16x1xf32>
    %249 = vector.broadcast %248 : vector<16x1xf32> to vector<16x32xf32>
    %250 = arith.subf %244, %249 : vector<16x32xf32>
    %251 = arith.mulf %250, %250 : vector<16x32xf32>
    %cst_162 = arith.constant dense<0.000000e+00> : vector<16xf32>
    %252 = vector.multi_reduction <add>, %251, %cst_162 [1] : vector<16x32xf32> to vector<16xf32>
    %253 = vector.shape_cast %252 : vector<16xf32> to vector<16x1xf32>
    %cst_163 = arith.constant 3.200000e+01 : f32
    %254 = vector.broadcast %cst_163 : f32 to vector<16x1xf32>
    %255 = arith.divf %253, %254 : vector<16x1xf32>
    %256 = vector.broadcast %248 : vector<16x1xf32> to vector<16x32xf32>
    %257 = arith.subf %244, %256 : vector<16x32xf32>
    %cst_164 = arith.constant 9.99999974E-6 : f32
    %258 = vector.broadcast %cst_164 : f32 to vector<16x1xf32>
    %259 = arith.addf %255, %258 : vector<16x1xf32>
    %260 = math.rsqrt %259 : vector<16x1xf32>
    %261 = vector.broadcast %260 : vector<16x1xf32> to vector<16x32xf32>
    %262 = arith.mulf %257, %261 : vector<16x32xf32>
    %263 = vector.broadcast %51 : vector<1x32xf32> to vector<16x32xf32>
    %264 = arith.mulf %262, %263 : vector<16x32xf32>
    %265 = vector.broadcast %53 : vector<1x32xf32> to vector<16x32xf32>
    %266 = arith.addf %264, %265 : vector<16x32xf32>
    %c0_165 = arith.constant 0 : index
    %c0_166 = arith.constant 0 : index
    %c0_167 = arith.constant 0 : index
    %267 = vector.load %arg6[%c0_165, %c0_166, %c0_167] : memref<2x32x128xf32, #tpu.memory_space<vmem>>, vector<1x32x128xf32>
    %268 = vector.shape_cast %267 : vector<1x32x128xf32> to vector<32x128xf32>
    %cst_168 = arith.constant dense<0.000000e+00> : vector<16x128xf32>
    %269 = tpu.matmul %266, %268, %cst_168 {dimension_numbers = #tpu.dot_dimension_numbers<[1], [0], [0], [1], [0, 0, 1, 1], [], []>} : vector<16x32xf32>, vector<32x128xf32>, vector<16x128xf32> -> vector<16x128xf32>
    %270 = vector.broadcast %57 : vector<1x128xf32> to vector<16x128xf32>
    %271 = arith.addf %269, %270 : vector<16x128xf32>
    %cst_169 = arith.constant 0.000000e+00 : f32
    %272 = vector.broadcast %cst_169 : f32 to vector<16x128xf32>
    %273 = arith.maximumf %271, %272 : vector<16x128xf32>
    %c0_170 = arith.constant 0 : index
    %c0_171 = arith.constant 0 : index
    %c0_172 = arith.constant 0 : index
    %274 = vector.load %arg7[%c0_170, %c0_171, %c0_172] : memref<2x128x32xf32, #tpu.memory_space<vmem>>, vector<1x128x32xf32>
    %275 = vector.shape_cast %274 : vector<1x128x32xf32> to vector<128x32xf32>
    %cst_173 = arith.constant dense<0.000000e+00> : vector<16x32xf32>
    %276 = tpu.matmul %273, %275, %cst_173 {dimension_numbers = #tpu.dot_dimension_numbers<[1], [0], [0], [1], [0, 0, 1, 1], [], []>} : vector<16x128xf32>, vector<128x32xf32>, vector<16x32xf32> -> vector<16x32xf32>
    %277 = vector.broadcast %55 : vector<1x32xf32> to vector<16x32xf32>
    %278 = arith.addf %276, %277 : vector<16x32xf32>
    %279 = arith.addf %244, %278 : vector<16x32xf32>
    %c1_174 = arith.constant 1 : index
    %c0_175 = arith.constant 0 : index
    %c0_176 = arith.constant 0 : index
    %280 = vector.load %arg1[%c1_174, %c0_175, %c0_176] : memref<2x1x288xf32, #tpu.memory_space<vmem>>, vector<1x1x32xf32>
    %281 = vector.shape_cast %280 : vector<1x1x32xf32> to vector<1x32xf32>
    %c1_177 = arith.constant 1 : index
    %c0_178 = arith.constant 0 : index
    %c32_179 = arith.constant 32 : index
    %282 = vector.load %arg1[%c1_177, %c0_178, %c32_179] : memref<2x1x288xf32, #tpu.memory_space<vmem>>, vector<1x1x32xf32>
    %283 = vector.shape_cast %282 : vector<1x1x32xf32> to vector<1x32xf32>
    %c1_180 = arith.constant 1 : index
    %c0_181 = arith.constant 0 : index
    %c64_182 = arith.constant 64 : index
    %284 = vector.load %arg1[%c1_180, %c0_181, %c64_182] : memref<2x1x288xf32, #tpu.memory_space<vmem>>, vector<1x1x32xf32>
    %285 = vector.shape_cast %284 : vector<1x1x32xf32> to vector<1x32xf32>
    %c1_183 = arith.constant 1 : index
    %c0_184 = arith.constant 0 : index
    %c96_185 = arith.constant 96 : index
    %286 = vector.load %arg1[%c1_183, %c0_184, %c96_185] : memref<2x1x288xf32, #tpu.memory_space<vmem>>, vector<1x1x32xf32>
    %287 = vector.shape_cast %286 : vector<1x1x32xf32> to vector<1x32xf32>
    %c1_186 = arith.constant 1 : index
    %c0_187 = arith.constant 0 : index
    %c128_188 = arith.constant 128 : index
    %288 = vector.load %arg1[%c1_186, %c0_187, %c128_188] : memref<2x1x288xf32, #tpu.memory_space<vmem>>, vector<1x1x32xf32>
    %289 = vector.shape_cast %288 : vector<1x1x32xf32> to vector<1x32xf32>
    %c1_189 = arith.constant 1 : index
    %c0_190 = arith.constant 0 : index
    %c160_191 = arith.constant 160 : index
    %290 = vector.load %arg1[%c1_189, %c0_190, %c160_191] : memref<2x1x288xf32, #tpu.memory_space<vmem>>, vector<1x1x32xf32>
    %291 = vector.shape_cast %290 : vector<1x1x32xf32> to vector<1x32xf32>
    %c1_192 = arith.constant 1 : index
    %c0_193 = arith.constant 0 : index
    %c192_194 = arith.constant 192 : index
    %292 = vector.load %arg1[%c1_192, %c0_193, %c192_194] : memref<2x1x288xf32, #tpu.memory_space<vmem>>, vector<1x1x32xf32>
    %293 = vector.shape_cast %292 : vector<1x1x32xf32> to vector<1x32xf32>
    %c1_195 = arith.constant 1 : index
    %c0_196 = arith.constant 0 : index
    %c224_197 = arith.constant 224 : index
    %294 = vector.load %arg1[%c1_195, %c0_196, %c224_197] : memref<2x1x288xf32, #tpu.memory_space<vmem>>, vector<1x1x32xf32>
    %295 = vector.shape_cast %294 : vector<1x1x32xf32> to vector<1x32xf32>
    %c1_198 = arith.constant 1 : index
    %c0_199 = arith.constant 0 : index
    %c256_200 = arith.constant 256 : index
    %296 = vector.load %arg1[%c1_198, %c0_199, %c256_200] : memref<2x1x288xf32, #tpu.memory_space<vmem>>, vector<1x1x32xf32>
    %297 = vector.shape_cast %296 : vector<1x1x32xf32> to vector<1x32xf32>
    %c1_201 = arith.constant 1 : index
    %c0_202 = arith.constant 0 : index
    %c0_203 = arith.constant 0 : index
    %298 = vector.load %arg2[%c1_201, %c0_202, %c0_203] : memref<2x1x384xf32, #tpu.memory_space<vmem>>, vector<1x1x128xf32>
    %299 = vector.shape_cast %298 : vector<1x1x128xf32> to vector<1x128xf32>
    %c1_204 = arith.constant 1 : index
    %c0_205 = arith.constant 0 : index
    %c128_206 = arith.constant 128 : index
    %300 = vector.load %arg2[%c1_204, %c0_205, %c128_206] : memref<2x1x384xf32, #tpu.memory_space<vmem>>, vector<1x1x256xf32>
    %301 = vector.shape_cast %300 : vector<1x1x256xf32> to vector<1x256xf32>
    %c1_207 = arith.constant 1 : index
    %c0_208 = arith.constant 0 : index
    %c0_209 = arith.constant 0 : index
    %c0_210 = arith.constant 0 : index
    %302 = vector.load %arg4[%c1_207, %c0_208, %c0_209, %c0_210] : memref<2x4x32x32xf32, #tpu.memory_space<vmem>>, vector<1x1x32x32xf32>
    %303 = vector.shape_cast %302 : vector<1x1x32x32xf32> to vector<32x32xf32>
    %c1_211 = arith.constant 1 : index
    %c1_212 = arith.constant 1 : index
    %c0_213 = arith.constant 0 : index
    %c0_214 = arith.constant 0 : index
    %304 = vector.load %arg4[%c1_211, %c1_212, %c0_213, %c0_214] : memref<2x4x32x32xf32, #tpu.memory_space<vmem>>, vector<1x1x32x32xf32>
    %305 = vector.shape_cast %304 : vector<1x1x32x32xf32> to vector<32x32xf32>
    %c1_215 = arith.constant 1 : index
    %c2_216 = arith.constant 2 : index
    %c0_217 = arith.constant 0 : index
    %c0_218 = arith.constant 0 : index
    %306 = vector.load %arg4[%c1_215, %c2_216, %c0_217, %c0_218] : memref<2x4x32x32xf32, #tpu.memory_space<vmem>>, vector<1x1x32x32xf32>
    %307 = vector.shape_cast %306 : vector<1x1x32x32xf32> to vector<32x32xf32>
    %c1_219 = arith.constant 1 : index
    %c3_220 = arith.constant 3 : index
    %c0_221 = arith.constant 0 : index
    %c0_222 = arith.constant 0 : index
    %308 = vector.load %arg4[%c1_219, %c3_220, %c0_221, %c0_222] : memref<2x4x32x32xf32, #tpu.memory_space<vmem>>, vector<1x1x32x32xf32>
    %309 = vector.shape_cast %308 : vector<1x1x32x32xf32> to vector<32x32xf32>
    %cst_223 = arith.constant dense<0.000000e+00> : vector<16xf32>
    %310 = vector.multi_reduction <add>, %279, %cst_223 [1] : vector<16x32xf32> to vector<16xf32>
    %311 = vector.shape_cast %310 : vector<16xf32> to vector<16x1xf32>
    %cst_224 = arith.constant 3.200000e+01 : f32
    %312 = vector.broadcast %cst_224 : f32 to vector<16x1xf32>
    %313 = arith.divf %311, %312 : vector<16x1xf32>
    %314 = vector.broadcast %313 : vector<16x1xf32> to vector<16x32xf32>
    %315 = arith.subf %279, %314 : vector<16x32xf32>
    %316 = arith.mulf %315, %315 : vector<16x32xf32>
    %cst_225 = arith.constant dense<0.000000e+00> : vector<16xf32>
    %317 = vector.multi_reduction <add>, %316, %cst_225 [1] : vector<16x32xf32> to vector<16xf32>
    %318 = vector.shape_cast %317 : vector<16xf32> to vector<16x1xf32>
    %cst_226 = arith.constant 3.200000e+01 : f32
    %319 = vector.broadcast %cst_226 : f32 to vector<16x1xf32>
    %320 = arith.divf %318, %319 : vector<16x1xf32>
    %321 = vector.broadcast %313 : vector<16x1xf32> to vector<16x32xf32>
    %322 = arith.subf %279, %321 : vector<16x32xf32>
    %cst_227 = arith.constant 9.99999974E-6 : f32
    %323 = vector.broadcast %cst_227 : f32 to vector<16x1xf32>
    %324 = arith.addf %320, %323 : vector<16x1xf32>
    %325 = math.rsqrt %324 : vector<16x1xf32>
    %326 = vector.broadcast %325 : vector<16x1xf32> to vector<16x32xf32>
    %327 = arith.mulf %322, %326 : vector<16x32xf32>
    %328 = vector.broadcast %281 : vector<1x32xf32> to vector<16x32xf32>
    %329 = arith.mulf %327, %328 : vector<16x32xf32>
    %330 = vector.broadcast %283 : vector<1x32xf32> to vector<16x32xf32>
    %331 = arith.addf %329, %330 : vector<16x32xf32>
    %c1_228 = arith.constant 1 : index
    %c0_229 = arith.constant 0 : index
    %c0_230 = arith.constant 0 : index
    %332 = vector.load %arg3[%c1_228, %c0_229, %c0_230] : memref<2x8x32xf32, #tpu.memory_space<vmem>>, vector<1x8x32xf32>
    %333 = vector.shape_cast %332 : vector<1x8x32xf32> to vector<8x32xf32>
    %cst_231 = arith.constant dense<0.000000e+00> : vector<8x32xf32>
    %334 = tpu.matmul %333, %303, %cst_231 {dimension_numbers = #tpu.dot_dimension_numbers<[1], [0], [0], [1], [0, 0, 1, 1], [], []>} : vector<8x32xf32>, vector<32x32xf32>, vector<8x32xf32> -> vector<8x32xf32>
    %335 = vector.broadcast %285 : vector<1x32xf32> to vector<8x32xf32>
    %336 = arith.addf %334, %335 : vector<8x32xf32>
    %337 = vector.broadcast %31 : vector<1x32xf32> to vector<8x32xf32>
    %338 = arith.mulf %336, %337 : vector<8x32xf32>
    %339 = vector.broadcast %33 : vector<1x32xf32> to vector<8x32xf32>
    %340 = arith.mulf %336, %339 : vector<8x32xf32>
    %341 = vector.broadcast %35 : vector<1x32xf32> to vector<8x32xf32>
    %342 = arith.mulf %336, %341 : vector<8x32xf32>
    %343 = vector.broadcast %37 : vector<1x32xf32> to vector<8x32xf32>
    %344 = arith.mulf %336, %343 : vector<8x32xf32>
    %345 = tpu.concatenate %338, %340, %342, %344 in 0 : vector<8x32xf32>, vector<8x32xf32>, vector<8x32xf32>, vector<8x32xf32> -> vector<32x32xf32>
    %cst_232 = arith.constant dense<0.000000e+00> : vector<16x32xf32>
    %346 = tpu.matmul %331, %305, %cst_232 {dimension_numbers = #tpu.dot_dimension_numbers<[1], [0], [0], [1], [0, 0, 1, 1], [], []>} : vector<16x32xf32>, vector<32x32xf32>, vector<16x32xf32> -> vector<16x32xf32>
    %347 = vector.broadcast %287 : vector<1x32xf32> to vector<16x32xf32>
    %348 = arith.addf %346, %347 : vector<16x32xf32>
    %cst_233 = arith.constant dense<0.000000e+00> : vector<16x32xf32>
    %349 = tpu.matmul %331, %307, %cst_233 {dimension_numbers = #tpu.dot_dimension_numbers<[1], [0], [0], [1], [0, 0, 1, 1], [], []>} : vector<16x32xf32>, vector<32x32xf32>, vector<16x32xf32> -> vector<16x32xf32>
    %350 = vector.broadcast %289 : vector<1x32xf32> to vector<16x32xf32>
    %351 = arith.addf %349, %350 : vector<16x32xf32>
    %352 = vector.extract_strided_slice %348 {offsets = [0, 0], sizes = [8, 32], strides = [1, 1]} : vector<16x32xf32> to vector<8x32xf32>
    %353 = vector.extract_strided_slice %351 {offsets = [0, 0], sizes = [8, 32], strides = [1, 1]} : vector<16x32xf32> to vector<8x32xf32>
    %cst_234 = arith.constant dense<0.000000e+00> : vector<32x8xf32>
    %354 = tpu.matmul %345, %352, %cst_234 {dimension_numbers = #tpu.dot_dimension_numbers<[1], [1], [0], [0], [0, 0, 1, 0], [], []>} : vector<32x32xf32>, vector<8x32xf32>, vector<32x8xf32> -> vector<32x8xf32>
    %cst_235 = arith.constant dense<0xFF800000> : vector<32xf32>
    %355 = vector.multi_reduction <maximumf>, %354, %cst_235 [1] : vector<32x8xf32> to vector<32xf32>
    %356 = vector.shape_cast %355 : vector<32xf32> to vector<32x1xf32>
    %357 = vector.broadcast %356 : vector<32x1xf32> to vector<32x8xf32>
    %358 = arith.subf %354, %357 : vector<32x8xf32>
    %359 = math.exp %358 : vector<32x8xf32>
    %cst_236 = arith.constant dense<0.000000e+00> : vector<32xf32>
    %360 = vector.multi_reduction <add>, %359, %cst_236 [1] : vector<32x8xf32> to vector<32xf32>
    %361 = vector.shape_cast %360 : vector<32xf32> to vector<32x1xf32>
    %362 = vector.broadcast %361 : vector<32x1xf32> to vector<32x8xf32>
    %363 = arith.divf %359, %362 : vector<32x8xf32>
    %cst_237 = arith.constant dense<0.000000e+00> : vector<32x32xf32>
    %364 = tpu.matmul %363, %353, %cst_237 {dimension_numbers = #tpu.dot_dimension_numbers<[1], [0], [0], [1], [0, 0, 1, 1], [], []>} : vector<32x8xf32>, vector<8x32xf32>, vector<32x32xf32> -> vector<32x32xf32>
    %365 = vector.extract_strided_slice %364 {offsets = [0, 0], sizes = [8, 32], strides = [1, 1]} : vector<32x32xf32> to vector<8x32xf32>
    %366 = vector.broadcast %8 : vector<1x32xf32> to vector<8x32xf32>
    %367 = arith.mulf %365, %366 : vector<8x32xf32>
    %368 = vector.extract_strided_slice %364 {offsets = [8, 0], sizes = [8, 32], strides = [1, 1]} : vector<32x32xf32> to vector<8x32xf32>
    %369 = vector.broadcast %15 : vector<1x32xf32> to vector<8x32xf32>
    %370 = arith.mulf %368, %369 : vector<8x32xf32>
    %371 = vector.extract_strided_slice %364 {offsets = [16, 0], sizes = [8, 32], strides = [1, 1]} : vector<32x32xf32> to vector<8x32xf32>
    %372 = vector.broadcast %22 : vector<1x32xf32> to vector<8x32xf32>
    %373 = arith.mulf %371, %372 : vector<8x32xf32>
    %374 = vector.extract_strided_slice %364 {offsets = [24, 0], sizes = [8, 32], strides = [1, 1]} : vector<32x32xf32> to vector<8x32xf32>
    %375 = vector.broadcast %29 : vector<1x32xf32> to vector<8x32xf32>
    %376 = arith.mulf %374, %375 : vector<8x32xf32>
    %377 = arith.addf %367, %370 : vector<8x32xf32>
    %378 = arith.addf %373, %376 : vector<8x32xf32>
    %379 = arith.addf %377, %378 : vector<8x32xf32>
    %cst_238 = arith.constant dense<0.000000e+00> : vector<8x32xf32>
    %380 = tpu.matmul %379, %309, %cst_238 {dimension_numbers = #tpu.dot_dimension_numbers<[1], [0], [0], [1], [0, 0, 1, 1], [], []>} : vector<8x32xf32>, vector<32x32xf32>, vector<8x32xf32> -> vector<8x32xf32>
    %381 = vector.broadcast %291 : vector<1x32xf32> to vector<8x32xf32>
    %382 = arith.addf %380, %381 : vector<8x32xf32>
    %383 = vector.extract_strided_slice %382 {offsets = [0, 0], sizes = [1, 32], strides = [1, 1]} : vector<8x32xf32> to vector<1x32xf32>
    %c0_239 = arith.constant 0 : index
    %c0_240 = arith.constant 0 : index
    %384 = vector.load %arg11[%c0_239, %c0_240] : memref<2x256xf32, #tpu.memory_space<vmem>>, vector<1x32xf32>
    tpu.vector_store %arg11[%c0_239, %c0_240], %383 {strides = array<i32>} : memref<2x256xf32, #tpu.memory_space<vmem>>, vector<1x32xf32>,
    %385 = vector.extract_strided_slice %382 {offsets = [1, 0], sizes = [1, 32], strides = [1, 1]} : vector<8x32xf32> to vector<1x32xf32>
    %c0_241 = arith.constant 0 : index
    %c32_242 = arith.constant 32 : index
    %386 = vector.load %arg11[%c0_241, %c32_242] : memref<2x256xf32, #tpu.memory_space<vmem>>, vector<1x32xf32>
    tpu.vector_store %arg11[%c0_241, %c32_242], %385 {strides = array<i32>} : memref<2x256xf32, #tpu.memory_space<vmem>>, vector<1x32xf32>,
    %387 = vector.extract_strided_slice %382 {offsets = [2, 0], sizes = [1, 32], strides = [1, 1]} : vector<8x32xf32> to vector<1x32xf32>
    %c0_243 = arith.constant 0 : index
    %c64_244 = arith.constant 64 : index
    %388 = vector.load %arg11[%c0_243, %c64_244] : memref<2x256xf32, #tpu.memory_space<vmem>>, vector<1x32xf32>
    tpu.vector_store %arg11[%c0_243, %c64_244], %387 {strides = array<i32>} : memref<2x256xf32, #tpu.memory_space<vmem>>, vector<1x32xf32>,
    %389 = vector.extract_strided_slice %382 {offsets = [3, 0], sizes = [1, 32], strides = [1, 1]} : vector<8x32xf32> to vector<1x32xf32>
    %c0_245 = arith.constant 0 : index
    %c96_246 = arith.constant 96 : index
    %390 = vector.load %arg11[%c0_245, %c96_246] : memref<2x256xf32, #tpu.memory_space<vmem>>, vector<1x32xf32>
    tpu.vector_store %arg11[%c0_245, %c96_246], %389 {strides = array<i32>} : memref<2x256xf32, #tpu.memory_space<vmem>>, vector<1x32xf32>,
    %391 = vector.extract_strided_slice %382 {offsets = [4, 0], sizes = [1, 32], strides = [1, 1]} : vector<8x32xf32> to vector<1x32xf32>
    %c0_247 = arith.constant 0 : index
    %c128_248 = arith.constant 128 : index
    %392 = vector.load %arg11[%c0_247, %c128_248] : memref<2x256xf32, #tpu.memory_space<vmem>>, vector<1x32xf32>
    tpu.vector_store %arg11[%c0_247, %c128_248], %391 {strides = array<i32>} : memref<2x256xf32, #tpu.memory_space<vmem>>, vector<1x32xf32>,
    %393 = vector.extract_strided_slice %382 {offsets = [5, 0], sizes = [1, 32], strides = [1, 1]} : vector<8x32xf32> to vector<1x32xf32>
    %c0_249 = arith.constant 0 : index
    %c160_250 = arith.constant 160 : index
    %394 = vector.load %arg11[%c0_249, %c160_250] : memref<2x256xf32, #tpu.memory_space<vmem>>, vector<1x32xf32>
    tpu.vector_store %arg11[%c0_249, %c160_250], %393 {strides = array<i32>} : memref<2x256xf32, #tpu.memory_space<vmem>>, vector<1x32xf32>,
    %395 = vector.extract_strided_slice %382 {offsets = [6, 0], sizes = [1, 32], strides = [1, 1]} : vector<8x32xf32> to vector<1x32xf32>
    %c0_251 = arith.constant 0 : index
    %c192_252 = arith.constant 192 : index
    %396 = vector.load %arg11[%c0_251, %c192_252] : memref<2x256xf32, #tpu.memory_space<vmem>>, vector<1x32xf32>
    tpu.vector_store %arg11[%c0_251, %c192_252], %395 {strides = array<i32>} : memref<2x256xf32, #tpu.memory_space<vmem>>, vector<1x32xf32>,
    %397 = vector.extract_strided_slice %382 {offsets = [7, 0], sizes = [1, 32], strides = [1, 1]} : vector<8x32xf32> to vector<1x32xf32>
    %c0_253 = arith.constant 0 : index
    %c224_254 = arith.constant 224 : index
    %398 = vector.load %arg11[%c0_253, %c224_254] : memref<2x256xf32, #tpu.memory_space<vmem>>, vector<1x32xf32>
    tpu.vector_store %arg11[%c0_253, %c224_254], %397 {strides = array<i32>} : memref<2x256xf32, #tpu.memory_space<vmem>>, vector<1x32xf32>,
    %399 = vector.extract_strided_slice %348 {offsets = [8, 0], sizes = [8, 32], strides = [1, 1]} : vector<16x32xf32> to vector<8x32xf32>
    %400 = vector.extract_strided_slice %351 {offsets = [8, 0], sizes = [8, 32], strides = [1, 1]} : vector<16x32xf32> to vector<8x32xf32>
    %cst_255 = arith.constant dense<0.000000e+00> : vector<32x8xf32>
    %401 = tpu.matmul %345, %399, %cst_255 {dimension_numbers = #tpu.dot_dimension_numbers<[1], [1], [0], [0], [0, 0, 1, 0], [], []>} : vector<32x32xf32>, vector<8x32xf32>, vector<32x8xf32> -> vector<32x8xf32>
    %cst_256 = arith.constant dense<0xFF800000> : vector<32xf32>
    %402 = vector.multi_reduction <maximumf>, %401, %cst_256 [1] : vector<32x8xf32> to vector<32xf32>
    %403 = vector.shape_cast %402 : vector<32xf32> to vector<32x1xf32>
    %404 = vector.broadcast %403 : vector<32x1xf32> to vector<32x8xf32>
    %405 = arith.subf %401, %404 : vector<32x8xf32>
    %406 = math.exp %405 : vector<32x8xf32>
    %cst_257 = arith.constant dense<0.000000e+00> : vector<32xf32>
    %407 = vector.multi_reduction <add>, %406, %cst_257 [1] : vector<32x8xf32> to vector<32xf32>
    %408 = vector.shape_cast %407 : vector<32xf32> to vector<32x1xf32>
    %409 = vector.broadcast %408 : vector<32x1xf32> to vector<32x8xf32>
    %410 = arith.divf %406, %409 : vector<32x8xf32>
    %cst_258 = arith.constant dense<0.000000e+00> : vector<32x32xf32>
    %411 = tpu.matmul %410, %400, %cst_258 {dimension_numbers = #tpu.dot_dimension_numbers<[1], [0], [0], [1], [0, 0, 1, 1], [], []>} : vector<32x8xf32>, vector<8x32xf32>, vector<32x32xf32> -> vector<32x32xf32>
    %412 = vector.extract_strided_slice %411 {offsets = [0, 0], sizes = [8, 32], strides = [1, 1]} : vector<32x32xf32> to vector<8x32xf32>
    %413 = vector.broadcast %8 : vector<1x32xf32> to vector<8x32xf32>
    %414 = arith.mulf %412, %413 : vector<8x32xf32>
    %415 = vector.extract_strided_slice %411 {offsets = [8, 0], sizes = [8, 32], strides = [1, 1]} : vector<32x32xf32> to vector<8x32xf32>
    %416 = vector.broadcast %15 : vector<1x32xf32> to vector<8x32xf32>
    %417 = arith.mulf %415, %416 : vector<8x32xf32>
    %418 = vector.extract_strided_slice %411 {offsets = [16, 0], sizes = [8, 32], strides = [1, 1]} : vector<32x32xf32> to vector<8x32xf32>
    %419 = vector.broadcast %22 : vector<1x32xf32> to vector<8x32xf32>
    %420 = arith.mulf %418, %419 : vector<8x32xf32>
    %421 = vector.extract_strided_slice %411 {offsets = [24, 0], sizes = [8, 32], strides = [1, 1]} : vector<32x32xf32> to vector<8x32xf32>
    %422 = vector.broadcast %29 : vector<1x32xf32> to vector<8x32xf32>
    %423 = arith.mulf %421, %422 : vector<8x32xf32>
    %424 = arith.addf %414, %417 : vector<8x32xf32>
    %425 = arith.addf %420, %423 : vector<8x32xf32>
    %426 = arith.addf %424, %425 : vector<8x32xf32>
    %cst_259 = arith.constant dense<0.000000e+00> : vector<8x32xf32>
    %427 = tpu.matmul %426, %309, %cst_259 {dimension_numbers = #tpu.dot_dimension_numbers<[1], [0], [0], [1], [0, 0, 1, 1], [], []>} : vector<8x32xf32>, vector<32x32xf32>, vector<8x32xf32> -> vector<8x32xf32>
    %428 = vector.broadcast %291 : vector<1x32xf32> to vector<8x32xf32>
    %429 = arith.addf %427, %428 : vector<8x32xf32>
    %430 = vector.extract_strided_slice %429 {offsets = [0, 0], sizes = [1, 32], strides = [1, 1]} : vector<8x32xf32> to vector<1x32xf32>
    %c1_260 = arith.constant 1 : index
    %c0_261 = arith.constant 0 : index
    %431 = vector.load %arg11[%c1_260, %c0_261] : memref<2x256xf32, #tpu.memory_space<vmem>>, vector<1x32xf32>
    tpu.vector_store %arg11[%c1_260, %c0_261], %430 {strides = array<i32>} : memref<2x256xf32, #tpu.memory_space<vmem>>, vector<1x32xf32>,
    %432 = vector.extract_strided_slice %429 {offsets = [1, 0], sizes = [1, 32], strides = [1, 1]} : vector<8x32xf32> to vector<1x32xf32>
    %c1_262 = arith.constant 1 : index
    %c32_263 = arith.constant 32 : index
    %433 = vector.load %arg11[%c1_262, %c32_263] : memref<2x256xf32, #tpu.memory_space<vmem>>, vector<1x32xf32>
    tpu.vector_store %arg11[%c1_262, %c32_263], %432 {strides = array<i32>} : memref<2x256xf32, #tpu.memory_space<vmem>>, vector<1x32xf32>,
    %434 = vector.extract_strided_slice %429 {offsets = [2, 0], sizes = [1, 32], strides = [1, 1]} : vector<8x32xf32> to vector<1x32xf32>
    %c1_264 = arith.constant 1 : index
    %c64_265 = arith.constant 64 : index
    %435 = vector.load %arg11[%c1_264, %c64_265] : memref<2x256xf32, #tpu.memory_space<vmem>>, vector<1x32xf32>
    tpu.vector_store %arg11[%c1_264, %c64_265], %434 {strides = array<i32>} : memref<2x256xf32, #tpu.memory_space<vmem>>, vector<1x32xf32>,
    %436 = vector.extract_strided_slice %429 {offsets = [3, 0], sizes = [1, 32], strides = [1, 1]} : vector<8x32xf32> to vector<1x32xf32>
    %c1_266 = arith.constant 1 : index
    %c96_267 = arith.constant 96 : index
    %437 = vector.load %arg11[%c1_266, %c96_267] : memref<2x256xf32, #tpu.memory_space<vmem>>, vector<1x32xf32>
    tpu.vector_store %arg11[%c1_266, %c96_267], %436 {strides = array<i32>} : memref<2x256xf32, #tpu.memory_space<vmem>>, vector<1x32xf32>,
    %438 = vector.extract_strided_slice %429 {offsets = [4, 0], sizes = [1, 32], strides = [1, 1]} : vector<8x32xf32> to vector<1x32xf32>
    %c1_268 = arith.constant 1 : index
    %c128_269 = arith.constant 128 : index
    %439 = vector.load %arg11[%c1_268, %c128_269] : memref<2x256xf32, #tpu.memory_space<vmem>>, vector<1x32xf32>
    tpu.vector_store %arg11[%c1_268, %c128_269], %438 {strides = array<i32>} : memref<2x256xf32, #tpu.memory_space<vmem>>, vector<1x32xf32>,
    %440 = vector.extract_strided_slice %429 {offsets = [5, 0], sizes = [1, 32], strides = [1, 1]} : vector<8x32xf32> to vector<1x32xf32>
    %c1_270 = arith.constant 1 : index
    %c160_271 = arith.constant 160 : index
    %441 = vector.load %arg11[%c1_270, %c160_271] : memref<2x256xf32, #tpu.memory_space<vmem>>, vector<1x32xf32>
    tpu.vector_store %arg11[%c1_270, %c160_271], %440 {strides = array<i32>} : memref<2x256xf32, #tpu.memory_space<vmem>>, vector<1x32xf32>,
    %442 = vector.extract_strided_slice %429 {offsets = [6, 0], sizes = [1, 32], strides = [1, 1]} : vector<8x32xf32> to vector<1x32xf32>
    %c1_272 = arith.constant 1 : index
    %c192_273 = arith.constant 192 : index
    %443 = vector.load %arg11[%c1_272, %c192_273] : memref<2x256xf32, #tpu.memory_space<vmem>>, vector<1x32xf32>
    tpu.vector_store %arg11[%c1_272, %c192_273], %442 {strides = array<i32>} : memref<2x256xf32, #tpu.memory_space<vmem>>, vector<1x32xf32>,
    %444 = vector.extract_strided_slice %429 {offsets = [7, 0], sizes = [1, 32], strides = [1, 1]} : vector<8x32xf32> to vector<1x32xf32>
    %c1_274 = arith.constant 1 : index
    %c224_275 = arith.constant 224 : index
    %445 = vector.load %arg11[%c1_274, %c224_275] : memref<2x256xf32, #tpu.memory_space<vmem>>, vector<1x32xf32>
    tpu.vector_store %arg11[%c1_274, %c224_275], %444 {strides = array<i32>} : memref<2x256xf32, #tpu.memory_space<vmem>>, vector<1x32xf32>,
    %c0_276 = arith.constant 0 : index
    %c0_277 = arith.constant 0 : index
    %446 = vector.load %arg11[%c0_276, %c0_277] : memref<2x256xf32, #tpu.memory_space<vmem>>, vector<2x256xf32>
    %c1_278 = arith.constant 1 : index
    %c0_279 = arith.constant 0 : index
    %c0_280 = arith.constant 0 : index
    %447 = vector.load %arg5[%c1_278, %c0_279, %c0_280] : memref<2x256x256xf32, #tpu.memory_space<vmem>>, vector<1x256x256xf32>
    %448 = vector.shape_cast %447 : vector<1x256x256xf32> to vector<256x256xf32>
    %cst_281 = arith.constant dense<0.000000e+00> : vector<2x256xf32>
    %449 = tpu.matmul %446, %448, %cst_281 {dimension_numbers = #tpu.dot_dimension_numbers<[1], [0], [0], [1], [0, 0, 1, 1], [], []>} : vector<2x256xf32>, vector<256x256xf32>, vector<2x256xf32> -> vector<2x256xf32>
    %450 = vector.broadcast %301 : vector<1x256xf32> to vector<2x256xf32>
    %451 = arith.addf %449, %450 : vector<2x256xf32>
    %c0_282 = arith.constant 0 : index
    %c0_283 = arith.constant 0 : index
    %452 = vector.load %arg12[%c0_282, %c0_283] : memref<2x256xf32, #tpu.memory_space<vmem>>, vector<2x256xf32>
    tpu.vector_store %arg12[%c0_282, %c0_283], %451 {strides = array<i32>} : memref<2x256xf32, #tpu.memory_space<vmem>>, vector<2x256xf32>,
    %c0_284 = arith.constant 0 : index
    %c0_285 = arith.constant 0 : index
    %453 = vector.load %arg12[%c0_284, %c0_285] : memref<2x256xf32, #tpu.memory_space<vmem>>, vector<1x32xf32>
    %c0_286 = arith.constant 0 : index
    %c0_287 = arith.constant 0 : index
    %454 = vector.load %arg13[%c0_286, %c0_287] : memref<16x32xf32, #tpu.memory_space<vmem>>, vector<1x32xf32>
    tpu.vector_store %arg13[%c0_286, %c0_287], %453 {strides = array<i32>} : memref<16x32xf32, #tpu.memory_space<vmem>>, vector<1x32xf32>,
    %c0_288 = arith.constant 0 : index
    %c32_289 = arith.constant 32 : index
    %455 = vector.load %arg12[%c0_288, %c32_289] : memref<2x256xf32, #tpu.memory_space<vmem>>, vector<1x32xf32>
    %c1_290 = arith.constant 1 : index
    %c0_291 = arith.constant 0 : index
    %456 = vector.load %arg13[%c1_290, %c0_291] : memref<16x32xf32, #tpu.memory_space<vmem>>, vector<1x32xf32>
    tpu.vector_store %arg13[%c1_290, %c0_291], %455 {strides = array<i32>} : memref<16x32xf32, #tpu.memory_space<vmem>>, vector<1x32xf32>,
    %c0_292 = arith.constant 0 : index
    %c64_293 = arith.constant 64 : index
    %457 = vector.load %arg12[%c0_292, %c64_293] : memref<2x256xf32, #tpu.memory_space<vmem>>, vector<1x32xf32>
    %c2_294 = arith.constant 2 : index
    %c0_295 = arith.constant 0 : index
    %458 = vector.load %arg13[%c2_294, %c0_295] : memref<16x32xf32, #tpu.memory_space<vmem>>, vector<1x32xf32>
    tpu.vector_store %arg13[%c2_294, %c0_295], %457 {strides = array<i32>} : memref<16x32xf32, #tpu.memory_space<vmem>>, vector<1x32xf32>,
    %c0_296 = arith.constant 0 : index
    %c96_297 = arith.constant 96 : index
    %459 = vector.load %arg12[%c0_296, %c96_297] : memref<2x256xf32, #tpu.memory_space<vmem>>, vector<1x32xf32>
    %c3_298 = arith.constant 3 : index
    %c0_299 = arith.constant 0 : index
    %460 = vector.load %arg13[%c3_298, %c0_299] : memref<16x32xf32, #tpu.memory_space<vmem>>, vector<1x32xf32>
    tpu.vector_store %arg13[%c3_298, %c0_299], %459 {strides = array<i32>} : memref<16x32xf32, #tpu.memory_space<vmem>>, vector<1x32xf32>,
    %c0_300 = arith.constant 0 : index
    %c128_301 = arith.constant 128 : index
    %461 = vector.load %arg12[%c0_300, %c128_301] : memref<2x256xf32, #tpu.memory_space<vmem>>, vector<1x32xf32>
    %c4_302 = arith.constant 4 : index
    %c0_303 = arith.constant 0 : index
    %462 = vector.load %arg13[%c4_302, %c0_303] : memref<16x32xf32, #tpu.memory_space<vmem>>, vector<1x32xf32>
    tpu.vector_store %arg13[%c4_302, %c0_303], %461 {strides = array<i32>} : memref<16x32xf32, #tpu.memory_space<vmem>>, vector<1x32xf32>,
    %c0_304 = arith.constant 0 : index
    %c160_305 = arith.constant 160 : index
    %463 = vector.load %arg12[%c0_304, %c160_305] : memref<2x256xf32, #tpu.memory_space<vmem>>, vector<1x32xf32>
    %c5_306 = arith.constant 5 : index
    %c0_307 = arith.constant 0 : index
    %464 = vector.load %arg13[%c5_306, %c0_307] : memref<16x32xf32, #tpu.memory_space<vmem>>, vector<1x32xf32>
    tpu.vector_store %arg13[%c5_306, %c0_307], %463 {strides = array<i32>} : memref<16x32xf32, #tpu.memory_space<vmem>>, vector<1x32xf32>,
    %c0_308 = arith.constant 0 : index
    %c192_309 = arith.constant 192 : index
    %465 = vector.load %arg12[%c0_308, %c192_309] : memref<2x256xf32, #tpu.memory_space<vmem>>, vector<1x32xf32>
    %c6_310 = arith.constant 6 : index
    %c0_311 = arith.constant 0 : index
    %466 = vector.load %arg13[%c6_310, %c0_311] : memref<16x32xf32, #tpu.memory_space<vmem>>, vector<1x32xf32>
    tpu.vector_store %arg13[%c6_310, %c0_311], %465 {strides = array<i32>} : memref<16x32xf32, #tpu.memory_space<vmem>>, vector<1x32xf32>,
    %c0_312 = arith.constant 0 : index
    %c224_313 = arith.constant 224 : index
    %467 = vector.load %arg12[%c0_312, %c224_313] : memref<2x256xf32, #tpu.memory_space<vmem>>, vector<1x32xf32>
    %c7_314 = arith.constant 7 : index
    %c0_315 = arith.constant 0 : index
    %468 = vector.load %arg13[%c7_314, %c0_315] : memref<16x32xf32, #tpu.memory_space<vmem>>, vector<1x32xf32>
    tpu.vector_store %arg13[%c7_314, %c0_315], %467 {strides = array<i32>} : memref<16x32xf32, #tpu.memory_space<vmem>>, vector<1x32xf32>,
    %c1_316 = arith.constant 1 : index
    %c0_317 = arith.constant 0 : index
    %469 = vector.load %arg12[%c1_316, %c0_317] : memref<2x256xf32, #tpu.memory_space<vmem>>, vector<1x32xf32>
    %c8_318 = arith.constant 8 : index
    %c0_319 = arith.constant 0 : index
    %470 = vector.load %arg13[%c8_318, %c0_319] : memref<16x32xf32, #tpu.memory_space<vmem>>, vector<1x32xf32>
    tpu.vector_store %arg13[%c8_318, %c0_319], %469 {strides = array<i32>} : memref<16x32xf32, #tpu.memory_space<vmem>>, vector<1x32xf32>,
    %c1_320 = arith.constant 1 : index
    %c32_321 = arith.constant 32 : index
    %471 = vector.load %arg12[%c1_320, %c32_321] : memref<2x256xf32, #tpu.memory_space<vmem>>, vector<1x32xf32>
    %c9_322 = arith.constant 9 : index
    %c0_323 = arith.constant 0 : index
    %472 = vector.load %arg13[%c9_322, %c0_323] : memref<16x32xf32, #tpu.memory_space<vmem>>, vector<1x32xf32>
    tpu.vector_store %arg13[%c9_322, %c0_323], %471 {strides = array<i32>} : memref<16x32xf32, #tpu.memory_space<vmem>>, vector<1x32xf32>,
    %c1_324 = arith.constant 1 : index
    %c64_325 = arith.constant 64 : index
    %473 = vector.load %arg12[%c1_324, %c64_325] : memref<2x256xf32, #tpu.memory_space<vmem>>, vector<1x32xf32>
    %c10_326 = arith.constant 10 : index
    %c0_327 = arith.constant 0 : index
    %474 = vector.load %arg13[%c10_326, %c0_327] : memref<16x32xf32, #tpu.memory_space<vmem>>, vector<1x32xf32>
    tpu.vector_store %arg13[%c10_326, %c0_327], %473 {strides = array<i32>} : memref<16x32xf32, #tpu.memory_space<vmem>>, vector<1x32xf32>,
    %c1_328 = arith.constant 1 : index
    %c96_329 = arith.constant 96 : index
    %475 = vector.load %arg12[%c1_328, %c96_329] : memref<2x256xf32, #tpu.memory_space<vmem>>, vector<1x32xf32>
    %c11_330 = arith.constant 11 : index
    %c0_331 = arith.constant 0 : index
    %476 = vector.load %arg13[%c11_330, %c0_331] : memref<16x32xf32, #tpu.memory_space<vmem>>, vector<1x32xf32>
    tpu.vector_store %arg13[%c11_330, %c0_331], %475 {strides = array<i32>} : memref<16x32xf32, #tpu.memory_space<vmem>>, vector<1x32xf32>,
    %c1_332 = arith.constant 1 : index
    %c128_333 = arith.constant 128 : index
    %477 = vector.load %arg12[%c1_332, %c128_333] : memref<2x256xf32, #tpu.memory_space<vmem>>, vector<1x32xf32>
    %c12_334 = arith.constant 12 : index
    %c0_335 = arith.constant 0 : index
    %478 = vector.load %arg13[%c12_334, %c0_335] : memref<16x32xf32, #tpu.memory_space<vmem>>, vector<1x32xf32>
    tpu.vector_store %arg13[%c12_334, %c0_335], %477 {strides = array<i32>} : memref<16x32xf32, #tpu.memory_space<vmem>>, vector<1x32xf32>,
    %c1_336 = arith.constant 1 : index
    %c160_337 = arith.constant 160 : index
    %479 = vector.load %arg12[%c1_336, %c160_337] : memref<2x256xf32, #tpu.memory_space<vmem>>, vector<1x32xf32>
    %c13_338 = arith.constant 13 : index
    %c0_339 = arith.constant 0 : index
    %480 = vector.load %arg13[%c13_338, %c0_339] : memref<16x32xf32, #tpu.memory_space<vmem>>, vector<1x32xf32>
    tpu.vector_store %arg13[%c13_338, %c0_339], %479 {strides = array<i32>} : memref<16x32xf32, #tpu.memory_space<vmem>>, vector<1x32xf32>,
    %c1_340 = arith.constant 1 : index
    %c192_341 = arith.constant 192 : index
    %481 = vector.load %arg12[%c1_340, %c192_341] : memref<2x256xf32, #tpu.memory_space<vmem>>, vector<1x32xf32>
    %c14_342 = arith.constant 14 : index
    %c0_343 = arith.constant 0 : index
    %482 = vector.load %arg13[%c14_342, %c0_343] : memref<16x32xf32, #tpu.memory_space<vmem>>, vector<1x32xf32>
    tpu.vector_store %arg13[%c14_342, %c0_343], %481 {strides = array<i32>} : memref<16x32xf32, #tpu.memory_space<vmem>>, vector<1x32xf32>,
    %c1_344 = arith.constant 1 : index
    %c224_345 = arith.constant 224 : index
    %483 = vector.load %arg12[%c1_344, %c224_345] : memref<2x256xf32, #tpu.memory_space<vmem>>, vector<1x32xf32>
    %c15_346 = arith.constant 15 : index
    %c0_347 = arith.constant 0 : index
    %484 = vector.load %arg13[%c15_346, %c0_347] : memref<16x32xf32, #tpu.memory_space<vmem>>, vector<1x32xf32>
    tpu.vector_store %arg13[%c15_346, %c0_347], %483 {strides = array<i32>} : memref<16x32xf32, #tpu.memory_space<vmem>>, vector<1x32xf32>,
    %c0_348 = arith.constant 0 : index
    %c0_349 = arith.constant 0 : index
    %485 = vector.load %arg13[%c0_348, %c0_349] : memref<16x32xf32, #tpu.memory_space<vmem>>, vector<16x32xf32>
    %486 = arith.addf %279, %485 : vector<16x32xf32>
    %cst_350 = arith.constant dense<0.000000e+00> : vector<16xf32>
    %487 = vector.multi_reduction <add>, %486, %cst_350 [1] : vector<16x32xf32> to vector<16xf32>
    %488 = vector.shape_cast %487 : vector<16xf32> to vector<16x1xf32>
    %cst_351 = arith.constant 3.200000e+01 : f32
    %489 = vector.broadcast %cst_351 : f32 to vector<16x1xf32>
    %490 = arith.divf %488, %489 : vector<16x1xf32>
    %491 = vector.broadcast %490 : vector<16x1xf32> to vector<16x32xf32>
    %492 = arith.subf %486, %491 : vector<16x32xf32>
    %493 = arith.mulf %492, %492 : vector<16x32xf32>
    %cst_352 = arith.constant dense<0.000000e+00> : vector<16xf32>
    %494 = vector.multi_reduction <add>, %493, %cst_352 [1] : vector<16x32xf32> to vector<16xf32>
    %495 = vector.shape_cast %494 : vector<16xf32> to vector<16x1xf32>
    %cst_353 = arith.constant 3.200000e+01 : f32
    %496 = vector.broadcast %cst_353 : f32 to vector<16x1xf32>
    %497 = arith.divf %495, %496 : vector<16x1xf32>
    %498 = vector.broadcast %490 : vector<16x1xf32> to vector<16x32xf32>
    %499 = arith.subf %486, %498 : vector<16x32xf32>
    %cst_354 = arith.constant 9.99999974E-6 : f32
    %500 = vector.broadcast %cst_354 : f32 to vector<16x1xf32>
    %501 = arith.addf %497, %500 : vector<16x1xf32>
    %502 = math.rsqrt %501 : vector<16x1xf32>
    %503 = vector.broadcast %502 : vector<16x1xf32> to vector<16x32xf32>
    %504 = arith.mulf %499, %503 : vector<16x32xf32>
    %505 = vector.broadcast %293 : vector<1x32xf32> to vector<16x32xf32>
    %506 = arith.mulf %504, %505 : vector<16x32xf32>
    %507 = vector.broadcast %295 : vector<1x32xf32> to vector<16x32xf32>
    %508 = arith.addf %506, %507 : vector<16x32xf32>
    %c1_355 = arith.constant 1 : index
    %c0_356 = arith.constant 0 : index
    %c0_357 = arith.constant 0 : index
    %509 = vector.load %arg6[%c1_355, %c0_356, %c0_357] : memref<2x32x128xf32, #tpu.memory_space<vmem>>, vector<1x32x128xf32>
    %510 = vector.shape_cast %509 : vector<1x32x128xf32> to vector<32x128xf32>
    %cst_358 = arith.constant dense<0.000000e+00> : vector<16x128xf32>
    %511 = tpu.matmul %508, %510, %cst_358 {dimension_numbers = #tpu.dot_dimension_numbers<[1], [0], [0], [1], [0, 0, 1, 1], [], []>} : vector<16x32xf32>, vector<32x128xf32>, vector<16x128xf32> -> vector<16x128xf32>
    %512 = vector.broadcast %299 : vector<1x128xf32> to vector<16x128xf32>
    %513 = arith.addf %511, %512 : vector<16x128xf32>
    %cst_359 = arith.constant 0.000000e+00 : f32
    %514 = vector.broadcast %cst_359 : f32 to vector<16x128xf32>
    %515 = arith.maximumf %513, %514 : vector<16x128xf32>
    %c1_360 = arith.constant 1 : index
    %c0_361 = arith.constant 0 : index
    %c0_362 = arith.constant 0 : index
    %516 = vector.load %arg7[%c1_360, %c0_361, %c0_362] : memref<2x128x32xf32, #tpu.memory_space<vmem>>, vector<1x128x32xf32>
    %517 = vector.shape_cast %516 : vector<1x128x32xf32> to vector<128x32xf32>
    %cst_363 = arith.constant dense<0.000000e+00> : vector<16x32xf32>
    %518 = tpu.matmul %515, %517, %cst_363 {dimension_numbers = #tpu.dot_dimension_numbers<[1], [0], [0], [1], [0, 0, 1, 1], [], []>} : vector<16x128xf32>, vector<128x32xf32>, vector<16x32xf32> -> vector<16x32xf32>
    %519 = vector.broadcast %297 : vector<1x32xf32> to vector<16x32xf32>
    %520 = arith.addf %518, %519 : vector<16x32xf32>
    %521 = arith.addf %486, %520 : vector<16x32xf32>
    %c0_364 = arith.constant 0 : index
    %c0_365 = arith.constant 0 : index
    %522 = vector.load %arg8[%c0_364, %c0_365] : memref<1x96xf32, #tpu.memory_space<vmem>>, vector<1x32xf32>
    %c0_366 = arith.constant 0 : index
    %c32_367 = arith.constant 32 : index
    %523 = vector.load %arg8[%c0_366, %c32_367] : memref<1x96xf32, #tpu.memory_space<vmem>>, vector<1x32xf32>
    %c0_368 = arith.constant 0 : index
    %c64_369 = arith.constant 64 : index
    %524 = vector.load %arg8[%c0_368, %c64_369] : memref<1x96xf32, #tpu.memory_space<vmem>>, vector<1x32xf32>
    %cst_370 = arith.constant dense<0.000000e+00> : vector<16xf32>
    %525 = vector.multi_reduction <add>, %521, %cst_370 [1] : vector<16x32xf32> to vector<16xf32>
    %526 = vector.shape_cast %525 : vector<16xf32> to vector<16x1xf32>
    %cst_371 = arith.constant 3.200000e+01 : f32
    %527 = vector.broadcast %cst_371 : f32 to vector<16x1xf32>
    %528 = arith.divf %526, %527 : vector<16x1xf32>
    %529 = vector.broadcast %528 : vector<16x1xf32> to vector<16x32xf32>
    %530 = arith.subf %521, %529 : vector<16x32xf32>
    %531 = arith.mulf %530, %530 : vector<16x32xf32>
    %cst_372 = arith.constant dense<0.000000e+00> : vector<16xf32>
    %532 = vector.multi_reduction <add>, %531, %cst_372 [1] : vector<16x32xf32> to vector<16xf32>
    %533 = vector.shape_cast %532 : vector<16xf32> to vector<16x1xf32>
    %cst_373 = arith.constant 3.200000e+01 : f32
    %534 = vector.broadcast %cst_373 : f32 to vector<16x1xf32>
    %535 = arith.divf %533, %534 : vector<16x1xf32>
    %536 = vector.broadcast %528 : vector<16x1xf32> to vector<16x32xf32>
    %537 = arith.subf %521, %536 : vector<16x32xf32>
    %cst_374 = arith.constant 9.99999974E-6 : f32
    %538 = vector.broadcast %cst_374 : f32 to vector<16x1xf32>
    %539 = arith.addf %535, %538 : vector<16x1xf32>
    %540 = math.rsqrt %539 : vector<16x1xf32>
    %541 = vector.broadcast %540 : vector<16x1xf32> to vector<16x32xf32>
    %542 = arith.mulf %537, %541 : vector<16x32xf32>
    %543 = vector.broadcast %522 : vector<1x32xf32> to vector<16x32xf32>
    %544 = arith.mulf %542, %543 : vector<16x32xf32>
    %545 = vector.broadcast %523 : vector<1x32xf32> to vector<16x32xf32>
    %546 = arith.addf %544, %545 : vector<16x32xf32>
    %c0_375 = arith.constant 0 : index
    %c0_376 = arith.constant 0 : index
    %547 = vector.load %arg9[%c0_375, %c0_376] : memref<32x32xf32, #tpu.memory_space<vmem>>, vector<32x32xf32>
    %cst_377 = arith.constant dense<0.000000e+00> : vector<16x32xf32>
    %548 = tpu.matmul %546, %547, %cst_377 {dimension_numbers = #tpu.dot_dimension_numbers<[1], [0], [0], [1], [0, 0, 1, 1], [], []>} : vector<16x32xf32>, vector<32x32xf32>, vector<16x32xf32> -> vector<16x32xf32>
    %549 = vector.broadcast %524 : vector<1x32xf32> to vector<16x32xf32>
    %550 = arith.addf %548, %549 : vector<16x32xf32>
    %c0_378 = arith.constant 0 : index
    %c0_379 = arith.constant 0 : index
    %551 = vector.load %arg10[%c0_378, %c0_379] : memref<16x32xf32, #tpu.memory_space<vmem>>, vector<16x32xf32>
    tpu.vector_store %arg10[%c0_378, %c0_379], %550 {strides = array<i32>} : memref<16x32xf32, #tpu.memory_space<vmem>>, vector<16x32xf32>,
    return
  }
}

</mosaic_0001>

<bundles_post_ra>
// kernel: tpu_custom_call.1
= control target key start
LH: loop header
LB: loop body
LE: loop exit
PB: predicated region body
PF: predicated region fallthrough
CT: control target
= control target key end

     0   :  { %15 = vsyncpa [#allocation6], 0  ;;  %s5401_s0 = inlined_call_operand.hbm [shape: f32[16,32], index: 0, kind: input, shape index: {}]   ;;  %s5402_s1 = inlined_call_operand.hbm [shape: f32[2,1,288], index: 1, kind: input, shape index: {}]   ;;  %s5403_s2 = inlined_call_operand.hbm [shape: f32[2,1,384], index: 2, kind: input, shape index: {}]   ;;  %s5404_s3 = inlined_call_operand.hbm [shape: f32[2,8,32], index: 3, kind: input, shape index: {}]   ;;  %s5405_s4 = inlined_call_operand.vmem [shape: f32[2,4,32,32], index: 4, kind: input, shape index: {}]   ;;  %s5406_s5 = inlined_call_operand.hbm [shape: f32[2,256,256], index: 5, kind: input, shape index: {}]   ;;  %s5407_s6 = inlined_call_operand.vmem [shape: f32[2,32,128], index: 6, kind: input, shape index: {}]   ;;  %s5408_s7 = inlined_call_operand.vmem [shape: f32[2,128,32], index: 7, kind: input, shape index: {}]   ;;  %s5409_s8 = inlined_call_operand.vmem [shape: f32[1,96], index: 8, kind: input, shape index: {}]   ;;  %s5410_s9 = inlined_call_operand.vmem [shape: f32[32,32], index: 9, kind: input, shape index: {}]   ;;  %s5411_s10 = inlined_call_operand.hbm [shape: f32[16,32], index: 10, kind: output, shape index: {}]  }
   0x1   :  { %16 = vsyncpa [#allocation9], 0 }
   0x2   :  { %17 = vsyncpa [#allocation12], 0 }
   0x3   :  { %18 = vsyncpa [#allocation7], 0  ;;  %s4566_s13 = smov [#allocation8]   ;;  %s4426_s17 = scalar_lea.hbm %s5402_s1, 96 }
   0x4   :  { %s36_s14 = sshll.u32 %s4566_s13, 4  ;;  %p4427_p0 = scmp.ne.s32.totalorder %s5402_s1, %s4426_s17  ;;  %s37_s14 = int_to_ptr.vmem [resolvable:$true] %s36_s14 }
   0x5   :  { %p4430_p1 = scmp.lt.u32.totalorder %s4426_s17, %s5402_s1 }
   0x7   :  { %p4432_p2 = pnand %p4430_p1, %p4427_p0 }
   0x9   :  { %4435 = shalt.err (!%p4432_p2)
}
   0xa   :  { %s4436_s22 = scalar_lea.vmem %s37_s14, 96  ;;  %p4441_p4 = scmp.lt.s32.totalorder %s37_s14, %s37_s14 }
   0xb   :  { %p4437_p3 = scmp.ne.s32.totalorder %s37_s14, %s4436_s22  ;;  %p4442_p5 = scmp.lt.s32.totalorder %s4436_s22, %s4436_s22 }
   0xd   :  { %p4443_p6 = por %p4442_p5, %p4441_p4 }
   0xf   :  { %p4444_p7 = pnand %p4443_p6, %p4437_p3 }
  0x11   :  { %4447 = shalt.err (!%p4444_p7)
}
  0x12   :  { %s4567_s23 = smov 48   ;;  %s4568_s24 = smov 3  }
  0x13   :  { %42 = dma.hbm_to_vmem [thread:$0]  %s5402_s1, 96, %s37_s14, [#allocation9], %s4567_s23, %s4567_s23, %s4568_s24  }
  0x14   :  { %s4569_s27 = smov [#allocation11]   ;;  %s4570_s29 = smov [#allocation5]  }
  0x15   :  { %s60_s28 = sshll.u32 %s4569_s27, 4  ;;  %s24_s30 = sshll.u32 %s4570_s29, 4  ;;  %s61_s28 = int_to_ptr.vmem [resolvable:$true] %s60_s28  ;;  %s25_s30 = int_to_ptr.vmem [resolvable:$true] %s24_s30 }
  0x16   :  { %s4448_s13 = scalar_lea.hbm %s5404_s3, 256 }
  0x17   :  { %p4449_p8 = scmp.ne.s32.totalorder %s5404_s3, %s4448_s13  ;;  %p4452_p9 = scmp.lt.u32.totalorder %s4448_s13, %s5404_s3 }
  0x19   :  { %p4454_p10 = pnand %p4452_p9, %p4449_p8 }
  0x1b   :  { %4457 = shalt.err (!%p4454_p10)
}
  0x1c   :  { %s4458_s1 = scalar_lea.vmem %s61_s28, 256  ;;  %p4463_p12 = scmp.lt.s32.totalorder %s61_s28, %s61_s28 }
  0x1d   :  { %p4459_p11 = scmp.ne.s32.totalorder %s61_s28, %s4458_s1  ;;  %p4464_p13 = scmp.lt.s32.totalorder %s4458_s1, %s4458_s1 }
  0x1f   :  { %p4465_p0 = por %p4464_p13, %p4463_p12 }
  0x21   :  { %p4466_p1 = pnand %p4465_p0, %p4459_p11 }
  0x23   :  { %4469 = shalt.err (!%p4466_p1)
}
  0x24   :  { %s4571_s14 = smov 128   ;;  %s4572_s19 = smov 8  }
  0x25   :  { %66 = dma.hbm_to_vmem [thread:$0]  %s5404_s3, 256, %s61_s28, [#allocation12], %s4571_s14, %s4571_s14, %s4572_s19  }
  0x26   :  { %s4470_s26 = scalar_lea.hbm %s5401_s0, 256 }
  0x27   :  { %p4471_p2 = scmp.ne.s32.totalorder %s5401_s0, %s4470_s26  ;;  %p4474_p3 = scmp.lt.u32.totalorder %s4470_s26, %s5401_s0 }
  0x29   :  { %p4476_p4 = pnand %p4474_p3, %p4471_p2 }
  0x2b   :  { %4479 = shalt.err (!%p4476_p4)
}
  0x2c   :  { %s4480_s13 = scalar_lea.vmem %s25_s30, 256  ;;  %p4485_p6 = scmp.lt.s32.totalorder %s25_s30, %s25_s30 }
  0x2d   :  { %p4481_p5 = scmp.ne.s32.totalorder %s25_s30, %s4480_s13  ;;  %p4486_p7 = scmp.lt.s32.totalorder %s4480_s13, %s4480_s13 }
  0x2f   :  { %p4487_p8 = por %p4486_p7, %p4485_p6 }
  0x31   :  { %p4488_p9 = pnand %p4487_p8, %p4481_p5 }
  0x33   :  { %4491 = shalt.err (!%p4488_p9)
}
  0x34   :  { %30 = dma.hbm_to_vmem [thread:$0]  %s5401_s0, 256, %s25_s30, [#allocation6], %s4571_s14, %s4571_s14, %s4572_s19  }
  0x35   :  { %s4573_s15 = smov [#allocation10]   ;;  %s4574_s17 = smov [#allocation13]  }
  0x36   :  { %s48_s16 = sshll.u32 %s4573_s15, 4  ;;  %s74_s18 = sshll.u32 %s4574_s17, 4  ;;  %s49_s16 = int_to_ptr.vmem [resolvable:$true] %s48_s16  ;;  %s75_s18 = int_to_ptr.vmem [resolvable:$true] %s74_s18 }
  0x37   :  { %s4492_s21 = scalar_lea.hbm %s5403_s2, 96 }
  0x38   :  { %p4493_p10 = scmp.ne.s32.totalorder %s5403_s2, %s4492_s21  ;;  %p4496_p11 = scmp.lt.u32.totalorder %s4492_s21, %s5403_s2 }
  0x3a   :  { %p4498_p12 = pnand %p4496_p11, %p4493_p10 }
  0x3c   :  { %4501 = shalt.err (!%p4498_p12)
}
  0x3d   :  { %s4502_s0 = scalar_lea.vmem %s49_s16, 96  ;;  %p4507_p0 = scmp.lt.s32.totalorder %s49_s16, %s49_s16 }
  0x3e   :  { %p4503_p13 = scmp.ne.s32.totalorder %s49_s16, %s4502_s0  ;;  %p4508_p1 = scmp.lt.s32.totalorder %s4502_s0, %s4502_s0 }
  0x40   :  { %p4509_p2 = por %p4508_p1, %p4507_p0 }
  0x42   :  { %p4510_p3 = pnand %p4509_p2, %p4503_p13 }
  0x44   :  { %4513 = shalt.err (!%p4510_p3)
}
  0x45   :  { %54 = dma.hbm_to_vmem [thread:$0]  %s5403_s2, 96, %s49_s16, [#allocation9], %s4567_s23, %s4567_s23, %s4568_s24  }
  0x46   :  { %s4514_s13 = scalar_lea.hbm %s5406_s5, 16384 }
  0x47   :  { %p4515_p4 = scmp.ne.s32.totalorder %s5406_s5, %s4514_s13  ;;  %p4518_p5 = scmp.lt.u32.totalorder %s4514_s13, %s5406_s5 }
  0x49   :  { %p4520_p6 = pnand %p4518_p5, %p4515_p4 }
  0x4b   :  { %4523 = shalt.err (!%p4520_p6)
}
  0x4c   :  { %s4524_s1 = scalar_lea.vmem %s75_s18, 16384  ;;  %p4529_p8 = scmp.lt.s32.totalorder %s75_s18, %s75_s18 }
  0x4d   :  { %p4525_p7 = scmp.ne.s32.totalorder %s75_s18, %s4524_s1  ;;  %p4530_p9 = scmp.lt.s32.totalorder %s4524_s1, %s4524_s1 }
  0x4f   :  { %p4531_p10 = por %p4530_p9, %p4529_p8 }
  0x51   :  { %p4532_p11 = pnand %p4531_p10, %p4525_p7 }
  0x53   :  { %4535 = shalt.err (!%p4532_p11)
}
  0x54   :  { %s4575_s2 = smov 256   ;;  %s4576_s23 = smov 16  }
  0x55   :  { %80 = dma.hbm_to_vmem [thread:$0]  %s5406_s5, 16384, %s75_s18, [#allocation12], %s4575_s2, %s4575_s2, %s4576_s23  }
  0x56   :  { %4558 = dma.done.wait [#allocation6], 256  }
  0x57   :  { %4559 = vsyncadd [#allocation6], 4294967040 }
  0x58   :  { %4560 = dma.done.wait [#allocation9], 192  }
  0x59   :  { %4561 = vsyncadd [#allocation9], 4294967104 }
  0x5a   :  { %4562 = dma.done.wait [#allocation12], 16640  }
  0x5b   :  { %4563 = vsyncadd [#allocation12], 4294950656  ;;  %vm156_vm0 = vcmask 261120   ;;  %v104_v0 = vld [vmem:[#allocation5] sm:$0xff]  ;;  %v105_v1 = vld [vmem:[#allocation5 + $0x8] sm:$0xff]  ;;  %s4577_s20 = smov 96   ;;  %v106_v54 = vlaneseq }
  0x5c   :  { %v157_v2 = vsel %vm156_vm0, %v104_v0, 0.0  ;;  %v160_v3 = vsel %vm156_vm0, %v105_v1, 0.0  ;;  %v4714_v4 = vld [vmem:[#allocation8] ss:$0 sm:$0xff]  ;;  %v137_v15 = vld [vmem:[%s5405_s4] sm:$0xff]  ;;  %v139_v18 = vld [vmem:[%s5405_s4 + $0x10] sm:$0xff] }
  0x5d   :  { %158 = vadd.xlane.f32.xlu0 %v157_v2  ;;  %v138_v16 = vld [vmem:[%s5405_s4 + $0x8] sm:$0xff]  ;;  %v140_v19 = vld [vmem:[%s5405_s4 + $0x18] sm:$0xff]  ;;  %v3455_v20 = vld [vmem:[%s5405_s4 + $0x20] sm:$0xff]  ;;  %v4578_v21 = vmov 0.0|0.0   ;;  %vm4579_vm1 = vmmov 0   ;;  %v4580_v22 = vmov 0.0  }
  0x5e   :  { %v4038_v17 = vpack.c.bf16 %v138_v16, %v137_v15  ;;  %4037 = vmatprep.subr.bf16.mxu0 %v4578_v21  ;;  %3768 = vmatprep.mubr.msk.f32.mxu0 %vm4579_vm1, %v4580_v22  ;;  %v3456_v23 = vld [vmem:[%s5405_s4 + $0x28] sm:$0xff]  ;;  %v3459_v24 = vld [vmem:[%s5405_s4 + $0x40] sm:$0xff]  ;;  %v4041_v26 = vpack.c.bf16 %v140_v19, %v139_v18  ;;  %v197_v29 = vld [vmem:[#allocation11] sm:$0xff]  ;;  %s4581_s21 = smov 32   ;;  %s4582_s22 = smov 64   ;;  %v107_v55 = vand.u32 127, %v106_v54 }
  0x5f   :  { %v3460_v25 = vld [vmem:[%s5405_s4 + $0x48] sm:$0xff]  ;;  %v4043_v27 = vpack.c.bf16 %v3456_v23, %v3455_v20  ;;  %v3457_v30 = vld [vmem:[%s5405_s4 + $0x30] sm:$0xff]  ;;  %v3458_v31 = vld [vmem:[%s5405_s4 + $0x38] sm:$0xff]  ;;  %vm543_vm12 = vcmask 64512   ;;  %vm768_vm13 = vcmask 253952   ;;  %vm783_vm14 = vcmask 516352  }
  0x60   :  { %4039 = vmatpush3.bf16.msra.mxu0 %v4038_v17  ;;  %v4051_v28 = vpack.c.bf16 %v3460_v25, %v3459_v24  ;;  %v3461_v32 = vld [vmem:[%s5405_s4 + $0x50] sm:$0xff]  ;;  %v4047_v33 = vpack.c.bf16 %v3458_v31, %v3457_v30  ;;  %v3462_v34 = vld [vmem:[%s5405_s4 + $0x58] sm:$0xff]  ;;  %vm109_vm2 = vcmp.lt.s32.totalorder %v107_v55, 8  ;;  %vm113_vm3 = vcmp.ge.s32.totalorder %v107_v55, 8  ;;  %v4783_v62 = vld [vmem:[#allocation8 + $0x1] ss:$0 sm:$0xff] }
  0x61   :  { %161 = vadd.xlane.f32.xlu0 %v160_v3  ;;  %4040 = vmatprep.subr.bf16.mxu0 %v4578_v21  ;;  %v4055_v35 = vpack.c.bf16 %v3462_v34, %v3461_v32  ;;  %v4773_v57 = vsel %vm109_vm2, 1.0, %v4580_v22  ;;  %vm114_vm4 = vcmp.lt.s32.totalorder %v107_v55, 16  ;;  %vm118_vm6 = vcmp.ge.s32.totalorder %v107_v55, 16 }
  0x62   :  { %4044 = vmatprep.subr.bf16.mxu1 %v4043_v27  ;;  %v4776_v59 = vmul.f32 0.35355338, %v4773_v57  ;;  %vm115_vm5 = vmand %vm113_vm3, %vm114_vm4  ;;  %vm119_vm7 = vcmp.lt.s32.totalorder %v107_v55, 24  ;;  %vm123_vm9 = vcmp.ge.s32.totalorder %v107_v55, 24  ;;  %vm124_vm10 = vcmp.lt.s32.totalorder %v107_v55, 32 }
  0x63   :  { %4046 = vmatpush3.bf16.msra.mxu1 %v4043_v27  ;;  %v4781_v61 = vsel %vm115_vm5, 1.0, %v4580_v22  ;;  %vm120_vm8 = vmand %vm118_vm6, %vm119_vm7  ;;  %vm789_vm15 = vcmask 778752   ;;  %vm796_vm2 = vcmask 1041152  }
  0x64   :  { %4042 = vmatpush3.bf16.msra.mxu0 %v4041_v26  ;;  %4048 = vmatprep.subr.bf16.mxu1 %v4047_v33  ;;  %v4791_v2 = vsel %vm120_vm8, 1.0, %v4580_v22  ;;  %vm125_vm11 = vmand %vm123_vm9, %vm124_vm10 }
  0x65   :  { %4052 = vmatprep.subr.bf16.mxu0 %v4051_v28 }
  0x67   :  { %3769 = vmatmul.mubr.msk.f32.vlgmr.msra.gmra.mrb[0].mxu0 %vm156_vm0, %v197_v29  ;;  %4050 = vmatpush3.bf16.msra.mxu1 %v4047_v33 }
  0x68   :  { %4054 = vmatpush3.bf16.msra.mxu0 %v4051_v28 }
  0x69   :  { %4056 = vmatprep.subr.bf16.mxu0 %v4055_v35 }
  0x6c   :  { %4058 = vmatpush3.bf16.msra.mxu0 %v4055_v35 }
  0x77   :  { %192 = vrot.lane.b32.xlu0 %v4714_v4, %s4577_s20 }
  0xea   :  { %v159_v5 = vpop.xlane.xlu0 %158 }
  0xeb   :  { %v164_v6 = vmul.f32 0.03125, %v159_v5 }
  0xed   :  { %v166_v7 = vsub.f32 %v104_v0, %v164_v6 }
  0xee   :  { %v162_v8 = vpop.xlane.xlu0 %161 }
  0xef   :  { %v165_v9 = vmul.f32 0.03125, %v162_v8  ;;  %v168_v10 = vmul.f32 %v166_v7, %v166_v7  ;;  %v4798_v8 = vsel %vm125_vm11, 1.0, %v4580_v22 }
  0xf1   :  { %v167_v11 = vsub.f32 %v105_v1, %v165_v9  ;;  %v170_v12 = vsel %vm156_vm0, %v168_v10, 0.0  ;;  %v4788_v1 = vmul.f32 0.35355338, %v4781_v61 }
  0xf2   :  { %171 = vadd.xlane.f32.xlu1 %v170_v12  ;;  %v193_v44 = vpop.permute.xlu0 %192 }
  0xf3   :  { %v169_v13 = vmul.f32 %v167_v11, %v167_v11 }
  0xf5   :  { %v173_v14 = vsel %vm156_vm0, %v169_v13, 0.0 }
  0xf6   :  { %174 = vadd.xlane.f32.xlu1 %v173_v14 }
 0x107   :  { %278 = vrot.lane.b32.xlu1 %v4714_v4, %s4581_s21 }
 0x10b   :  { %198 = vrot.lane.b32.xlu1 %v4714_v4, %s4582_s22 }
 0x13a   :  { %v270_v51 = vpop.f32.mrb[0].mxu0 }
 0x13b   :  { %v3770_v52 = vpop.f32.mrb[1].mxu0 }
 0x13c   :  { %v3463_v52 = vld [vmem:[%s5405_s4 + $0x60] sm:$0xff] }
 0x17f   :  { %v172_v36 = vpop.xlane.xlu1 %171 }
 0x180   :  { %v176_v37 = vmul.f32 0.03125, %v172_v36 }
 0x182   :  { %v178_v38 = vadd.f32 1e-05, %v176_v37 }
 0x183   :  { %v175_v39 = vpop.xlane.xlu1 %174 }
 0x184   :  { %4340 = vrsqrt.f32 %v178_v38  ;;  %v177_v40 = vmul.f32 0.03125, %v175_v39 }
 0x186   :  { %v179_v41 = vadd.f32 1e-05, %v177_v40 }
 0x187   :  { %v279_v53 = vpop.permute.xlu1 %278 }
 0x188   :  { %4342 = vrsqrt.f32 %v179_v41 }
 0x18b   :  { %v199_v56 = vpop.permute.xlu1 %198 }
 0x18c   :  { %v271_v58 = vadd.f32 %v270_v51, %v199_v56  ;;  %v3465_v56 = vld [vmem:[%s5405_s4 + $0x70] sm:$0xff] }
 0x18e   :  { %v4341_v42 = vpop.eup %4340  ;;  %v274_v60 = vmul.f32 %v271_v58, %v4776_v59  ;;  %v275_v10 = vmul.f32 %v271_v58, %v4788_v1 }
 0x18f   :  { %v182_v43 = vmul.f32 %v4341_v42, %v166_v7  ;;  %v4795_v7 = vmul.f32 0.35355338, %v4791_v2 }
 0x191   :  { %v190_v45 = vmul.f32 %v4714_v4, %v182_v43  ;;  %v276_v12 = vmul.f32 %v271_v58, %v4795_v7 }
 0x192   :  { %v4343_v46 = vpop.eup %4342 }
 0x193   :  { %v183_v47 = vmul.f32 %v4343_v46, %v167_v11  ;;  %v195_v48 = vadd.f32 %v193_v44, %v190_v45  ;;  %v4805_v11 = vmul.f32 0.35355338, %v4798_v8 }
 0x195   :  { %v191_v49 = vmul.f32 %v4714_v4, %v183_v47  ;;  %3779 = vmatprep.mubr.msk.f32.mxu1 %vm156_vm0, %v195_v48  ;;  %3790 = vmatprep.mubr.msk.f32.mxu0 %vm156_vm0, %v195_v48  ;;  %v277_v13 = vmul.f32 %v271_v58, %v4805_v11  ;;  %v3466_v58 = vld [vmem:[%s5405_s4 + $0x78] sm:$0xff] }
 0x197   :  { %v196_v50 = vadd.f32 %v193_v44, %v191_v49 }
 0x199   :  { %3780 = vmatmul.mubr.msk.f32.vlgmr.msra.gmra.mrb[0].mxu1 %vm156_vm0, %v196_v50  ;;  %3791 = vmatmul.mubr.msk.f32.vlgmr.msra.gmra.mrb[2].mxu0 %vm156_vm0, %v196_v50 }
 0x19a   :  { %3795 = vmatprep.mubr.msk.f32.mxu1 %vm156_vm0, %v274_v60 }
 0x26c   :  { %v3781_v63 = vpop.f32.mrb[0].mxu1  ;;  %v4785_v0 = vpop.f32.mrb[2].mxu0 }
 0x26d   :  { %v353_v3 = vpop.f32.mrb[1].mxu1  ;;  %v434_v4 = vpop.f32.mrb[3].mxu0  ;;  %v359_v9 = vadd.f32 %v3781_v63, %v279_v53 }
 0x26e   :  { %v354_v5 = vadd.f32 %v353_v3, %v279_v53  ;;  %v435_v6 = vadd.f32 %v4783_v62, %v434_v4  ;;  %v3464_v53 = vld [vmem:[%s5405_s4 + $0x68] sm:$0xff] }
 0x26f   :  { %v4060_v55 = vpack.c.bf16 %v3464_v53, %v3463_v52 }
 0x270   :  { %3793 = vmatprep.subr.msk.mxu1 %vm156_vm0, %v354_v5  ;;  %3801 = vmatprep.subr.mxu0 %v435_v6 }
 0x271   :  { %3794 = vmatpush3.xpose.msk.msra.mxu1 %vm156_vm0, %v354_v5  ;;  %3802 = vmatpush3.msra.mxu0 %v435_v6 }
 0x272   :  { %3820 = vmatprep.subr.msk.mxu1 %vm156_vm0, %v359_v9  ;;  %4059 = vmatprep.subr.bf16.mxu0 %v4578_v21 }
 0x274   :  { %3796 = vmatmul.mubr.msk.f32.vlgmr.msra.gmra.mrb[2].mxu1 %vm156_vm0, %v275_v10 }
 0x275   :  { %3798 = vmatprep.mubr.msk.f32.mxu1 %vm156_vm0, %v276_v12  ;;  %3821 = vmatpush3.xpose.msk.msra.mxu1 %vm156_vm0, %v359_v9 }
 0x276   :  { %4065 = vmatprep.subr.bf16.mxu1 %v4578_v21 }
 0x278   :  { %3799 = vmatmul.mubr.msk.f32.gmra.mrb[4].mxu1 %vm156_vm0, %v277_v13 }
 0x279   :  { %3822 = vmatprep.mubr.msk.f32.mxu1 %vm156_vm0, %v274_v60  ;;  %v4063_v60 = vpack.c.bf16 %v3466_v58, %v3465_v56 }
 0x27c   :  { %3823 = vmatmul.mubr.msk.f32.vlgmr.msra.gmra.mrb[6].mxu1 %vm156_vm0, %v275_v10 }
 0x27d   :  { %3825 = vmatprep.mubr.msk.f32.mxu1 %vm156_vm0, %v276_v12  ;;  %4067 = vmatpush3.bf16.msra.mxu1 %v4060_v55 }
 0x27e   :  { %4068 = vmatprep.subr.bf16.mxu1 %v4578_v21 }
 0x280   :  { %3826 = vmatmul.mubr.msk.f32.gmra.mrb[8].mxu1 %vm156_vm0, %v277_v13 }
 0x281   :  { %3844 = vmatprep.mubr.msk.f32.mxu1 %vm4579_vm1, %v4580_v22  ;;  %4070 = vmatpush3.bf16.msra.mxu1 %v4063_v60 }
 0x347   :  { %v3797_v14 = vpop.f32.mrb[2].mxu1 }
 0x348   :  { %v524_v15 = vpop.f32.mrb[3].mxu1  ;;  %v547_v16 = vsel %vm543_vm12, %v3797_v14, -inf }
 0x349   :  { %548 = vmax.xlane.f32.xlu0 %v547_v16  ;;  %v544_v17 = vsel %vm543_vm12, %v524_v15, -inf }
 0x34a   :  { %545 = vmax.xlane.f32.xlu1 %v544_v17 }
 0x34b   :  { %v3800_v18 = vpop.f32.mrb[4].mxu1 }
 0x34c   :  { %v534_v19 = vpop.f32.mrb[5].mxu1  ;;  %v553_v25 = vsel %vm543_vm12, %v3800_v18, -inf }
 0x34d   :  { %v550_v20 = vsel %vm543_vm12, %v534_v19, -inf }
 0x34e   :  { %551 = vmax.xlane.f32.xlu0 %v550_v20 }
 0x34f   :  { %v4824_v23 = vpop.f32.mrb[6].mxu1 }
 0x350   :  { %v894_v24 = vpop.f32.mrb[7].mxu1  ;;  %v916_v50 = vsel %vm543_vm12, %v4824_v23, -inf }
 0x351   :  { %v913_v47 = vsel %vm543_vm12, %v894_v24, -inf }
 0x352   :  { %554 = vmax.xlane.f32.xlu0 %v553_v25 }
 0x353   :  { %v4827_v26 = vpop.f32.mrb[8].mxu1 }
 0x354   :  { %v4829_v27 = vpop.f32.mrb[9].mxu1  ;;  %v922_v51 = vsel %vm543_vm12, %v4827_v26, -inf }
 0x355   :  { %v919_v49 = vsel %vm543_vm12, %v4829_v27, -inf }
 0x3d6   :  { %v549_v28 = vpop.xlane.xlu0 %548 }
 0x3d7   :  { %v557_v29 = vsub.f32 %v3797_v14, %v549_v28  ;;  %v546_v30 = vpop.xlane.xlu1 %545 }
 0x3d8   :  { %v556_v31 = vsub.f32 %v524_v15, %v546_v30 }
 0x3d9   :  { %v562_v32 = vmul.f32 1.442695, %v557_v29 }
 0x3da   :  { %v560_v33 = vmul.f32 1.442695, %v556_v31 }
 0x3db   :  { %4344 = vpow2.f32 %v562_v32  ;;  %v552_v34 = vpop.xlane.xlu0 %551 }
 0x3dc   :  { %4346 = vpow2.f32 %v560_v33  ;;  %v558_v35 = vsub.f32 %v534_v19, %v552_v34 }
 0x3de   :  { %v564_v36 = vmul.f32 1.442695, %v558_v35 }
 0x3df   :  { %v555_v37 = vpop.xlane.xlu0 %554 }
 0x3e0   :  { %4348 = vpow2.f32 %v564_v36  ;;  %v559_v38 = vsub.f32 %v3800_v18, %v555_v37 }
 0x3e2   :  { %v566_v39 = vmul.f32 1.442695, %v559_v38 }
 0x3e4   :  { %4350 = vpow2.f32 %v566_v39 }
 0x3e5   :  { %v4345_v40 = vpop.eup %4344 }
 0x3e6   :  { %v4347_v41 = vpop.eup %4346  ;;  %v571_v42 = vsel %vm543_vm12, %v4345_v40, 0.0 }
 0x3e7   :  { %572 = vadd.xlane.f32.xlu0 %v571_v42  ;;  %v568_v43 = vsel %vm543_vm12, %v4347_v41, 0.0 }
 0x3e8   :  { %569 = vadd.xlane.f32.xlu1 %v568_v43 }
 0x3ea   :  { %v4349_v44 = vpop.eup %4348 }
 0x3eb   :  { %v574_v45 = vsel %vm543_vm12, %v4349_v44, 0.0 }
 0x3ec   :  { %575 = vadd.xlane.f32.xlu1 %v574_v45 }
 0x3ee   :  { %v4351_v46 = vpop.eup %4350 }
 0x3ef   :  { %v577_v48 = vsel %vm543_vm12, %v4351_v46, 0.0 }
 0x3f0   :  { %914 = vmax.xlane.f32.xlu1 %v913_v47  ;;  %578 = vadd.xlane.f32.xlu0 %v577_v48 }
 0x3f4   :  { %920 = vmax.xlane.f32.xlu1 %v919_v49  ;;  %917 = vmax.xlane.f32.xlu0 %v916_v50 }
 0x3f8   :  { %923 = vmax.xlane.f32.xlu0 %v922_v51 }
 0x474   :  { %v573_v63 = vpop.xlane.xlu0 %572 }
 0x475   :  { %4352 = vrcp.f32 %v573_v63  ;;  %v570_v3 = vpop.xlane.xlu1 %569 }
 0x476   :  { %4354 = vrcp.f32 %v570_v3 }
 0x479   :  { %v576_v4 = vpop.xlane.xlu1 %575 }
 0x47a   :  { %4356 = vrcp.f32 %v576_v4 }
 0x47d   :  { %v915_v5 = vpop.xlane.xlu1 %914  ;;  %v579_v6 = vpop.xlane.xlu0 %578 }
 0x47e   :  { %v925_v9 = vsub.f32 %v894_v24, %v915_v5  ;;  %4358 = vrcp.f32 %v579_v6  ;;  %v4583_v6 = vmov 1983009808  }
 0x47f   :  { %v4353_v10 = vpop.eup %4352 }
 0x480   :  { %v4355_v12 = vpop.eup %4354  ;;  %v929_v13 = vmul.f32 1.442695, %v925_v9  ;;  %v583_v19 = vmul.f32 %v4353_v10, %v4345_v40  ;;  %v772_v9 = vunpack.c.l.s4 %v4583_v6 }
 0x481   :  { %v921_v14 = vpop.xlane.xlu1 %920  ;;  %v918_v15 = vpop.xlane.xlu0 %917  ;;  %v581_v16 = vmul.f32 %v4355_v12, %v4347_v41  ;;  %v4883_v12 = vshrl.u32 %v106_v54, 7 }
 0x482   :  { %4360 = vpow2.f32 %v929_v13  ;;  %v927_v17 = vsub.f32 %v4829_v27, %v921_v14  ;;  %v926_v18 = vsub.f32 %v4824_v23, %v918_v15  ;;  %v440_v27 = vadd.f32 %v4785_v0, %v4783_v62 }
 0x483   :  { %3803 = vmatprep.mubr.msk.f32.mxu0 %vm543_vm12, %v581_v16  ;;  %v773_v10 = vunpack.c.0.s8 %v772_v9  ;;  %v1200_v9 = vld [vmem:[#allocation13 + $0x60] sm:$0xff] }
 0x484   :  { %v4357_v20 = vpop.eup %4356  ;;  %v933_v25 = vmul.f32 1.442695, %v927_v17  ;;  %v931_v28 = vmul.f32 1.442695, %v926_v18  ;;  %3804 = vmatmul.mubr.msk.f32.vlgmr.msra.gmra.mrb[4].mxu0 %vm543_vm12, %v583_v19 }
 0x485   :  { %4061 = vmatpush3.bf16.msra.mxu0 %v4060_v55  ;;  %v924_v24 = vpop.xlane.xlu0 %923  ;;  %v585_v29 = vmul.f32 %v4357_v20, %v4349_v44  ;;  %v4888_v14 = vsub.s32 %v773_v10, %v4883_v12  ;;  %v1202_v10 = vld [vmem:[#allocation13 + $0x70] sm:$0xff] }
 0x486   :  { %4362 = vpow2.f32 %v933_v25  ;;  %v928_v30 = vsub.f32 %v4827_v26, %v924_v24  ;;  %4062 = vmatprep.subr.bf16.mxu0 %v4578_v21 }
 0x487   :  { %4364 = vpow2.f32 %v931_v28  ;;  %3806 = vmatprep.mubr.msk.f32.mxu0 %vm543_vm12, %v585_v29 }
 0x488   :  { %v4359_v23 = vpop.eup %4358  ;;  %v935_v31 = vmul.f32 1.442695, %v928_v30 }
 0x489   :  { %4064 = vmatpush3.bf16.msra.mxu0 %v4063_v60  ;;  %v587_v32 = vmul.f32 %v4359_v23, %v4351_v46 }
 0x48a   :  { %4366 = vpow2.f32 %v935_v31  ;;  %3828 = vmatprep.subr.mxu0 %v440_v27 }
 0x48b   :  { %3807 = vmatmul.mubr.msk.f32.gmra.mrb[6].mxu0 %vm543_vm12, %v587_v32 }
 0x48c   :  { %v4361_v33 = vpop.eup %4360  ;;  %3817 = vmatprep.mubr.msk.f32.mxu0 %vm4579_vm1, %v4580_v22 }
 0x48d   :  { %v937_v26 = vsel %vm543_vm12, %v4361_v33, 0.0 }
 0x48e   :  { %938 = vadd.xlane.f32.xlu1 %v937_v26 }
 0x490   :  { %v4363_v34 = vpop.eup %4362 }
 0x491   :  { %v4365_v35 = vpop.eup %4364  ;;  %v943_v36 = vsel %vm543_vm12, %v4363_v34, 0.0 }
 0x492   :  { %944 = vadd.xlane.f32.xlu1 %v943_v36  ;;  %v940_v0 = vsel %vm543_vm12, %v4365_v35, 0.0 }
 0x493   :  { %941 = vadd.xlane.f32.xlu0 %v940_v0 }
 0x494   :  { %v4367_v37 = vpop.eup %4366 }
 0x495   :  { %v946_v38 = vsel %vm543_vm12, %v4367_v37, 0.0 }
 0x497   :  { %947 = vadd.xlane.f32.xlu0 %v946_v38  ;;  %v1189_v38 = vld [vmem:[#allocation13 + $0x8] sm:$0xff] }
 0x4a3   :  { %692 = vrot.lane.b32.xlu1 %v4783_v62, %s4577_s20 }
 0x51b   :  { %v939_v39 = vpop.xlane.xlu1 %938 }
 0x51c   :  { %4368 = vrcp.f32 %v939_v39  ;;  %v1191_v39 = vld [vmem:[#allocation13 + $0x18] sm:$0xff] }
 0x51f   :  { %v945_v44 = vpop.xlane.xlu1 %944 }
 0x520   :  { %v942_v40 = vpop.xlane.xlu0 %941 }
 0x521   :  { %4370 = vrcp.f32 %v942_v40  ;;  %v1188_v40 = vld [vmem:[#allocation13] sm:$0xff] }
 0x522   :  { %4372 = vrcp.f32 %v945_v44  ;;  %v1195_v44 = vld [vmem:[#allocation13 + $0x38] sm:$0xff] }
 0x523   :  { %v4885_v13 = vpop.permute.xlu1 %692 }
 0x524   :  { %v948_v47 = vpop.xlane.xlu0 %947 }
 0x525   :  { %4374 = vrcp.f32 %v948_v47  ;;  %v1192_v47 = vld [vmem:[#allocation13 + $0x20] sm:$0xff] }
 0x526   :  { %v4369_v52 = vpop.eup %4368 }
 0x527   :  { %v950_v58 = vmul.f32 %v4369_v52, %v4361_v33 }
 0x52b   :  { %v4371_v56 = vpop.eup %4370 }
 0x52c   :  { %v4373_v60 = vpop.eup %4372  ;;  %v952_v63 = vmul.f32 %v4371_v56, %v4365_v35  ;;  %v1196_v56 = vld [vmem:[#allocation13 + $0x40] sm:$0xff] }
 0x52d   :  { %v954_v4 = vmul.f32 %v4373_v60, %v4363_v34  ;;  %v1201_v60 = vld [vmem:[#allocation13 + $0x68] sm:$0xff] }
 0x52f   :  { %v4375_v3 = vpop.eup %4374 }
 0x530   :  { %v956_v5 = vmul.f32 %v4375_v3, %v4367_v37 }
 0x557   :  { %v3805_v41 = vpop.f32.mrb[4].mxu0 }
 0x558   :  { %v686_v42 = vmul.f32 %v3805_v41, %v4781_v61  ;;  %v666_v43 = vpop.f32.mrb[5].mxu0  ;;  %v4071_v41 = vpack.c.bf16 %v1191_v39, %v1189_v38  ;;  %v1216_v39 = vld [vmem:[#allocation13 + $0xe0] sm:$0xff] }
 0x559   :  { %v685_v45 = vmul.f32 %v4773_v57, %v666_v43  ;;  %v1193_v43 = vld [vmem:[#allocation13 + $0x28] sm:$0xff] }
 0x55b   :  { %v689_v46 = vadd.f32 %v686_v42, %v685_v45  ;;  %v1190_v42 = vld [vmem:[#allocation13 + $0x10] sm:$0xff] }
 0x55c   :  { %v4073_v45 = vpack.c.bf16 %v1190_v42, %v1188_v40  ;;  %v1218_v40 = vld [vmem:[#allocation13 + $0xf0] sm:$0xff]  ;;  %v1223_v42 = vld [vmem:[#allocation13 + $0x118] sm:$0xff] }
 0x55e   :  { %v3808_v48 = vpop.f32.mrb[6].mxu0 }
 0x55f   :  { %v688_v49 = vmul.f32 %v3808_v48, %v4798_v8  ;;  %v676_v50 = vpop.f32.mrb[7].mxu0  ;;  %v1194_v48 = vld [vmem:[#allocation13 + $0x30] sm:$0xff] }
 0x560   :  { %v687_v51 = vmul.f32 %v4791_v2, %v676_v50  ;;  %v4077_v52 = vpack.c.bf16 %v1194_v48, %v1192_v47  ;;  %v1225_v47 = vld [vmem:[#allocation13 + $0x128] sm:$0xff]  ;;  %v1227_v48 = vld [vmem:[#allocation13 + $0x138] sm:$0xff] }
 0x562   :  { %v690_v53 = vadd.f32 %v688_v49, %v687_v51  ;;  %v1197_v49 = vld [vmem:[#allocation13 + $0x48] sm:$0xff]  ;;  %v1199_v51 = vld [vmem:[#allocation13 + $0x58] sm:$0xff] }
 0x564   :  { %v691_v55 = vadd.f32 %v690_v53, %v689_v46  ;;  %v4075_v46 = vpack.c.bf16 %v1195_v44, %v1193_v43  ;;  %v4101_v43 = vpack.c.bf16 %v1218_v40, %v1216_v39  ;;  %v1246_v39 = vld [vmem:[#allocation13 + $0x1d0] sm:$0xff] }
 0x566   :  { %3818 = vmatmul.mubr.msk.f32.vlgmr.msra.gmra.mrb[8].mxu0 %vm156_vm0, %v691_v55  ;;  %v4079_v55 = vpack.c.bf16 %v1199_v51, %v1197_v49  ;;  %v1224_v51 = vld [vmem:[#allocation13 + $0x120] sm:$0xff] }
 0x567   :  { %3829 = vmatpush3.msra.mxu0 %v440_v27  ;;  %3830 = vmatprep.mubr.msk.f32.mxu0 %vm543_vm12, %v950_v58  ;;  %v1198_v58 = vld [vmem:[#allocation13 + $0x50] sm:$0xff] }
 0x568   :  { %4072 = vmatprep.subr.bf16.mxu0 %v4071_v41  ;;  %v1221_v41 = vld [vmem:[#allocation13 + $0x108] sm:$0xff] }
 0x569   :  { %v4103_v44 = vpack.c.bf16 %v1223_v42, %v1221_v41 }
 0x56a   :  { %3831 = vmatmul.mubr.msk.f32.vlgmr.msra.gmra.mrb[10].mxu0 %vm543_vm12, %v952_v63  ;;  %v1203_v63 = vld [vmem:[#allocation13 + $0x78] sm:$0xff] }
 0x56b   :  { %3833 = vmatprep.mubr.msk.f32.mxu0 %vm543_vm12, %v954_v4  ;;  %4074 = vmatpush1.bf16.msra.mxu0 %v4073_v45  ;;  %v4081_v4 = vpack.c.bf16 %v1198_v58, %v1196_v56  ;;  %v4083_v6 = vpack.c.bf16 %v1203_v63, %v1201_v60  ;;  %v1220_v45 = vld [vmem:[#allocation13 + $0x100] sm:$0xff]  ;;  %v1230_v63 = vld [vmem:[#allocation13 + $0x150] sm:$0xff] }
 0x56c   :  { %4076 = vmatprep.subr.bf16.mxu0 %v4075_v46  ;;  %v1222_v46 = vld [vmem:[#allocation13 + $0x110] sm:$0xff]  ;;  %v1228_v60 = vld [vmem:[#allocation13 + $0x140] sm:$0xff] }
 0x56d   :  { %v4105_v49 = vpack.c.bf16 %v1222_v46, %v1220_v45  ;;  %v1248_v46 = vld [vmem:[#allocation13 + $0x1e0] sm:$0xff] }
 0x56e   :  { %3834 = vmatmul.mubr.msk.f32.gmra.mrb[12].mxu0 %vm543_vm12, %v956_v5 }
 0x56f   :  { %4078 = vmatpush1.bf16.msra.mxu0 %v4077_v52  ;;  %v1226_v52 = vld [vmem:[#allocation13 + $0x130] sm:$0xff] }
 0x570   :  { %4080 = vmatprep.subr.bf16.mxu0 %v4079_v55  ;;  %v1231_v55 = vld [vmem:[#allocation13 + $0x158] sm:$0xff]  ;;  %v4109_v56 = vpack.c.bf16 %v1226_v52, %v1224_v51 }
 0x573   :  { %4082 = vmatpush1.bf16.msra.mxu0 %v4081_v4  ;;  %v1233_v4 = vld [vmem:[#allocation13 + $0x168] sm:$0xff] }
 0x574   :  { %4084 = vmatprep.subr.bf16.mxu0 %v4083_v6 }
 0x639   :  { %v764_v15 = vpop.f32.mrb[8].mxu0 }
 0x63a   :  { %v765_v16 = vadd.f32 %v764_v15, %v4885_v13  ;;  %v3819_v17 = vpop.f32.mrb[9].mxu0  ;;  %v1205_v15 = vld [vmem:[#allocation13 + $0x88] sm:$0xff] }
 0x63c   :  { %769 = vst.msk [vmem:[#allocation2] sm:$0x1] %vm768_vm13, %v765_v16  ;;  %v777_v18 = vrot.slane %v765_v16, %v4888_v14  ;;  %v798_v19 = vcombine.high %v765_v16, %v765_v16  ;;  %v1207_v16 = vld [vmem:[#allocation13 + $0x98] sm:$0xff] }
 0x63d   :  { %v3832_v20 = vpop.f32.mrb[10].mxu0 }
 0x63e   :  { %v805_v25 = vrot.slane %v798_v19, %v4888_v14  ;;  %v1055_v54 = vmul.f32 %v3832_v20, %v4781_v61  ;;  %v1035_v28 = vpop.f32.mrb[11].mxu0  ;;  %v3484_v24 = vrot.slane %v777_v18, 9  ;;  %v785_v33 = vcombine.high %v777_v18, %v777_v18 }
 0x63f   :  { %v1054_v29 = vmul.f32 %v4773_v57, %v1035_v28  ;;  %v4085_v18 = vpack.c.bf16 %v1202_v10, %v1200_v9  ;;  %v4087_v20 = vpack.c.bf16 %v1207_v16, %v1205_v15  ;;  %v1209_v28 = vld [vmem:[#allocation13 + $0xa8] sm:$0xff]  ;;  %v1232_v9 = vld [vmem:[#allocation13 + $0x160] sm:$0xff]  ;;  %v1234_v10 = vld [vmem:[#allocation13 + $0x170] sm:$0xff] }
 0x640   :  { %807 = vst.msk [vmem:[#allocation2 + $0x2] sm:$0x1] %vm768_vm13, %v805_v25  ;;  %780 = vrot.lane.b32.xlu0 %v3484_v24, %s4581_s21  ;;  %v3486_v30 = vrot.slane %v805_v25, 9  ;;  %v814_v34 = vcombine.high %v805_v25, %v805_v25  ;;  %v3485_v36 = vrot.slane %v785_v33, 9  ;;  %v1204_v25 = vld [vmem:[#allocation13 + $0x80] sm:$0xff]  ;;  %v1211_v24 = vld [vmem:[#allocation13 + $0xb8] sm:$0xff]  ;;  %v4117_v15 = vpack.c.bf16 %v1234_v10, %v1232_v9 }
 0x641   :  { %v1058_v23 = vadd.f32 %v1055_v54, %v1054_v29  ;;  %v3835_v27 = vpop.f32.mrb[12].mxu0  ;;  %v1206_v54 = vld [vmem:[#allocation13 + $0x90] sm:$0xff]  ;;  %4086 = vmatpush1.bf16.msra.mxu0 %v4085_v18  ;;  %v1237_v16 = vld [vmem:[#allocation13 + $0x188] sm:$0xff] }
 0x642   :  { %v1057_v31 = vmul.f32 %v3835_v27, %v4798_v8  ;;  %810 = vrot.lane.b32.xlu1 %v3486_v30, %s4581_s21  ;;  %v1045_v32 = vpop.f32.mrb[13].mxu0  ;;  %v3487_v37 = vrot.slane %v814_v34, 9  ;;  %v4089_v29 = vpack.c.bf16 %v1206_v54, %v1204_v25  ;;  %4088 = vmatprep.subr.bf16.mxu0 %v4087_v20  ;;  %v4091_v30 = vpack.c.bf16 %v1211_v24, %v1209_v28  ;;  %v1210_v27 = vld [vmem:[#allocation13 + $0xb0] sm:$0xff]  ;;  %v1236_v20 = vld [vmem:[#allocation13 + $0x180] sm:$0xff] }
 0x643   :  { %v1056_v26 = vmul.f32 %v4791_v2, %v1045_v32  ;;  %v1215_v32 = vld [vmem:[#allocation13 + $0xd8] sm:$0xff]  ;;  %v1238_v25 = vld [vmem:[#allocation13 + $0x190] sm:$0xff] }
 0x644   :  { %786 = vrot.lane.b32.xlu0 %v785_v33, %s4582_s22  ;;  %v4121_v24 = vpack.c.bf16 %v1238_v25, %v1236_v20 }
 0x645   :  { %v1059_v35 = vadd.f32 %v1057_v31, %v1056_v26  ;;  %v1213_v31 = vld [vmem:[#allocation13 + $0xc8] sm:$0xff]  ;;  %4090 = vmatpush1.bf16.msra.mxu0 %v4089_v29 }
 0x646   :  { %815 = vrot.lane.b32.xlu1 %v814_v34, %s4582_s22  ;;  %4092 = vmatprep.subr.bf16.mxu0 %v4091_v30  ;;  %v4095_v26 = vpack.c.bf16 %v1215_v32, %v1213_v31  ;;  %v1212_v34 = vld [vmem:[#allocation13 + $0xc0] sm:$0xff]  ;;  %v1241_v29 = vld [vmem:[#allocation13 + $0x1a8] sm:$0xff]  ;;  %v1243_v30 = vld [vmem:[#allocation13 + $0x1b8] sm:$0xff] }
 0x647   :  { %v1060_v0 = vadd.f32 %v1059_v35, %v1058_v23  ;;  %v1208_v23 = vld [vmem:[#allocation13 + $0xa0] sm:$0xff]  ;;  %v1214_v35 = vld [vmem:[#allocation13 + $0xd0] sm:$0xff]  ;;  %v4123_v31 = vpack.c.bf16 %v1243_v30, %v1241_v29 }
 0x648   :  { %793 = vrot.lane.b32.xlu0 %v3485_v36, %s4577_s20  ;;  %v4093_v33 = vpack.c.bf16 %v1210_v27, %v1208_v23  ;;  %v1217_v36 = vld [vmem:[#allocation13 + $0xe8] sm:$0xff]  ;;  %v1240_v32 = vld [vmem:[#allocation13 + $0x1a0] sm:$0xff] }
 0x649   :  { %3845 = vmatmul.mubr.msk.f32.vlgmr.msra.gmra.mrb[10].mxu1 %vm156_vm0, %v1060_v0  ;;  %v1219_v0 = vld [vmem:[#allocation13 + $0xf8] sm:$0xff] }
 0x64a   :  { %821 = vrot.lane.b32.xlu1 %v3487_v37, %s4577_s20  ;;  %4094 = vmatpush1.bf16.msra.mxu0 %v4093_v33  ;;  %v4097_v37 = vpack.c.bf16 %v1214_v35, %v1212_v34  ;;  %v4099_v38 = vpack.c.bf16 %v1219_v0, %v1217_v36  ;;  %v1242_v33 = vld [vmem:[#allocation13 + $0x1b0] sm:$0xff]  ;;  %v1245_v36 = vld [vmem:[#allocation13 + $0x1c8] sm:$0xff]  ;;  %v1247_v0 = vld [vmem:[#allocation13 + $0x1d8] sm:$0xff] }
 0x64b   :  { %4096 = vmatprep.subr.bf16.mxu0 %v4095_v26 }
 0x64e   :  { %4098 = vmatpush1.bf16.msra.mxu0 %v4097_v37  ;;  %v4127_v37 = vpack.c.bf16 %v1247_v0, %v1245_v36 }
 0x64f   :  { %4100 = vmatprep.subr.bf16.mxu0 %v4099_v38  ;;  %v1244_v38 = vld [vmem:[#allocation13 + $0x1c0] sm:$0xff] }
 0x650   :  { %v4129_v42 = vpack.c.bf16 %v1246_v39, %v1244_v38 }
 0x652   :  { %4102 = vmatpush1.bf16.msra.mxu0 %v4101_v43  ;;  %v1249_v43 = vld [vmem:[#allocation13 + $0x1e8] sm:$0xff] }
 0x653   :  { %4104 = vmatprep.subr.bf16.mxu0 %v4103_v44  ;;  %v1251_v44 = vld [vmem:[#allocation13 + $0x1f8] sm:$0xff] }
 0x654   :  { %v4131_v45 = vpack.c.bf16 %v1251_v44, %v1249_v43  ;;  %v4425_v43 = vld [vmem:[#allocation5 + $0x8] sm:$0xff] }
 0x656   :  { %4106 = vmatpush1.bf16.msra.mxu0 %v4105_v49 }
 0x6b2   :  { %v781_v50 = vpop.permute.xlu0 %780 }
 0x6b3   :  { %784 = vst.msk [vmem:[#allocation2] sm:$0x1] %vm783_vm14, %v781_v50  ;;  %v4107_v50 = vpack.c.bf16 %v1227_v48, %v1225_v47  ;;  %v1250_v47 = vld [vmem:[#allocation13 + $0x1f0] sm:$0xff] }
 0x6b4   :  { %v811_v53 = vpop.permute.xlu1 %810  ;;  %v4133_v49 = vpack.c.bf16 %v1250_v47, %v1248_v46 }
 0x6b5   :  { %813 = vst.msk [vmem:[#allocation2 + $0x2] sm:$0x1] %vm783_vm14, %v811_v53  ;;  %v1229_v53 = vld [vmem:[#allocation13 + $0x148] sm:$0xff]  ;;  %4108 = vmatprep.subr.bf16.mxu0 %v4107_v50 }
 0x6b6   :  { %v787_v3 = vpop.permute.xlu0 %786  ;;  %v4111_v58 = vpack.c.bf16 %v1231_v55, %v1229_v53  ;;  %4110 = vmatpush1.bf16.msra.mxu0 %v4109_v56 }
 0x6b7   :  { %790 = vst.msk [vmem:[#allocation2] sm:$0x1] %vm789_vm15, %v787_v3  ;;  %v4113_v3 = vpack.c.bf16 %v1230_v63, %v1228_v60 }
 0x6b8   :  { %v816_v5 = vpop.permute.xlu1 %815  ;;  %4112 = vmatprep.subr.bf16.mxu0 %v4111_v58 }
 0x6b9   :  { %818 = vst.msk [vmem:[#allocation2 + $0x2] sm:$0x1] %vm789_vm15, %v816_v5  ;;  %v1235_v5 = vld [vmem:[#allocation13 + $0x178] sm:$0xff] }
 0x6ba   :  { %v794_v17 = vpop.permute.xlu0 %793  ;;  %4114 = vmatpush1.bf16.msra.mxu0 %v4113_v3  ;;  %v4115_v6 = vpack.c.bf16 %v1235_v5, %v1233_v4  ;;  %v1255_v3 = vsub.s32 0, %v4883_v12  ;;  %v136_v4 = vld [vmem:[#allocation10 + $0x1] sm:$0x3]  ;;  %v1259_v5 = vsub.s32 1, %v4883_v12 }
 0x6bb   :  { %797 = vst.msk [vmem:[#allocation2] sm:$0x1] %vm796_vm2, %v794_v17  ;;  %v1239_v17 = vld [vmem:[#allocation13 + $0x198] sm:$0xff] }
 0x6bc   :  { %v822_v19 = vpop.permute.xlu1 %821  ;;  %4116 = vmatprep.subr.bf16.mxu0 %v4115_v6  ;;  %v4119_v18 = vpack.c.bf16 %v1239_v17, %v1237_v16  ;;  %v1256_v6 = vrot.slane %v136_v4, %v1255_v3  ;;  %v1260_v9 = vrot.slane %v136_v4, %v1259_v5  ;;  %v1527_v4 = vld [vmem:[%s5407_s6 + $0x10] sm:$0xff] }
 0x6bd   :  { %824 = vst.msk [vmem:[#allocation2 + $0x2] sm:$0x1] %vm796_vm2, %v822_v19 }
 0x6be   :  { %4118 = vmatpush1.bf16.msra.mxu0 %v4117_v15 }
 0x6bf   :  { %4120 = vmatprep.subr.bf16.mxu0 %v4119_v18 }
 0x6c2   :  { %4122 = vmatpush1.bf16.msra.mxu0 %v4121_v24 }
 0x6c3   :  { %4124 = vmatprep.subr.bf16.mxu0 %v4123_v31 }
 0x71c   :  { %v1130_v19 = vpop.f32.mrb[10].mxu1 }
 0x71d   :  { %v1131_v54 = vadd.f32 %v1130_v19, %v4885_v13  ;;  %v3846_v28 = vpop.f32.mrb[11].mxu1  ;;  %v4125_v13 = vpack.c.bf16 %v1242_v33, %v1240_v32 }
 0x71f   :  { %1134 = vst.msk [vmem:[#allocation2 + $0x1] sm:$0x1] %vm768_vm13, %v1131_v54  ;;  %v1142_v23 = vrot.slane %v1131_v54, %v4888_v14  ;;  %v1160_v27 = vcombine.high %v1131_v54, %v1131_v54  ;;  %4126 = vmatpush1.bf16.msra.mxu0 %v4125_v13 }
 0x720   :  { %4128 = vmatprep.subr.bf16.mxu0 %v4127_v37  ;;  %v4424_v37 = vld [vmem:[#allocation5] sm:$0xff] }
 0x721   :  { %v1167_v26 = vrot.slane %v1160_v27, %v4888_v14  ;;  %v1149_v34 = vcombine.high %v1142_v23, %v1142_v23  ;;  %v3498_v35 = vrot.slane %v1142_v23, 9 }
 0x723   :  { %1169 = vst.msk [vmem:[#allocation2 + $0x3] sm:$0x1] %vm768_vm13, %v1167_v26  ;;  %1150 = vrot.lane.b32.xlu0 %v1149_v34, %s4582_s22  ;;  %1145 = vrot.lane.b32.xlu1 %v3498_v35, %s4581_s21  ;;  %v3499_v40 = vrot.slane %v1149_v34, 9  ;;  %v3500_v41 = vrot.slane %v1167_v26, 9  ;;  %v1176_v48 = vcombine.high %v1167_v26, %v1167_v26 }
 0x724   :  { %4130 = vmatpush1.bf16.msra.mxu0 %v4129_v42 }
 0x725   :  { %4132 = vmatprep.subr.bf16.mxu0 %v4131_v45  ;;  %v3501_v50 = vrot.slane %v1176_v48, 9 }
 0x727   :  { %1156 = vrot.lane.b32.xlu0 %v3499_v40, %s4577_s20  ;;  %1172 = vrot.lane.b32.xlu1 %v3500_v41, %s4581_s21 }
 0x728   :  { %4134 = vmatpush1.bf16.msra.mxu0 %v4133_v49 }
 0x72b   :  { %1177 = vrot.lane.b32.xlu1 %v1176_v48, %s4582_s22 }
 0x72f   :  { %1183 = vrot.lane.b32.xlu1 %v3501_v50, %s4577_s20 }
 0x795   :  { %v1146_v51 = vpop.permute.xlu1 %1145  ;;  %v1151_v52 = vpop.permute.xlu0 %1150 }
 0x796   :  { %1148 = vst.msk [vmem:[#allocation2 + $0x1] sm:$0x1] %vm783_vm14, %v1146_v51 }
 0x797   :  { %1153 = vst.msk [vmem:[#allocation2 + $0x1] sm:$0x1] %vm789_vm15, %v1151_v52 }
 0x799   :  { %v1173_v53 = vpop.permute.xlu1 %1172  ;;  %v1157_v55 = vpop.permute.xlu0 %1156 }
 0x79a   :  { %1175 = vst.msk [vmem:[#allocation2 + $0x3] sm:$0x1] %vm783_vm14, %v1173_v53 }
 0x79b   :  { %1159 = vst.msk [vmem:[#allocation2 + $0x1] sm:$0x1] %vm796_vm2, %v1157_v55 }
 0x79d   :  { %v1178_v56 = vpop.permute.xlu1 %1177 }
 0x79e   :  { %1180 = vst.msk [vmem:[#allocation2 + $0x3] sm:$0x1] %vm789_vm15, %v1178_v56 }
 0x7a1   :  { %v1184_v58 = vpop.permute.xlu1 %1183 }
 0x7a2   :  { %1186 = vst.msk [vmem:[#allocation2 + $0x3] sm:$0x1] %vm796_vm2, %v1184_v58  ;;  %v1525_v58 = vld [vmem:[%s5407_s6] sm:$0xff] }
 0x7a9   :  { %v3502_v60 = vld.sshfl [vmem:[#allocation2] sm:$0x33 pattern:$0x76325410] }
 0x7aa   :  { %v1271_v63 = vcombine.high %v3502_v60, %v3502_v60 }
 0x7ac   :  { %1338 = vmatprep.mubr.f32.mxu0 %v1271_v63 }
 0x7ad   :  { %1339 = vmatmul.mubr.f32.vlgmr.msra.gmra.mrb[14].mxu0 %v3502_v60  ;;  %v1526_v60 = vld [vmem:[%s5407_s6 + $0x8] sm:$0xff] }
 0x7ae   :  { %v4135_v63 = vpack.c.bf16 %v1526_v60, %v1525_v58 }
 0x7b0   :  { %4136 = vmatprep.subr.bf16.mxu1 %v4135_v63 }
 0x7b1   :  { %4138 = vmatpush3.bf16.msra.mxu1 %v4135_v63 }
 0x880   :  { %v1340_v10 = vpop.f32.mrb[14].mxu0 }
 0x881   :  { %v1341_v15 = vadd.f32 %v1340_v10, %v1256_v6  ;;  %v1342_v16 = vpop.f32.mrb[15].mxu0  ;;  %v1528_v6 = vld [vmem:[%s5407_s6 + $0x18] sm:$0xff]  ;;  %v1619_v10 = vld [vmem:[%s5408_s7 + $0x8] sm:$0xff] }
 0x882   :  { %v1343_v17 = vadd.f32 %v1342_v16, %v1260_v9  ;;  %v1618_v9 = vld [vmem:[%s5408_s7] sm:$0xff] }
 0x884   :  { %v1347_v18 = vcombine.low %v1341_v15, %v1343_v17  ;;  %v4143_v15 = vpack.c.bf16 %v1619_v10, %v1618_v9 }
 0x886   :  { %3503 = vst.sshfl [vmem:[#allocation3] sm:$0x33 pattern:$0x76325410] %v1347_v18 }
 0x88d   :  { %v1357_v19 = vld [vmem:[#allocation3] sm:$0x1]  ;;  %v1389_v20 = vld [vmem:[#allocation3 + $0x2] sm:$0x1]  ;;  %v1421_v25 = vld [vmem:[#allocation3 + $0x1] sm:$0x1] }
 0x88e   :  { %1358 = vst.msk [vmem:[#allocation4] sm:$0x1] %vm768_vm13, %v1357_v19  ;;  %1390 = vst.msk [vmem:[#allocation4 + $0x4] sm:$0x1] %vm768_vm13, %v1389_v20  ;;  %v1453_v54 = vld [vmem:[#allocation3 + $0x3] sm:$0x1] }
 0x88f   :  { %1422 = vst.msk [vmem:[#allocation4 + $0x8] sm:$0x1] %vm768_vm13, %v1421_v25  ;;  %v3505_v28 = vld [vmem:[#allocation3] ss:$0 sm:$0xff]  ;;  %1454 = vst.msk [vmem:[#allocation4 + $0xc] sm:$0x1] %vm768_vm13, %v1453_v54 }
 0x890   :  { %1375 = vrot.lane.b32.xlu1 %v3505_v28, %s4582_s22  ;;  %1365 = vrot.lane.b32.xlu0 %v3505_v28, %s4577_s20  ;;  %v3507_v24 = vld [vmem:[#allocation3 + $0x2] ss:$0 sm:$0xff]  ;;  %v3511_v29 = vld [vmem:[#allocation3 + $0x1] ss:$0 sm:$0xff]  ;;  %v3513_v30 = vld [vmem:[#allocation3 + $0x3] ss:$0 sm:$0xff] }
 0x894   :  { %1397 = vrot.lane.b32.xlu1 %v3507_v24, %s4577_s20  ;;  %1385 = vrot.lane.b32.xlu0 %v3505_v28, %s4581_s21 }
 0x898   :  { %1417 = vrot.lane.b32.xlu1 %v3507_v24, %s4581_s21  ;;  %1407 = vrot.lane.b32.xlu0 %v3507_v24, %s4582_s22 }
 0x89c   :  { %1439 = vrot.lane.b32.xlu1 %v3511_v29, %s4582_s22  ;;  %1429 = vrot.lane.b32.xlu0 %v3511_v29, %s4577_s20 }
 0x8a0   :  { %1461 = vrot.lane.b32.xlu1 %v3513_v30, %s4577_s20  ;;  %1449 = vrot.lane.b32.xlu0 %v3511_v29, %s4581_s21 }
 0x8a4   :  { %1481 = vrot.lane.b32.xlu1 %v3513_v30, %s4581_s21  ;;  %1471 = vrot.lane.b32.xlu0 %v3513_v30, %s4582_s22 }
 0x902   :  { %v1376_v23 = vpop.permute.xlu1 %1375  ;;  %v1366_v27 = vpop.permute.xlu0 %1365 }
 0x903   :  { %1378 = vst.msk [vmem:[#allocation4 + $0x2] sm:$0x1] %vm768_vm13, %v1376_v23  ;;  %1368 = vst.msk [vmem:[#allocation4 + $0x1] sm:$0x1] %vm768_vm13, %v1366_v27 }
 0x906   :  { %v1398_v31 = vpop.permute.xlu1 %1397  ;;  %v1386_v32 = vpop.permute.xlu0 %1385 }
 0x907   :  { %1400 = vst.msk [vmem:[#allocation4 + $0x5] sm:$0x1] %vm768_vm13, %v1398_v31  ;;  %1388 = vst.msk [vmem:[#allocation4 + $0x3] sm:$0x1] %vm768_vm13, %v1386_v32  ;;  %v1620_v32 = vld [vmem:[%s5408_s7 + $0x10] sm:$0xff] }
 0x90a   :  { %v1418_v33 = vpop.permute.xlu1 %1417  ;;  %v1408_v26 = vpop.permute.xlu0 %1407 }
 0x90b   :  { %1420 = vst.msk [vmem:[#allocation4 + $0x7] sm:$0x1] %vm768_vm13, %v1418_v33  ;;  %1410 = vst.msk [vmem:[#allocation4 + $0x6] sm:$0x1] %vm768_vm13, %v1408_v26  ;;  %v1621_v33 = vld [vmem:[%s5408_s7 + $0x18] sm:$0xff] }
 0x90e   :  { %v1440_v34 = vpop.permute.xlu1 %1439  ;;  %v1430_v35 = vpop.permute.xlu0 %1429 }
 0x90f   :  { %1442 = vst.msk [vmem:[#allocation4 + $0xa] sm:$0x1] %vm768_vm13, %v1440_v34  ;;  %1432 = vst.msk [vmem:[#allocation4 + $0x9] sm:$0x1] %vm768_vm13, %v1430_v35  ;;  %v4147_v35 = vpack.c.bf16 %v1621_v33, %v1620_v32  ;;  %v3520_v32 = vld [vmem:[%s5405_s4 + $0x80] sm:$0xff]  ;;  %v3521_v33 = vld [vmem:[%s5405_s4 + $0x88] sm:$0xff] }
 0x912   :  { %v1462_v13 = vpop.permute.xlu1 %1461  ;;  %v1450_v36 = vpop.permute.xlu0 %1449  ;;  %v1485_v0 = vld [vmem:[#allocation4] sm:$0xff] }
 0x913   :  { %1464 = vst.msk [vmem:[#allocation4 + $0xd] sm:$0x1] %vm768_vm13, %v1462_v13  ;;  %1452 = vst.msk [vmem:[#allocation4 + $0xb] sm:$0x1] %vm768_vm13, %v1450_v36  ;;  %v4961_v38 = vadd.f32 %v4424_v37, %v1485_v0  ;;  %v1622_v13 = vld [vmem:[%s5408_s7 + $0x20] sm:$0xff]  ;;  %v1623_v36 = vld [vmem:[%s5408_s7 + $0x28] sm:$0xff] }
 0x914   :  { %v4151_v0 = vpack.c.bf16 %v1623_v36, %v1622_v13  ;;  %v1624_v37 = vld [vmem:[%s5408_s7 + $0x30] sm:$0xff]  ;;  %v3524_v13 = vld [vmem:[%s5405_s4 + $0xa0] sm:$0xff]  ;;  %v3525_v36 = vld [vmem:[%s5405_s4 + $0xa8] sm:$0xff] }
 0x915   :  { %v1489_v39 = vsel %vm156_vm0, %v4961_v38, 0.0 }
 0x916   :  { %v1482_v40 = vpop.permute.xlu1 %1481  ;;  %v1472_v41 = vpop.permute.xlu0 %1471  ;;  %1490 = vadd.xlane.f32.xlu0 %v1489_v39  ;;  %v1625_v39 = vld [vmem:[%s5408_s7 + $0x38] sm:$0xff] }
 0x917   :  { %1484 = vst.msk [vmem:[#allocation4 + $0xf] sm:$0x1] %vm768_vm13, %v1482_v40  ;;  %1474 = vst.msk [vmem:[#allocation4 + $0xe] sm:$0x1] %vm768_vm13, %v1472_v41  ;;  %v4155_v40 = vpack.c.bf16 %v1625_v39, %v1624_v37  ;;  %v1626_v41 = vld [vmem:[%s5408_s7 + $0x40] sm:$0xff]  ;;  %v4181_v37 = vpack.c.bf16 %v3525_v36, %v3524_v13  ;;  %v3526_v39 = vld [vmem:[%s5405_s4 + $0xb0] sm:$0xff] }
 0x91e   :  { %v1486_v42 = vld [vmem:[#allocation4 + $0x8] sm:$0xff] }
 0x91f   :  { %v4967_v44 = vadd.f32 %v4425_v43, %v1486_v42  ;;  %v1627_v42 = vld [vmem:[%s5408_s7 + $0x48] sm:$0xff] }
 0x920   :  { %v4159_v43 = vpack.c.bf16 %v1627_v42, %v1626_v41  ;;  %v1784_v41 = vld [vmem:[#allocation11 + $0x8] sm:$0xff] }
 0x921   :  { %v1492_v45 = vsel %vm156_vm0, %v4967_v44, 0.0 }
 0x922   :  { %1493 = vadd.xlane.f32.xlu1 %v1492_v45  ;;  %v1628_v45 = vld [vmem:[%s5408_s7 + $0x50] sm:$0xff] }
 0x933   :  { %1520 = vrot.lane.b32.xlu1 %v4783_v62, %s4581_s21 }
 0x9a3   :  { %v1491_v46 = vpop.xlane.xlu0 %1490 }
 0x9a4   :  { %v1495_v47 = vmul.f32 0.03125, %v1491_v46  ;;  %v1629_v46 = vld [vmem:[%s5408_s7 + $0x58] sm:$0xff] }
 0x9a6   :  { %v1497_v48 = vsub.f32 %v4961_v38, %v1495_v47  ;;  %v4163_v47 = vpack.c.bf16 %v1629_v46, %v1628_v45  ;;  %v3529_v45 = vld [vmem:[%s5405_s4 + $0xc8] sm:$0xff] }
 0x9a8   :  { %v1499_v49 = vmul.f32 %v1497_v48, %v1497_v48 }
 0x9aa   :  { %v1501_v50 = vsel %vm156_vm0, %v1499_v49, 0.0  ;;  %v1631_v49 = vld [vmem:[%s5408_s7 + $0x68] sm:$0xff] }
 0x9ab   :  { %1502 = vadd.xlane.f32.xlu0 %v1501_v50 }
 0x9af   :  { %v1494_v51 = vpop.xlane.xlu1 %1493 }
 0x9b0   :  { %v1496_v52 = vmul.f32 0.03125, %v1494_v51  ;;  %v1632_v51 = vld [vmem:[%s5408_s7 + $0x70] sm:$0xff] }
 0x9b2   :  { %v1498_v53 = vsub.f32 %v4967_v44, %v1496_v52  ;;  %v1633_v52 = vld [vmem:[%s5408_s7 + $0x78] sm:$0xff] }
 0x9b3   :  { %v1521_v29 = vpop.permute.xlu1 %1520 }
 0x9b4   :  { %v1500_v55 = vmul.f32 %v1498_v53, %v1498_v53 }
 0x9b6   :  { %v1504_v56 = vsel %vm156_vm0, %v1500_v55, 0.0  ;;  %v3516_v55 = vld [vmem:[#allocation10] ss:$0 sm:$0xff] }
 0x9b7   :  { %1505 = vadd.xlane.f32.xlu0 %v1504_v56 }
 0x9cd   :  { %1515 = vrot.lane.b32.xlu0 %v4783_v62, %s4582_s22  ;;  %v4139_v62 = vpack.c.bf16 %v1528_v6, %v1527_v4 }
 0x9cf   :  { %4140 = vmatprep.subr.bf16.mxu1 %v4139_v62 }
 0x9d0   :  { %4142 = vmatpush3.bf16.msra.mxu1 %v4139_v62  ;;  %v3519_v62 = vld [vmem:[#allocation8 + $0x2] ss:$0 sm:$0xff] }
 0x9d1   :  { %4144 = vmatprep.subr.bf16.mxu1 %v4143_v15 }
 0xa38   :  { %v1503_v16 = vpop.xlane.xlu0 %1502 }
 0xa39   :  { %v1507_v17 = vmul.f32 0.03125, %v1503_v16 }
 0xa3b   :  { %v1509_v18 = vadd.f32 1e-05, %v1507_v17 }
 0xa3d   :  { %4376 = vrsqrt.f32 %v1509_v18 }
 0xa44   :  { %v1506_v19 = vpop.xlane.xlu0 %1505 }
 0xa45   :  { %v1508_v20 = vmul.f32 0.03125, %v1506_v19 }
 0xa47   :  { %v4377_v25 = vpop.eup %4376  ;;  %v1510_v54 = vadd.f32 1e-05, %v1508_v20 }
 0xa48   :  { %v1513_v28 = vmul.f32 %v4377_v25, %v1497_v48  ;;  %v1516_v24 = vpop.permute.xlu0 %1515  ;;  %v1630_v48 = vld [vmem:[%s5408_s7 + $0x60] sm:$0xff] }
 0xa49   :  { %4378 = vrsqrt.f32 %v1510_v54  ;;  %v4167_v50 = vpack.c.bf16 %v1631_v49, %v1630_v48 }
 0xa4a   :  { %v1518_v30 = vmul.f32 %v1516_v24, %v1513_v28 }
 0xa4c   :  { %v1523_v23 = vadd.f32 %v1521_v29, %v1518_v30 }
 0xa4e   :  { %3855 = vmatprep.mubr.msk.f32.mxu1 %vm156_vm0, %v1523_v23 }
 0xa53   :  { %v4379_v27 = vpop.eup %4378 }
 0xa54   :  { %v1514_v31 = vmul.f32 %v4379_v27, %v1498_v53  ;;  %v4171_v53 = vpack.c.bf16 %v1633_v52, %v1632_v51 }
 0xa56   :  { %v1519_v26 = vmul.f32 %v1516_v24, %v1514_v31  ;;  %v3536_v31 = vld [vmem:[#allocation8 + $0x3] ss:$0 sm:$0xff] }
 0xa58   :  { %v1524_v34 = vadd.f32 %v1521_v29, %v1519_v26  ;;  %v3522_v26 = vld [vmem:[%s5405_s4 + $0x90] sm:$0xff] }
 0xa5a   :  { %3856 = vmatmul.mubr.msk.f32.vlgmr.msra.gmra.mrb[12].mxu1 %vm156_vm0, %v1524_v34  ;;  %v4176_v34 = vpack.c.bf16 %v3521_v33, %v3520_v32  ;;  %v5128_v32 = vld [vmem:[#allocation8 + $0x4] ss:$0 sm:$0xff] }
 0xa5b   :  { %4146 = vmatpush3.bf16.msra.mxu1 %v4143_v15 }
 0xa5c   :  { %4148 = vmatprep.subr.bf16.mxu1 %v4147_v35 }
 0xa5f   :  { %4150 = vmatpush3.bf16.msra.mxu1 %v4147_v35  ;;  %v3523_v35 = vld [vmem:[%s5405_s4 + $0x98] sm:$0xff] }
 0xa60   :  { %4152 = vmatprep.subr.bf16.mxu1 %v4151_v0 }
 0xa63   :  { %4154 = vmatpush3.bf16.msra.mxu1 %v4151_v0  ;;  %v4179_v0 = vpack.c.bf16 %v3523_v35, %v3522_v26 }
 0xa64   :  { %4156 = vmatprep.subr.bf16.mxu1 %v4155_v40 }
 0xa67   :  { %4158 = vmatpush3.bf16.msra.mxu1 %v4155_v40  ;;  %v3527_v40 = vld [vmem:[%s5405_s4 + $0xb8] sm:$0xff] }
 0xa68   :  { %4160 = vmatprep.subr.bf16.mxu1 %v4159_v43  ;;  %v4185_v42 = vpack.c.bf16 %v3527_v40, %v3526_v39 }
 0xa6b   :  { %4162 = vmatpush3.bf16.msra.mxu1 %v4159_v43  ;;  %v3528_v43 = vld [vmem:[%s5405_s4 + $0xc0] sm:$0xff] }
 0xa6c   :  { %4164 = vmatprep.subr.bf16.mxu1 %v4163_v47  ;;  %v4189_v46 = vpack.c.bf16 %v3529_v45, %v3528_v43 }
 0xa6f   :  { %4166 = vmatpush3.bf16.msra.mxu1 %v4163_v47 }
 0xa70   :  { %4168 = vmatprep.subr.bf16.mxu1 %v4167_v50 }
 0xa73   :  { %4170 = vmatpush3.bf16.msra.mxu1 %v4167_v50 }
 0xa74   :  { %4172 = vmatprep.subr.bf16.mxu1 %v4171_v53 }
 0xa77   :  { %4174 = vmatpush3.bf16.msra.mxu1 %v4171_v53 }
 0xa78   :  { %4175 = vmatprep.subr.bf16.mxu1 %v4578_v21 }
 0xb2d   :  { %v3857_v56 = vpop.f32.mrb[12].mxu1 }
 0xb2e   :  { %v1613_v58 = vadd.f32 %v3857_v56, %v3516_v55  ;;  %v1607_v60 = vpop.f32.mrb[13].mxu1 }
 0xb2f   :  { %v1608_v63 = vadd.f32 %v3516_v55, %v1607_v60 }
 0xb30   :  { %v1617_v6 = vmax.f32 %v1613_v58, 0.0 }
 0xb31   :  { %v1616_v4 = vmax.f32 %v1608_v63, 0.0 }
 0xb33   :  { %3890 = vmatprep.mubr.f32.mxu1 %v1616_v4 }
 0xb34   :  { %3891 = vmatmul.mubr.f32.vlgmr.msra.gmra.mrb[14].mxu1 %v1617_v6  ;;  %v3530_v6 = vld [vmem:[%s5405_s4 + $0xd0] sm:$0xff] }
 0xb35   :  { %3901 = vmatprep.mubr.msk.f32.mxu1 %vm4579_vm1, %v4580_v22  ;;  %4177 = vmatpush3.bf16.msra.mxu1 %v4176_v34 }
 0xb36   :  { %4178 = vmatprep.subr.bf16.mxu1 %v4578_v21 }
 0xb39   :  { %4180 = vmatpush3.bf16.msra.mxu1 %v4179_v0 }
 0xb3a   :  { %4182 = vmatprep.subr.bf16.mxu1 %v4181_v37 }
 0xb3c   :  { %3902 = vmatmul.mubr.msk.f32.vlgmr.msra.gmra.mrb[16].mxu1 %vm156_vm0, %v1784_v41 }
 0xb3d   :  { %4184 = vmatpush3.bf16.msra.mxu1 %v4181_v37 }
 0xb3e   :  { %4186 = vmatprep.subr.bf16.mxu1 %v4185_v42 }
 0xb41   :  { %4188 = vmatpush3.bf16.msra.mxu1 %v4185_v42 }
 0xb42   :  { %4190 = vmatprep.subr.bf16.mxu1 %v4189_v46 }
 0xc07   :  { %v3892_v9 = vpop.f32.mrb[14].mxu1 }
 0xc08   :  { %v1712_v10 = vadd.f32 %v3892_v9, %v3519_v62  ;;  %v1706_v15 = vpop.f32.mrb[15].mxu1 }
 0xc09   :  { %v1707_v16 = vadd.f32 %v3519_v62, %v1706_v15  ;;  %v3531_v62 = vld [vmem:[%s5405_s4 + $0xd8] sm:$0xff] }
 0xc0a   :  { %v5045_v17 = vadd.f32 %v1712_v10, %v4967_v44  ;;  %v4193_v15 = vpack.c.bf16 %v3531_v62, %v3530_v6 }
 0xc0b   :  { %v5048_v18 = vadd.f32 %v1707_v16, %v4961_v38 }
 0xc0c   :  { %v1747_v19 = vsel %vm156_vm0, %v5045_v17, 0.0 }
 0xc0d   :  { %1748 = vadd.xlane.f32.xlu0 %v1747_v19  ;;  %v1744_v20 = vsel %vm156_vm0, %v5048_v18, 0.0 }
 0xc0e   :  { %1745 = vadd.xlane.f32.xlu1 %v1744_v20 }
 0xc0f   :  { %v1857_v20 = vpop.f32.mrb[16].mxu1 }
 0xc9a   :  { %v1749_v25 = vpop.xlane.xlu0 %1748 }
 0xc9b   :  { %v1751_v54 = vmul.f32 0.03125, %v1749_v25  ;;  %v1746_v28 = vpop.xlane.xlu1 %1745  ;;  %v3903_v25 = vpop.f32.mrb[17].mxu1 }
 0xc9c   :  { %v1750_v24 = vmul.f32 0.03125, %v1746_v28 }
 0xc9d   :  { %v1753_v29 = vsub.f32 %v5045_v17, %v1751_v54 }
 0xc9e   :  { %v1752_v44 = vsub.f32 %v5048_v18, %v1750_v24 }
 0xc9f   :  { %v1755_v30 = vmul.f32 %v1753_v29, %v1753_v29 }
 0xca0   :  { %v1754_v23 = vmul.f32 %v1752_v44, %v1752_v44 }
 0xca1   :  { %v1759_v38 = vsel %vm156_vm0, %v1755_v30, 0.0  ;;  %v3532_v30 = vld [vmem:[%s5405_s4 + $0xe0] sm:$0xff] }
 0xca2   :  { %1760 = vadd.xlane.f32.xlu1 %v1759_v38  ;;  %v1756_v27 = vsel %vm156_vm0, %v1754_v23, 0.0  ;;  %v3533_v23 = vld [vmem:[%s5405_s4 + $0xe8] sm:$0xff] }
 0xca3   :  { %1757 = vadd.xlane.f32.xlu0 %v1756_v27  ;;  %v3534_v27 = vld [vmem:[%s5405_s4 + $0xf0] sm:$0xff] }
 0xcb3   :  { %1865 = vrot.lane.b32.xlu1 %v3536_v31, %s4581_s21 }
 0xcb7   :  { %1785 = vrot.lane.b32.xlu1 %v3536_v31, %s4582_s22 }
 0xcb9   :  { %1778 = vrot.lane.b32.xlu0 %v3536_v31, %s4577_s20 }
 0xd2f   :  { %v1761_v47 = vpop.xlane.xlu1 %1760 }
 0xd30   :  { %v1763_v48 = vmul.f32 0.03125, %v1761_v47  ;;  %v1758_v49 = vpop.xlane.xlu0 %1757 }
 0xd31   :  { %v1762_v50 = vmul.f32 0.03125, %v1758_v49 }
 0xd32   :  { %v1765_v51 = vadd.f32 1e-05, %v1763_v48 }
 0xd33   :  { %v1764_v52 = vadd.f32 1e-05, %v1762_v50  ;;  %v1866_v16 = vpop.permute.xlu1 %1865 }
 0xd34   :  { %4380 = vrsqrt.f32 %v1765_v51  ;;  %v1779_v60 = vpop.permute.xlu0 %1778 }
 0xd35   :  { %4382 = vrsqrt.f32 %v1764_v52 }
 0xd37   :  { %v1786_v19 = vpop.permute.xlu1 %1785 }
 0xd38   :  { %v1858_v54 = vadd.f32 %v1857_v20, %v1786_v19 }
 0xd3a   :  { %v5104_v28 = vmul.f32 %v1858_v54, %v4776_v59  ;;  %v5116_v59 = vpack.c.bf16 %v3533_v23, %v3532_v30  ;;  %v5119_v38 = vmul.f32 %v1858_v54, %v4788_v1  ;;  %v5131_v33 = vmul.f32 %v1858_v54, %v4795_v7 }
 0xd3b   :  { %v5142_v13 = vmul.f32 %v1858_v54, %v4805_v11 }
 0xd3c   :  { %3928 = vmatprep.mubr.msk.f32.mxu0 %vm156_vm0, %v5104_v28 }
 0xd3e   :  { %v4381_v53 = vpop.eup %4380 }
 0xd3f   :  { %v4383_v55 = vpop.eup %4382  ;;  %v1769_v56 = vmul.f32 %v4381_v53, %v1753_v29 }
 0xd40   :  { %v1768_v58 = vmul.f32 %v4383_v55, %v1752_v44 }
 0xd41   :  { %v1777_v63 = vmul.f32 %v3536_v31, %v1769_v56 }
 0xd42   :  { %v1776_v4 = vmul.f32 %v3536_v31, %v1768_v58  ;;  %v3535_v31 = vld [vmem:[%s5405_s4 + $0xf8] sm:$0xff] }
 0xd43   :  { %v1782_v10 = vadd.f32 %v1779_v60, %v1777_v63  ;;  %v5138_v34 = vpack.c.bf16 %v3535_v31, %v3534_v27 }
 0xd44   :  { %v1781_v9 = vadd.f32 %v1779_v60, %v1776_v4 }
 0xd46   :  { %3912 = vmatprep.mubr.msk.f32.mxu1 %vm156_vm0, %v1781_v9 }
 0xd47   :  { %3913 = vmatmul.mubr.msk.f32.vlgmr.msra.gmra.mrb[18].mxu1 %vm156_vm0, %v1782_v10 }
 0xd48   :  { %4192 = vmatpush3.bf16.msra.mxu1 %v4189_v46  ;;  %3923 = vmatprep.mubr.msk.f32.mxu1 %vm156_vm0, %v1781_v9 }
 0xd49   :  { %4194 = vmatprep.subr.bf16.mxu1 %v4193_v15 }
 0xd4c   :  { %4196 = vmatpush3.bf16.msra.mxu1 %v4193_v15 }
 0xd4f   :  { %3924 = vmatmul.mubr.msk.f32.vlgmr.msra.gmra.mrb[20].mxu1 %vm156_vm0, %v1782_v10 }
 0xe1a   :  { %v3914_v24 = vpop.f32.mrb[18].mxu1 }
 0xe1b   :  { %v1940_v29 = vpop.f32.mrb[19].mxu1  ;;  %v5145_v7 = vadd.f32 %v3914_v24, %v1866_v16 }
 0xe1c   :  { %v1941_v44 = vadd.f32 %v1940_v29, %v1866_v16 }
 0xe1e   :  { %3926 = vmatprep.subr.msk.mxu0 %vm156_vm0, %v1941_v44 }
 0xe1f   :  { %3927 = vmatpush3.xpose.msk.msra.mxu0 %vm156_vm0, %v1941_v44 }
 0xe20   :  { %4197 = vmatprep.subr.bf16.mxu0 %v4578_v21 }
 0xe22   :  { %v3925_v26 = vpop.f32.mrb[20].mxu1  ;;  %3929 = vmatmul.mubr.msk.f32.vlgmr.msra.gmra.mrb[16].mxu0 %vm156_vm0, %v5119_v38 }
 0xe23   :  { %v2021_v1 = vpop.f32.mrb[21].mxu1  ;;  %3931 = vmatprep.mubr.msk.f32.mxu0 %vm156_vm0, %v5131_v33  ;;  %4199 = vmatpush3.bf16.msra.mxu0 %v5116_v59  ;;  %v5148_v36 = vadd.f32 %v3925_v26, %v5128_v32 }
 0xe24   :  { %v2022_v35 = vadd.f32 %v5128_v32, %v2021_v1  ;;  %4200 = vmatprep.subr.bf16.mxu0 %v4578_v21 }
 0xe26   :  { %3934 = vmatprep.subr.mxu1 %v2022_v35  ;;  %3932 = vmatmul.mubr.msk.f32.gmra.mrb[18].mxu0 %vm156_vm0, %v5142_v13 }
 0xe27   :  { %3935 = vmatpush3.msra.mxu1 %v2022_v35  ;;  %4202 = vmatpush3.bf16.msra.mxu0 %v5138_v34 }
 0xe28   :  { %3961 = vmatprep.subr.mxu1 %v5148_v36  ;;  %3953 = vmatprep.subr.msk.mxu0 %vm156_vm0, %v5145_v7 }
 0xe29   :  { %3950 = vmatprep.mubr.msk.f32.mxu0 %vm4579_vm1, %v4580_v22 }
 0xef5   :  { %v3930_v11 = vpop.f32.mrb[16].mxu0 }
 0xef6   :  { %v2111_v0 = vpop.f32.mrb[17].mxu0  ;;  %v2133_v37 = vsel %vm543_vm12, %v3930_v11, -inf }
 0xef7   :  { %2134 = vmax.xlane.f32.xlu0 %v2133_v37  ;;  %v2130_v39 = vsel %vm543_vm12, %v2111_v0, -inf }
 0xef8   :  { %2131 = vmax.xlane.f32.xlu1 %v2130_v39 }
 0xef9   :  { %v3933_v40 = vpop.f32.mrb[18].mxu0 }
 0xefa   :  { %v2121_v41 = vpop.f32.mrb[19].mxu0  ;;  %v2139_v43 = vsel %vm543_vm12, %v3933_v40, -inf }
 0xefb   :  { %v2136_v42 = vsel %vm543_vm12, %v2121_v41, -inf }
 0xefc   :  { %2137 = vmax.xlane.f32.xlu0 %v2136_v42 }
 0xf00   :  { %2140 = vmax.xlane.f32.xlu0 %v2139_v43 }
 0xf84   :  { %v2135_v45 = vpop.xlane.xlu0 %2134 }
 0xf85   :  { %v2143_v46 = vsub.f32 %v3930_v11, %v2135_v45  ;;  %v2132_v47 = vpop.xlane.xlu1 %2131 }
 0xf86   :  { %v2142_v48 = vsub.f32 %v2111_v0, %v2132_v47 }
 0xf87   :  { %v2148_v49 = vmul.f32 1.442695, %v2143_v46 }
 0xf88   :  { %v2146_v50 = vmul.f32 1.442695, %v2142_v48 }
 0xf89   :  { %4384 = vpow2.f32 %v2148_v49  ;;  %v2138_v51 = vpop.xlane.xlu0 %2137 }
 0xf8a   :  { %4386 = vpow2.f32 %v2146_v50  ;;  %v2144_v52 = vsub.f32 %v2121_v41, %v2138_v51 }
 0xf8c   :  { %v2150_v53 = vmul.f32 1.442695, %v2144_v52 }
 0xf8d   :  { %v2141_v55 = vpop.xlane.xlu0 %2140 }
 0xf8e   :  { %4388 = vpow2.f32 %v2150_v53  ;;  %v2145_v56 = vsub.f32 %v3933_v40, %v2141_v55 }
 0xf90   :  { %v2152_v58 = vmul.f32 1.442695, %v2145_v56 }
 0xf92   :  { %4390 = vpow2.f32 %v2152_v58 }
 0xf93   :  { %v4385_v60 = vpop.eup %4384 }
 0xf94   :  { %v4387_v63 = vpop.eup %4386  ;;  %v2157_v4 = vsel %vm543_vm12, %v4385_v60, 0.0 }
 0xf95   :  { %2158 = vadd.xlane.f32.xlu0 %v2157_v4  ;;  %v2154_v6 = vsel %vm543_vm12, %v4387_v63, 0.0 }
 0xf96   :  { %2155 = vadd.xlane.f32.xlu1 %v2154_v6 }
 0xf98   :  { %v4389_v62 = vpop.eup %4388 }
 0xf99   :  { %v2160_v9 = vsel %vm543_vm12, %v4389_v62, 0.0 }
 0xf9a   :  { %2161 = vadd.xlane.f32.xlu1 %v2160_v9 }
 0xf9c   :  { %v4391_v10 = vpop.eup %4390 }
 0xf9d   :  { %v2163_v15 = vsel %vm543_vm12, %v4391_v10, 0.0 }
 0xf9e   :  { %2164 = vadd.xlane.f32.xlu0 %v2163_v15 }
0x1022   :  { %v2159_v16 = vpop.xlane.xlu0 %2158 }
0x1023   :  { %4392 = vrcp.f32 %v2159_v16  ;;  %v2156_v19 = vpop.xlane.xlu1 %2155 }
0x1024   :  { %4394 = vrcp.f32 %v2156_v19 }
0x1027   :  { %v2162_v20 = vpop.xlane.xlu1 %2161 }
0x1028   :  { %4396 = vrcp.f32 %v2162_v20 }
0x102b   :  { %v2165_v25 = vpop.xlane.xlu0 %2164 }
0x102c   :  { %4398 = vrcp.f32 %v2165_v25 }
0x102d   :  { %v4393_v54 = vpop.eup %4392 }
0x102e   :  { %v4395_v24 = vpop.eup %4394  ;;  %v2169_v44 = vmul.f32 %v4393_v54, %v4385_v60 }
0x102f   :  { %v2167_v29 = vmul.f32 %v4395_v24, %v4387_v63 }
0x1031   :  { %3936 = vmatprep.mubr.msk.f32.mxu1 %vm543_vm12, %v2167_v29 }
0x1032   :  { %v4397_v30 = vpop.eup %4396  ;;  %3937 = vmatmul.mubr.msk.f32.vlgmr.msra.gmra.mrb[22].mxu1 %vm543_vm12, %v2169_v44 }
0x1033   :  { %3962 = vmatpush3.msra.mxu1 %v5148_v36  ;;  %v2171_v23 = vmul.f32 %v4397_v30, %v4389_v62 }
0x1035   :  { %3939 = vmatprep.mubr.msk.f32.mxu1 %vm543_vm12, %v2171_v23 }
0x1036   :  { %v4399_v27 = vpop.eup %4398 }
0x1037   :  { %v2173_v31 = vmul.f32 %v4399_v27, %v4391_v10 }
0x1039   :  { %3940 = vmatmul.mubr.msk.f32.gmra.mrb[24].mxu1 %vm543_vm12, %v2173_v31 }
0x1105   :  { %v3938_v26 = vpop.f32.mrb[22].mxu1 }
0x1106   :  { %v2272_v1 = vmul.f32 %v3938_v26, %v4781_v61  ;;  %v2252_v35 = vpop.f32.mrb[23].mxu1 }
0x1107   :  { %v2271_v11 = vmul.f32 %v4773_v57, %v2252_v35 }
0x1109   :  { %v2275_v0 = vadd.f32 %v2272_v1, %v2271_v11 }
0x110c   :  { %v3941_v37 = vpop.f32.mrb[24].mxu1 }
0x110d   :  { %v2274_v39 = vmul.f32 %v3941_v37, %v4798_v8  ;;  %v2262_v40 = vpop.f32.mrb[25].mxu1 }
0x110e   :  { %v2273_v36 = vmul.f32 %v4791_v2, %v2262_v40 }
0x1110   :  { %v2276_v41 = vadd.f32 %v2274_v39, %v2273_v36 }
0x1112   :  { %v2277_v42 = vadd.f32 %v2276_v41, %v2275_v0 }
0x1114   :  { %3951 = vmatmul.mubr.msk.f32.vlgmr.msra.gmra.mrb[20].mxu0 %vm156_vm0, %v2277_v42 }
0x1115   :  { %3954 = vmatpush3.xpose.msk.msra.mxu0 %vm156_vm0, %v5145_v7  ;;  %3955 = vmatprep.mubr.msk.f32.mxu0 %vm156_vm0, %v5104_v28 }
0x1116   :  { %4203 = vmatprep.subr.bf16.mxu0 %v4578_v21 }
0x1118   :  { %3956 = vmatmul.mubr.msk.f32.vlgmr.msra.gmra.mrb[22].mxu0 %vm156_vm0, %v5119_v38 }
0x1119   :  { %3958 = vmatprep.mubr.msk.f32.mxu0 %vm156_vm0, %v5131_v33  ;;  %4205 = vmatpush3.bf16.msra.mxu0 %v5116_v59 }
0x111a   :  { %4206 = vmatprep.subr.bf16.mxu0 %v4578_v21 }
0x111c   :  { %3959 = vmatmul.mubr.msk.f32.gmra.mrb[24].mxu0 %vm156_vm0, %v5142_v13 }
0x111d   :  { %4208 = vmatpush3.bf16.msra.mxu0 %v5138_v34  ;;  %3977 = vmatprep.mubr.msk.f32.mxu0 %vm4579_vm1, %v4580_v22 }
0x11e7   :  { %v2350_v28 = vpop.f32.mrb[20].mxu0 }
0x11e8   :  { %v3952_v7 = vpop.f32.mrb[21].mxu0 }
0x11eb   :  { %v3957_v43 = vpop.f32.mrb[22].mxu0 }
0x11ec   :  { %v2476_v45 = vpop.f32.mrb[23].mxu0  ;;  %v2498_v38 = vsel %vm543_vm12, %v3957_v43, -inf }
0x11ed   :  { %2499 = vmax.xlane.f32.xlu0 %v2498_v38  ;;  %v2495_v33 = vsel %vm543_vm12, %v2476_v45, -inf }
0x11ee   :  { %2496 = vmax.xlane.f32.xlu1 %v2495_v33 }
0x11ef   :  { %v3960_v59 = vpop.f32.mrb[24].mxu0 }
0x11f0   :  { %v2486_v21 = vpop.f32.mrb[25].mxu0  ;;  %v2504_v46 = vsel %vm543_vm12, %v3960_v59, -inf }
0x11f1   :  { %2505 = vmax.xlane.f32.xlu0 %v2504_v46  ;;  %v2501_v34 = vsel %vm543_vm12, %v2486_v21, -inf }
0x11f2   :  { %2502 = vmax.xlane.f32.xlu1 %v2501_v34 }
0x127a   :  { %v2500_v13 = vpop.xlane.xlu0 %2499 }
0x127b   :  { %v2508_v22 = vsub.f32 %v3957_v43, %v2500_v13  ;;  %v2497_v47 = vpop.xlane.xlu1 %2496 }
0x127c   :  { %v2507_v48 = vsub.f32 %v2476_v45, %v2497_v47 }
0x127d   :  { %v2513_v49 = vmul.f32 1.442695, %v2508_v22 }
0x127e   :  { %v2511_v50 = vmul.f32 1.442695, %v2507_v48  ;;  %v2506_v51 = vpop.xlane.xlu0 %2505 }
0x127f   :  { %4400 = vpow2.f32 %v2513_v49  ;;  %v2510_v52 = vsub.f32 %v3960_v59, %v2506_v51  ;;  %v2503_v53 = vpop.xlane.xlu1 %2502 }
0x1280   :  { %4402 = vpow2.f32 %v2511_v50  ;;  %v2509_v55 = vsub.f32 %v2486_v21, %v2503_v53  ;;  %v2774_v53 = vld [vmem:[#allocation13 + $0x218] sm:$0xff] }
0x1281   :  { %v2517_v56 = vmul.f32 1.442695, %v2510_v52  ;;  %v2772_v52 = vld [vmem:[#allocation13 + $0x208] sm:$0xff] }
0x1282   :  { %v2515_v58 = vmul.f32 1.442695, %v2509_v55  ;;  %v2771_v55 = vld [vmem:[#allocation13 + $0x200] sm:$0xff] }
0x1283   :  { %4404 = vpow2.f32 %v2517_v56  ;;  %v4209_v56 = vpack.c.bf16 %v2774_v53, %v2772_v52  ;;  %v2807_v53 = vld [vmem:[#allocation13 + $0x320] sm:$0xff] }
0x1284   :  { %4406 = vpow2.f32 %v2515_v58  ;;  %v2773_v58 = vld [vmem:[#allocation13 + $0x210] sm:$0xff] }
0x1285   :  { %4210 = vmatprep.subr.bf16.mxu1 %v4209_v56  ;;  %v2812_v56 = vld [vmem:[#allocation13 + $0x348] sm:$0xff] }
0x1289   :  { %v4401_v60 = vpop.eup %4400 }
0x128a   :  { %v4403_v63 = vpop.eup %4402  ;;  %v2522_v4 = vsel %vm543_vm12, %v4401_v60, 0.0 }
0x128b   :  { %2523 = vadd.xlane.f32.xlu0 %v2522_v4  ;;  %v2519_v6 = vsel %vm543_vm12, %v4403_v63, 0.0  ;;  %v2775_v4 = vld [vmem:[#allocation13 + $0x220] sm:$0xff] }
0x128c   :  { %2520 = vadd.xlane.f32.xlu1 %v2519_v6  ;;  %v2777_v6 = vld [vmem:[#allocation13 + $0x230] sm:$0xff] }
0x128d   :  { %v4405_v62 = vpop.eup %4404 }
0x128e   :  { %v4407_v9 = vpop.eup %4406  ;;  %v2528_v10 = vsel %vm543_vm12, %v4405_v62, 0.0 }
0x128f   :  { %2529 = vadd.xlane.f32.xlu0 %v2528_v10  ;;  %v2525_v15 = vsel %vm543_vm12, %v4407_v9, 0.0  ;;  %v2779_v10 = vld [vmem:[#allocation13 + $0x240] sm:$0xff] }
0x1290   :  { %2526 = vadd.xlane.f32.xlu1 %v2525_v15  ;;  %v2781_v15 = vld [vmem:[#allocation13 + $0x250] sm:$0xff] }
0x12a1   :  { %2278 = vrot.lane.b32.xlu1 %v5128_v32, %s4577_s20 }
0x1318   :  { %v2524_v16 = vpop.xlane.xlu0 %2523 }
0x1319   :  { %4408 = vrcp.f32 %v2524_v16  ;;  %v2521_v19 = vpop.xlane.xlu1 %2520  ;;  %v2784_v16 = vld [vmem:[#allocation13 + $0x268] sm:$0xff] }
0x131a   :  { %4410 = vrcp.f32 %v2521_v19  ;;  %v2786_v19 = vld [vmem:[#allocation13 + $0x278] sm:$0xff] }
0x131c   :  { %v2530_v20 = vpop.xlane.xlu0 %2529 }
0x131d   :  { %4412 = vrcp.f32 %v2530_v20  ;;  %v2527_v25 = vpop.xlane.xlu1 %2526  ;;  %v4219_v20 = vpack.c.bf16 %v2781_v15, %v2779_v10  ;;  %v2820_v15 = vld [vmem:[#allocation13 + $0x388] sm:$0xff] }
0x131e   :  { %4414 = vrcp.f32 %v2527_v25  ;;  %v4221_v25 = vpack.c.bf16 %v2786_v19, %v2784_v16  ;;  %v2822_v16 = vld [vmem:[#allocation13 + $0x398] sm:$0xff] }
0x131f   :  { %v4257_v19 = vpack.c.bf16 %v2822_v16, %v2820_v15 }
0x1321   :  { %v5202_v54 = vpop.permute.xlu1 %2278 }
0x1322   :  { %v2351_v24 = vadd.f32 %v2350_v28, %v5202_v54 }
0x1323   :  { %v4409_v29 = vpop.eup %4408 }
0x1324   :  { %v4411_v44 = vpop.eup %4410  ;;  %v2380_v30 = vcombine.high %v2351_v24, %v2351_v24  ;;  %2354 = vst.msk [vmem:[#allocation2] sm:$0x1] %vm768_vm13, %v2351_v24  ;;  %v2362_v23 = vrot.slane %v2351_v24, %v4888_v14  ;;  %v2534_v31 = vmul.f32 %v4409_v29, %v4401_v60  ;;  %v2778_v60 = vld [vmem:[#allocation13 + $0x238] sm:$0xff]  ;;  %v2783_v24 = vld [vmem:[#allocation13 + $0x260] sm:$0xff]  ;;  %v2785_v29 = vld [vmem:[#allocation13 + $0x270] sm:$0xff] }
0x1325   :  { %v2532_v27 = vmul.f32 %v4411_v44, %v4403_v63  ;;  %v4211_v63 = vpack.c.bf16 %v2773_v58, %v2771_v55  ;;  %v2788_v44 = vld [vmem:[#allocation13 + $0x288] sm:$0xff]  ;;  %v2809_v55 = vld [vmem:[#allocation13 + $0x330] sm:$0xff]  ;;  %v2814_v58 = vld [vmem:[#allocation13 + $0x358] sm:$0xff] }
0x1326   :  { %v2387_v26 = vrot.slane %v2380_v30, %v4888_v14  ;;  %v3553_v1 = vrot.slane %v2362_v23, 9  ;;  %v2369_v40 = vcombine.high %v2362_v23, %v2362_v23  ;;  %v2790_v30 = vld [vmem:[#allocation13 + $0x298] sm:$0xff]  ;;  %v4223_v23 = vpack.c.bf16 %v2785_v29, %v2783_v24  ;;  %v2821_v24 = vld [vmem:[#allocation13 + $0x390] sm:$0xff] }
0x1327   :  { %v4413_v35 = vpop.eup %4412  ;;  %3963 = vmatprep.mubr.msk.f32.mxu1 %vm543_vm12, %v2532_v27  ;;  %v4225_v27 = vpack.c.bf16 %v2790_v30, %v2788_v44 }
0x1328   :  { %v4415_v11 = vpop.eup %4414  ;;  %2389 = vst.msk [vmem:[#allocation2 + $0x2] sm:$0x1] %vm768_vm13, %v2387_v26  ;;  %3964 = vmatmul.mubr.msk.f32.vlgmr.msra.gmra.mrb[26].mxu1 %vm543_vm12, %v2534_v31  ;;  %2365 = vrot.lane.b32.xlu0 %v3553_v1, %s4581_s21  ;;  %v3555_v0 = vrot.slane %v2387_v26, 9  ;;  %v2538_v39 = vmul.f32 %v4413_v35, %v4405_v62  ;;  %v2396_v36 = vcombine.high %v2387_v26, %v2387_v26  ;;  %v3554_v41 = vrot.slane %v2369_v40, 9  ;;  %v2780_v62 = vld [vmem:[#allocation13 + $0x248] sm:$0xff]  ;;  %v2787_v31 = vld [vmem:[#allocation13 + $0x280] sm:$0xff] }
0x1329   :  { %v2536_v37 = vmul.f32 %v4415_v11, %v4407_v9  ;;  %4212 = vmatpush1.bf16.msra.mxu1 %v4211_v63  ;;  %v2789_v26 = vld [vmem:[#allocation13 + $0x290] sm:$0xff]  ;;  %v2792_v1 = vld [vmem:[#allocation13 + $0x2a8] sm:$0xff]  ;;  %v2794_v35 = vld [vmem:[#allocation13 + $0x2b8] sm:$0xff] }
0x132a   :  { %2392 = vrot.lane.b32.xlu1 %v3555_v0, %s4581_s21  ;;  %v3556_v42 = vrot.slane %v2396_v36, 9  ;;  %v4227_v11 = vpack.c.bf16 %v2789_v26, %v2787_v31  ;;  %v4229_v0 = vpack.c.bf16 %v2794_v35, %v2792_v1  ;;  %v2811_v63 = vld [vmem:[#allocation13 + $0x340] sm:$0xff] }
0x132b   :  { %3966 = vmatprep.mubr.msk.f32.mxu1 %vm543_vm12, %v2536_v37  ;;  %v2791_v37 = vld [vmem:[#allocation13 + $0x2a0] sm:$0xff] }
0x132c   :  { %3967 = vmatmul.mubr.msk.f32.gmra.mrb[28].mxu1 %vm543_vm12, %v2538_v39  ;;  %2370 = vrot.lane.b32.xlu0 %v2369_v40, %s4582_s22  ;;  %v2793_v39 = vld [vmem:[#allocation13 + $0x2b0] sm:$0xff]  ;;  %v2796_v40 = vld [vmem:[#allocation13 + $0x2c8] sm:$0xff]  ;;  %v2823_v35 = vld [vmem:[#allocation13 + $0x3a0] sm:$0xff] }
0x132e   :  { %2397 = vrot.lane.b32.xlu1 %v2396_v36, %s4582_s22  ;;  %v2798_v36 = vld [vmem:[#allocation13 + $0x2d8] sm:$0xff] }
0x1330   :  { %2376 = vrot.lane.b32.xlu0 %v3554_v41, %s4577_s20  ;;  %v4231_v41 = vpack.c.bf16 %v2793_v39, %v2791_v37 }
0x1332   :  { %2403 = vrot.lane.b32.xlu1 %v3556_v42, %s4577_s20  ;;  %v4233_v42 = vpack.c.bf16 %v2798_v36, %v2796_v40  ;;  %v2828_v40 = vld [vmem:[#allocation13 + $0x3c8] sm:$0xff]  ;;  %v2830_v36 = vld [vmem:[#allocation13 + $0x3d8] sm:$0xff] }
0x139a   :  { %v2366_v28 = vpop.permute.xlu0 %2365 }
0x139b   :  { %2368 = vst.msk [vmem:[#allocation2] sm:$0x1] %vm783_vm14, %v2366_v28  ;;  %v2795_v28 = vld [vmem:[#allocation13 + $0x2c0] sm:$0xff] }
0x139c   :  { %v2393_v7 = vpop.permute.xlu1 %2392 }
0x139d   :  { %2395 = vst.msk [vmem:[#allocation2 + $0x2] sm:$0x1] %vm783_vm14, %v2393_v7  ;;  %v2797_v7 = vld [vmem:[#allocation13 + $0x2d0] sm:$0xff] }
0x139e   :  { %v2371_v43 = vpop.permute.xlu0 %2370 }
0x139f   :  { %2373 = vst.msk [vmem:[#allocation2] sm:$0x1] %vm789_vm15, %v2371_v43  ;;  %v2800_v43 = vld [vmem:[#allocation13 + $0x2e8] sm:$0xff] }
0x13a0   :  { %v2398_v45 = vpop.permute.xlu1 %2397 }
0x13a1   :  { %2400 = vst.msk [vmem:[#allocation2 + $0x2] sm:$0x1] %vm789_vm15, %v2398_v45  ;;  %v2802_v45 = vld [vmem:[#allocation13 + $0x2f8] sm:$0xff] }
0x13a2   :  { %v2377_v38 = vpop.permute.xlu0 %2376 }
0x13a3   :  { %2379 = vst.msk [vmem:[#allocation2] sm:$0x1] %vm796_vm2, %v2377_v38  ;;  %v4235_v38 = vpack.c.bf16 %v2797_v7, %v2795_v28  ;;  %v2829_v28 = vld [vmem:[#allocation13 + $0x3d0] sm:$0xff]  ;;  %v2832_v7 = vld [vmem:[#allocation13 + $0x3e8] sm:$0xff] }
0x13a4   :  { %v2404_v33 = vpop.permute.xlu1 %2403 }
0x13a5   :  { %2406 = vst.msk [vmem:[#allocation2 + $0x2] sm:$0x1] %vm796_vm2, %v2404_v33  ;;  %v4237_v33 = vpack.c.bf16 %v2802_v45, %v2800_v43  ;;  %v2834_v43 = vld [vmem:[#allocation13 + $0x3f8] sm:$0xff] }
0x13fb   :  { %v3965_v59 = vpop.f32.mrb[26].mxu1 }
0x13fc   :  { %v2637_v21 = vmul.f32 %v3965_v59, %v4781_v61  ;;  %v2617_v46 = vpop.f32.mrb[27].mxu1  ;;  %v2776_v61 = vld [vmem:[#allocation13 + $0x228] sm:$0xff]  ;;  %v2799_v59 = vld [vmem:[#allocation13 + $0x2e0] sm:$0xff] }
0x13fd   :  { %v2636_v34 = vmul.f32 %v4773_v57, %v2617_v46  ;;  %v4213_v57 = vpack.c.bf16 %v2778_v60, %v2776_v61  ;;  %v2804_v46 = vld [vmem:[#allocation13 + $0x308] sm:$0xff]  ;;  %v4247_v61 = vpack.c.bf16 %v2809_v55, %v2807_v53  ;;  %v4249_v60 = vpack.c.bf16 %v2814_v58, %v2812_v56 }
0x13fe   :  { %v1723_v55 = vld [vmem:[#allocation10 + $0x4] sm:$0x3] }
0x13ff   :  { %v2640_v13 = vadd.f32 %v2637_v21, %v2636_v34  ;;  %v3968_v22 = vpop.f32.mrb[28].mxu1  ;;  %4214 = vmatprep.subr.bf16.mxu1 %v4213_v57  ;;  %v2801_v21 = vld [vmem:[#allocation13 + $0x2f0] sm:$0xff]  ;;  %v2806_v34 = vld [vmem:[#allocation13 + $0x318] sm:$0xff]  ;;  %v2839_v56 = vrot.slane %v1723_v55, %v1255_v3  ;;  %v2843_v58 = vrot.slane %v1723_v55, %v1259_v5 }
0x1400   :  { %v2639_v47 = vmul.f32 %v3968_v22, %v4798_v8  ;;  %v2627_v48 = vpop.f32.mrb[29].mxu1  ;;  %v2782_v8 = vld [vmem:[#allocation13 + $0x258] sm:$0xff]  ;;  %v4241_v22 = vpack.c.bf16 %v2806_v34, %v2804_v46  ;;  %v2813_v57 = vld [vmem:[#allocation13 + $0x350] sm:$0xff] }
0x1401   :  { %v2638_v49 = vmul.f32 %v4791_v2, %v2627_v48  ;;  %v4215_v2 = vpack.c.bf16 %v2777_v6, %v2775_v4  ;;  %v4217_v9 = vpack.c.bf16 %v2782_v8, %v2780_v62  ;;  %v2805_v48 = vld [vmem:[#allocation13 + $0x310] sm:$0xff]  ;;  %v4251_v4 = vpack.c.bf16 %v2813_v57, %v2811_v63  ;;  %v2816_v6 = vld [vmem:[#allocation13 + $0x368] sm:$0xff]  ;;  %v2818_v62 = vld [vmem:[#allocation13 + $0x378] sm:$0xff] }
0x1402   :  { %v4253_v8 = vpack.c.bf16 %v2818_v62, %v2816_v6 }
0x1403   :  { %v2641_v50 = vadd.f32 %v2639_v47, %v2638_v49  ;;  %4216 = vmatpush1.bf16.msra.mxu1 %v4215_v2  ;;  %v2803_v47 = vld [vmem:[#allocation13 + $0x300] sm:$0xff]  ;;  %v2808_v49 = vld [vmem:[#allocation13 + $0x328] sm:$0xff] }
0x1404   :  { %4218 = vmatprep.subr.bf16.mxu1 %v4217_v9  ;;  %v2815_v2 = vld [vmem:[#allocation13 + $0x360] sm:$0xff]  ;;  %v2817_v9 = vld [vmem:[#allocation13 + $0x370] sm:$0xff] }
0x1405   :  { %v2642_v51 = vadd.f32 %v2641_v50, %v2640_v13  ;;  %v4239_v13 = vpack.c.bf16 %v2801_v21, %v2799_v59  ;;  %v2810_v50 = vld [vmem:[#allocation13 + $0x338] sm:$0xff]  ;;  %v4255_v10 = vpack.c.bf16 %v2817_v9, %v2815_v2  ;;  %v2831_v59 = vld [vmem:[#allocation13 + $0x3e0] sm:$0xff]  ;;  %v2833_v21 = vld [vmem:[#allocation13 + $0x3f0] sm:$0xff] }
0x1406   :  { %v4245_v52 = vpack.c.bf16 %v2810_v50, %v2808_v49  ;;  %v4271_v46 = vpack.c.bf16 %v2833_v21, %v2831_v59  ;;  %v3593_v59 = vld [vmem:[%s5408_s7 + $0x88] sm:$0xff] }
0x1407   :  { %3978 = vmatmul.mubr.msk.f32.vlgmr.msra.gmra.mrb[26].mxu0 %vm156_vm0, %v2642_v51  ;;  %4220 = vmatpush1.bf16.msra.mxu1 %v4219_v20  ;;  %v4243_v51 = vpack.c.bf16 %v2805_v48, %v2803_v47 }
0x1408   :  { %4222 = vmatprep.subr.bf16.mxu1 %v4221_v25  ;;  %v2819_v25 = vld [vmem:[#allocation13 + $0x380] sm:$0xff] }
0x1409   :  { %v4259_v30 = vpack.c.bf16 %v2821_v24, %v2819_v25 }
0x140b   :  { %4224 = vmatpush1.bf16.msra.mxu1 %v4223_v23  ;;  %v2824_v23 = vld [vmem:[#allocation13 + $0x3a8] sm:$0xff] }
0x140c   :  { %4226 = vmatprep.subr.bf16.mxu1 %v4225_v27  ;;  %v2826_v27 = vld [vmem:[#allocation13 + $0x3b8] sm:$0xff] }
0x140d   :  { %v4261_v1 = vpack.c.bf16 %v2826_v27, %v2824_v23 }
0x140f   :  { %4228 = vmatpush1.bf16.msra.mxu1 %v4227_v11  ;;  %v2825_v11 = vld [vmem:[#allocation13 + $0x3b0] sm:$0xff] }
0x1410   :  { %4230 = vmatprep.subr.bf16.mxu1 %v4229_v0 }
0x1413   :  { %4232 = vmatpush1.bf16.msra.mxu1 %v4231_v41  ;;  %v2827_v41 = vld [vmem:[#allocation13 + $0x3c0] sm:$0xff] }
0x1414   :  { %4234 = vmatprep.subr.bf16.mxu1 %v4233_v42  ;;  %v4265_v42 = vpack.c.bf16 %v2830_v36, %v2828_v40  ;;  %v4267_v45 = vpack.c.bf16 %v2829_v28, %v2827_v41 }
0x1417   :  { %4236 = vmatpush1.bf16.msra.mxu1 %v4235_v38 }
0x1418   :  { %4238 = vmatprep.subr.bf16.mxu1 %v4237_v33  ;;  %v4269_v33 = vpack.c.bf16 %v2834_v43, %v2832_v7  ;;  %v3585_v7 = vld [vmem:[%s5407_s6 + $0x20] sm:$0xff]  ;;  %v3586_v43 = vld [vmem:[%s5407_s6 + $0x28] sm:$0xff] }
0x141b   :  { %4240 = vmatpush1.bf16.msra.mxu1 %v4239_v13 }
0x141c   :  { %4242 = vmatprep.subr.bf16.mxu1 %v4241_v22 }
0x141f   :  { %4244 = vmatpush1.bf16.msra.mxu1 %v4243_v51 }
0x1420   :  { %4246 = vmatprep.subr.bf16.mxu1 %v4245_v52 }
0x1423   :  { %4248 = vmatpush1.bf16.msra.mxu1 %v4247_v61 }
0x1424   :  { %4250 = vmatprep.subr.bf16.mxu1 %v4249_v60 }
0x1427   :  { %4252 = vmatpush1.bf16.msra.mxu1 %v4251_v4 }
0x1428   :  { %4254 = vmatprep.subr.bf16.mxu1 %v4253_v8 }
0x142b   :  { %4256 = vmatpush1.bf16.msra.mxu1 %v4255_v10 }
0x142c   :  { %4258 = vmatprep.subr.bf16.mxu1 %v4257_v19 }
0x142f   :  { %4260 = vmatpush1.bf16.msra.mxu1 %v4259_v30 }
0x1430   :  { %4262 = vmatprep.subr.bf16.mxu1 %v4261_v1 }
0x14da   :  { %v2712_v20 = vpop.f32.mrb[26].mxu0 }
0x14db   :  { %v2713_v29 = vadd.f32 %v2712_v20, %v5202_v54  ;;  %v3979_v44 = vpop.f32.mrb[27].mxu0  ;;  %v4263_v54 = vpack.c.bf16 %v2825_v11, %v2823_v35 }
0x14dd   :  { %v2724_v31 = vrot.slane %v2713_v29, %v4888_v14  ;;  %v2742_v26 = vcombine.high %v2713_v29, %v2713_v29  ;;  %2716 = vst.msk [vmem:[#allocation2 + $0x1] sm:$0x1] %vm768_vm13, %v2713_v29  ;;  %4264 = vmatpush1.bf16.msra.mxu1 %v4263_v54 }
0x14de   :  { %4266 = vmatprep.subr.bf16.mxu1 %v4265_v42 }
0x14df   :  { %v2749_v0 = vrot.slane %v2742_v26, %v4888_v14  ;;  %v3567_v37 = vrot.slane %v2724_v31, 9  ;;  %v2731_v39 = vcombine.high %v2724_v31, %v2724_v31 }
0x14e1   :  { %2751 = vst.msk [vmem:[#allocation2 + $0x3] sm:$0x1] %vm768_vm13, %v2749_v0  ;;  %2727 = vrot.lane.b32.xlu1 %v3567_v37, %s4581_s21  ;;  %2732 = vrot.lane.b32.xlu0 %v2731_v39, %s4582_s22  ;;  %v3569_v14 = vrot.slane %v2749_v0, 9  ;;  %v3568_v38 = vrot.slane %v2731_v39, 9  ;;  %v2758_v34 = vcombine.high %v2749_v0, %v2749_v0 }
0x14e2   :  { %4268 = vmatpush1.bf16.msra.mxu1 %v4267_v45  ;;  %v4273_v45 = vpack.c.bf16 %v3586_v43, %v3585_v7 }
0x14e3   :  { %4270 = vmatprep.subr.bf16.mxu1 %v4269_v33  ;;  %v3570_v13 = vrot.slane %v2758_v34, 9  ;;  %v3592_v33 = vld [vmem:[%s5408_s7 + $0x80] sm:$0xff] }
0x14e4   :  { %4274 = vmatprep.subr.bf16.mxu0 %v4273_v45  ;;  %v4281_v21 = vpack.c.bf16 %v3593_v59, %v3592_v33 }
0x14e5   :  { %2754 = vrot.lane.b32.xlu1 %v3569_v14, %s4581_s21  ;;  %2738 = vrot.lane.b32.xlu0 %v3568_v38, %s4577_s20  ;;  %v3587_v14 = vld [vmem:[%s5407_s6 + $0x30] sm:$0xff]  ;;  %v3588_v38 = vld [vmem:[%s5407_s6 + $0x38] sm:$0xff] }
0x14e6   :  { %4272 = vmatpush1.bf16.msra.mxu1 %v4271_v46  ;;  %4276 = vmatpush3.bf16.msra.mxu0 %v4273_v45 }
0x14e9   :  { %2759 = vrot.lane.b32.xlu1 %v2758_v34, %s4582_s22 }
0x14ed   :  { %2765 = vrot.lane.b32.xlu1 %v3570_v13, %s4577_s20 }
0x1553   :  { %v2728_v22 = vpop.permute.xlu1 %2727  ;;  %v2733_v47 = vpop.permute.xlu0 %2732 }
0x1554   :  { %2730 = vst.msk [vmem:[#allocation2 + $0x1] sm:$0x1] %vm783_vm14, %v2728_v22 }
0x1555   :  { %2735 = vst.msk [vmem:[#allocation2 + $0x1] sm:$0x1] %vm789_vm15, %v2733_v47 }
0x1557   :  { %v2755_v48 = vpop.permute.xlu1 %2754  ;;  %v2739_v49 = vpop.permute.xlu0 %2738 }
0x1558   :  { %2757 = vst.msk [vmem:[#allocation2 + $0x3] sm:$0x1] %vm783_vm14, %v2755_v48 }
0x1559   :  { %2741 = vst.msk [vmem:[#allocation2 + $0x1] sm:$0x1] %vm796_vm2, %v2739_v49 }
0x155b   :  { %v2760_v50 = vpop.permute.xlu1 %2759 }
0x155c   :  { %2762 = vst.msk [vmem:[#allocation2 + $0x3] sm:$0x1] %vm789_vm15, %v2760_v50 }
0x155f   :  { %v2766_v51 = vpop.permute.xlu1 %2765 }
0x1560   :  { %2768 = vst.msk [vmem:[#allocation2 + $0x3] sm:$0x1] %vm796_vm2, %v2766_v51 }
0x1567   :  { %v3571_v52 = vld.sshfl [vmem:[#allocation2] sm:$0x33 pattern:$0x76325410] }
0x1568   :  { %v2854_v53 = vcombine.high %v3571_v52, %v3571_v52 }
0x156a   :  { %2921 = vmatprep.mubr.f32.mxu1 %v2854_v53 }
0x156b   :  { %2922 = vmatmul.mubr.f32.vlgmr.msra.gmra.mrb[30].mxu1 %v3571_v52 }
0x163e   :  { %v2923_v61 = vpop.f32.mrb[30].mxu1 }
0x163f   :  { %v2924_v60 = vadd.f32 %v2923_v61, %v2839_v56  ;;  %v2925_v63 = vpop.f32.mrb[31].mxu1  ;;  %v3594_v61 = vld [vmem:[%s5408_s7 + $0x90] sm:$0xff] }
0x1640   :  { %v2926_v57 = vadd.f32 %v2925_v63, %v2843_v58 }
0x1642   :  { %v2930_v4 = vcombine.low %v2924_v60, %v2926_v57  ;;  %v3595_v60 = vld [vmem:[%s5408_s7 + $0x98] sm:$0xff] }
0x1644   :  { %3572 = vst.sshfl [vmem:[#allocation3] sm:$0x33 pattern:$0x76325410] %v2930_v4  ;;  %v4285_v4 = vpack.c.bf16 %v3595_v60, %v3594_v61 }
0x164b   :  { %v3574_v6 = vld [vmem:[#allocation3] ss:$0 sm:$0xff]  ;;  %v2972_v8 = vld [vmem:[#allocation3 + $0x2] sm:$0x1]  ;;  %v3004_v3 = vld [vmem:[#allocation3 + $0x1] sm:$0x1] }
0x164c   :  { %2958 = vrot.lane.b32.xlu1 %v3574_v6, %s4582_s22  ;;  %2948 = vrot.lane.b32.xlu0 %v3574_v6, %s4577_s20  ;;  %v2940_v62 = vld [vmem:[#allocation3] sm:$0x1]  ;;  %2973 = vst.msk [vmem:[#allocation4 + $0x4] sm:$0x1] %vm768_vm13, %v2972_v8  ;;  %v3036_v12 = vld [vmem:[#allocation3 + $0x3] sm:$0x1] }
0x164d   :  { %2941 = vst.msk [vmem:[#allocation4] sm:$0x1] %vm768_vm13, %v2940_v62  ;;  %3005 = vst.msk [vmem:[#allocation4 + $0x8] sm:$0x1] %vm768_vm13, %v3004_v3  ;;  %v3576_v5 = vld [vmem:[#allocation3 + $0x2] ss:$0 sm:$0xff] }
0x164e   :  { %3037 = vst.msk [vmem:[#allocation4 + $0xc] sm:$0x1] %vm768_vm13, %v3036_v12  ;;  %v3580_v2 = vld [vmem:[#allocation3 + $0x1] ss:$0 sm:$0xff]  ;;  %v3582_v9 = vld [vmem:[#allocation3 + $0x3] ss:$0 sm:$0xff] }
0x164f   :  { %v3597_v62 = vld [vmem:[%s5408_s7 + $0xa8] sm:$0xff]  ;;  %v3598_v3 = vld [vmem:[%s5408_s7 + $0xb0] sm:$0xff]  ;;  %v3599_v12 = vld [vmem:[%s5408_s7 + $0xb8] sm:$0xff] }
0x1650   :  { %2980 = vrot.lane.b32.xlu1 %v3576_v5, %s4577_s20  ;;  %2968 = vrot.lane.b32.xlu0 %v3574_v6, %s4581_s21  ;;  %v3596_v6 = vld [vmem:[%s5408_s7 + $0xa0] sm:$0xff] }
0x1651   :  { %v4289_v8 = vpack.c.bf16 %v3597_v62, %v3596_v6 }
0x1654   :  { %3000 = vrot.lane.b32.xlu1 %v3576_v5, %s4581_s21  ;;  %2990 = vrot.lane.b32.xlu0 %v3576_v5, %s4582_s22  ;;  %v4293_v5 = vpack.c.bf16 %v3599_v12, %v3598_v3 }
0x1658   :  { %3022 = vrot.lane.b32.xlu1 %v3580_v2, %s4582_s22  ;;  %3012 = vrot.lane.b32.xlu0 %v3580_v2, %s4577_s20 }
0x165c   :  { %3044 = vrot.lane.b32.xlu1 %v3582_v9, %s4577_s20  ;;  %3032 = vrot.lane.b32.xlu0 %v3580_v2, %s4581_s21  ;;  %v3600_v2 = vld [vmem:[%s5408_s7 + $0xc0] sm:$0xff] }
0x1660   :  { %3064 = vrot.lane.b32.xlu1 %v3582_v9, %s4581_s21  ;;  %3054 = vrot.lane.b32.xlu0 %v3582_v9, %s4582_s22  ;;  %v3601_v9 = vld [vmem:[%s5408_s7 + $0xc8] sm:$0xff] }
0x16be   :  { %v2959_v10 = vpop.permute.xlu1 %2958  ;;  %v2949_v15 = vpop.permute.xlu0 %2948 }
0x16bf   :  { %2961 = vst.msk [vmem:[#allocation4 + $0x2] sm:$0x1] %vm768_vm13, %v2959_v10  ;;  %2951 = vst.msk [vmem:[#allocation4 + $0x1] sm:$0x1] %vm768_vm13, %v2949_v15  ;;  %v4297_v10 = vpack.c.bf16 %v3601_v9, %v3600_v2  ;;  %v3602_v15 = vld [vmem:[%s5408_s7 + $0xd0] sm:$0xff] }
0x16c2   :  { %v2981_v16 = vpop.permute.xlu1 %2980  ;;  %v2969_v19 = vpop.permute.xlu0 %2968 }
0x16c3   :  { %2983 = vst.msk [vmem:[#allocation4 + $0x5] sm:$0x1] %vm768_vm13, %v2981_v16  ;;  %2971 = vst.msk [vmem:[#allocation4 + $0x3] sm:$0x1] %vm768_vm13, %v2969_v19  ;;  %v3603_v16 = vld [vmem:[%s5408_s7 + $0xd8] sm:$0xff] }
0x16c4   :  { %v4301_v19 = vpack.c.bf16 %v3603_v16, %v3602_v15 }
0x16c6   :  { %v3001_v20 = vpop.permute.xlu1 %3000  ;;  %v2991_v25 = vpop.permute.xlu0 %2990 }
0x16c7   :  { %3003 = vst.msk [vmem:[#allocation4 + $0x7] sm:$0x1] %vm768_vm13, %v3001_v20  ;;  %2993 = vst.msk [vmem:[#allocation4 + $0x6] sm:$0x1] %vm768_vm13, %v2991_v25  ;;  %v3604_v20 = vld [vmem:[%s5408_s7 + $0xe0] sm:$0xff]  ;;  %v3605_v25 = vld [vmem:[%s5408_s7 + $0xe8] sm:$0xff] }
0x16ca   :  { %v3023_v24 = vpop.permute.xlu1 %3022  ;;  %v3013_v29 = vpop.permute.xlu0 %3012 }
0x16cb   :  { %3025 = vst.msk [vmem:[#allocation4 + $0xa] sm:$0x1] %vm768_vm13, %v3023_v24  ;;  %3015 = vst.msk [vmem:[#allocation4 + $0x9] sm:$0x1] %vm768_vm13, %v3013_v29  ;;  %v4305_v24 = vpack.c.bf16 %v3605_v25, %v3604_v20  ;;  %v3606_v29 = vld [vmem:[%s5408_s7 + $0xf0] sm:$0xff] }
0x16ce   :  { %v3045_v44 = vpop.permute.xlu1 %3044  ;;  %v3033_v30 = vpop.permute.xlu0 %3032  ;;  %v3068_v23 = vld [vmem:[#allocation4] sm:$0xff] }
0x16cf   :  { %3047 = vst.msk [vmem:[#allocation4 + $0xd] sm:$0x1] %vm768_vm13, %v3045_v44  ;;  %3035 = vst.msk [vmem:[#allocation4 + $0xb] sm:$0x1] %vm768_vm13, %v3033_v30  ;;  %v5278_v27 = vadd.f32 %v3068_v23, %v5048_v18  ;;  %v3607_v44 = vld [vmem:[%s5408_s7 + $0xf8] sm:$0xff] }
0x16d0   :  { %v4309_v30 = vpack.c.bf16 %v3607_v44, %v3606_v29  ;;  %v3589_v23 = vld [vmem:[#allocation10 + $0x3] ss:$0 sm:$0xff] }
0x16d1   :  { %v3072_v31 = vsel %vm156_vm0, %v5278_v27, 0.0 }
0x16d2   :  { %v3065_v26 = vpop.permute.xlu1 %3064  ;;  %v3055_v1 = vpop.permute.xlu0 %3054  ;;  %3073 = vadd.xlane.f32.xlu0 %v3072_v31 }
0x16d3   :  { %3067 = vst.msk [vmem:[#allocation4 + $0xf] sm:$0x1] %vm768_vm13, %v3065_v26  ;;  %3057 = vst.msk [vmem:[#allocation4 + $0xe] sm:$0x1] %vm768_vm13, %v3055_v1 }
0x16da   :  { %v3069_v35 = vld [vmem:[#allocation4 + $0x8] sm:$0xff] }
0x16db   :  { %v5285_v11 = vadd.f32 %v3069_v35, %v5045_v17 }
0x16dd   :  { %v3075_v0 = vsel %vm156_vm0, %v5285_v11, 0.0 }
0x16de   :  { %3076 = vadd.xlane.f32.xlu1 %v3075_v0 }
0x16ef   :  { %3103 = vrot.lane.b32.xlu1 %v5128_v32, %s4581_s21 }
0x175f   :  { %v3074_v18 = vpop.xlane.xlu0 %3073 }
0x1760   :  { %v3078_v37 = vmul.f32 0.03125, %v3074_v18 }
0x1762   :  { %v3080_v39 = vsub.f32 %v5278_v27, %v3078_v37  ;;  %v3608_v37 = vld [vmem:[#allocation8 + $0x5] ss:$0 sm:$0xff] }
0x1764   :  { %v3082_v54 = vmul.f32 %v3080_v39, %v3080_v39 }
0x1766   :  { %v3084_v40 = vsel %vm156_vm0, %v3082_v54, 0.0 }
0x1767   :  { %3085 = vadd.xlane.f32.xlu0 %v3084_v40 }
0x176b   :  { %v3077_v36 = vpop.xlane.xlu1 %3076 }
0x176c   :  { %v3079_v41 = vmul.f32 0.03125, %v3077_v36 }
0x176e   :  { %v3081_v17 = vsub.f32 %v5285_v11, %v3079_v41 }
0x176f   :  { %v3104_v52 = vpop.permute.xlu1 %3103 }
0x1770   :  { %v3083_v42 = vmul.f32 %v3081_v17, %v3081_v17 }
0x1772   :  { %v3087_v28 = vsel %vm156_vm0, %v3083_v42, 0.0 }
0x1773   :  { %3088 = vadd.xlane.f32.xlu0 %v3087_v28 }
0x1789   :  { %3098 = vrot.lane.b32.xlu0 %v5128_v32, %s4582_s22  ;;  %v4277_v32 = vpack.c.bf16 %v3588_v38, %v3587_v14 }
0x178b   :  { %4278 = vmatprep.subr.bf16.mxu0 %v4277_v32 }
0x178c   :  { %4280 = vmatpush3.bf16.msra.mxu0 %v4277_v32 }
0x178d   :  { %4282 = vmatprep.subr.bf16.mxu0 %v4281_v21 }
0x17f4   :  { %v3086_v46 = vpop.xlane.xlu0 %3085 }
0x17f5   :  { %v3090_v34 = vmul.f32 0.03125, %v3086_v46  ;;  %v3342_v46 = vld [vmem:[%s5410_s9] sm:$0xff] }
0x17f7   :  { %v3092_v13 = vadd.f32 1e-05, %v3090_v34  ;;  %v3343_v34 = vld [vmem:[%s5410_s9 + $0x8] sm:$0xff] }
0x17f9   :  { %4416 = vrsqrt.f32 %v3092_v13  ;;  %v4313_v13 = vpack.c.bf16 %v3343_v34, %v3342_v46 }
0x1800   :  { %v3089_v22 = vpop.xlane.xlu0 %3088 }
0x1801   :  { %v3091_v47 = vmul.f32 0.03125, %v3089_v22  ;;  %v3344_v22 = vld [vmem:[%s5410_s9 + $0x10] sm:$0xff] }
0x1803   :  { %v4417_v48 = vpop.eup %4416  ;;  %v3093_v49 = vadd.f32 1e-05, %v3091_v47  ;;  %v3345_v47 = vld [vmem:[%s5410_s9 + $0x18] sm:$0xff]  ;;  %s4584_s9 = smov [#allocation14]  }
0x1804   :  { %v3096_v50 = vmul.f32 %v4417_v48, %v3080_v39  ;;  %v3099_v51 = vpop.permute.xlu0 %3098  ;;  %v4317_v48 = vpack.c.bf16 %v3345_v47, %v3344_v22 }
0x1805   :  { %4418 = vrsqrt.f32 %v3093_v49 }
0x1806   :  { %v3101_v53 = vmul.f32 %v3099_v51, %v3096_v50 }
0x1808   :  { %v3106_v55 = vadd.f32 %v3104_v52, %v3101_v53 }
0x180a   :  { %3988 = vmatprep.mubr.msk.f32.mxu0 %vm156_vm0, %v3106_v55 }
0x180f   :  { %v4419_v56 = vpop.eup %4418 }
0x1810   :  { %v3097_v58 = vmul.f32 %v4419_v56, %v3081_v17 }
0x1812   :  { %v3102_v63 = vmul.f32 %v3099_v51, %v3097_v58 }
0x1814   :  { %v3107_v57 = vadd.f32 %v3104_v52, %v3102_v63 }
0x1816   :  { %3989 = vmatmul.mubr.msk.f32.vlgmr.msra.gmra.mrb[28].mxu0 %vm156_vm0, %v3107_v57 }
0x1817   :  { %4284 = vmatpush3.bf16.msra.mxu0 %v4281_v21 }
0x1818   :  { %4286 = vmatprep.subr.bf16.mxu0 %v4285_v4 }
0x181b   :  { %4288 = vmatpush3.bf16.msra.mxu0 %v4285_v4 }
0x181c   :  { %4290 = vmatprep.subr.bf16.mxu0 %v4289_v8 }
0x181f   :  { %4292 = vmatpush3.bf16.msra.mxu0 %v4289_v8 }
0x1820   :  { %4294 = vmatprep.subr.bf16.mxu0 %v4293_v5 }
0x1823   :  { %4296 = vmatpush3.bf16.msra.mxu0 %v4293_v5 }
0x1824   :  { %4298 = vmatprep.subr.bf16.mxu0 %v4297_v10 }
0x1827   :  { %4300 = vmatpush3.bf16.msra.mxu0 %v4297_v10 }
0x1828   :  { %4302 = vmatprep.subr.bf16.mxu0 %v4301_v19 }
0x182b   :  { %4304 = vmatpush3.bf16.msra.mxu0 %v4301_v19 }
0x182c   :  { %4306 = vmatprep.subr.bf16.mxu0 %v4305_v24 }
0x182f   :  { %4308 = vmatpush3.bf16.msra.mxu0 %v4305_v24 }
0x1830   :  { %4310 = vmatprep.subr.bf16.mxu0 %v4309_v30 }
0x1833   :  { %4312 = vmatpush3.bf16.msra.mxu0 %v4309_v30 }
0x1834   :  { %4314 = vmatprep.subr.bf16.mxu0 %v4313_v13 }
0x18e9   :  { %v3990_v31 = vpop.f32.mrb[28].mxu0 }
0x18ea   :  { %v3197_v26 = vadd.f32 %v3990_v31, %v3589_v23  ;;  %v3191_v1 = vpop.f32.mrb[29].mxu0 }
0x18eb   :  { %v3192_v35 = vadd.f32 %v3589_v23, %v3191_v1 }
0x18ec   :  { %v3201_v18 = vmax.f32 %v3197_v26, 0.0 }
0x18ed   :  { %v3200_v0 = vmax.f32 %v3192_v35, 0.0 }
0x18ef   :  { %4023 = vmatprep.mubr.f32.mxu0 %v3200_v0 }
0x18f0   :  { %4024 = vmatmul.mubr.f32.vlgmr.msra.gmra.mrb[30].mxu0 %v3201_v18 }
0x18f1   :  { %4316 = vmatpush3.bf16.msra.mxu0 %v4313_v13 }
0x18f2   :  { %4318 = vmatprep.subr.bf16.mxu0 %v4317_v48 }
0x18f5   :  { %4320 = vmatpush3.bf16.msra.mxu0 %v4317_v48 }
0x19c3   :  { %v4025_v39 = vpop.f32.mrb[30].mxu0 }
0x19c4   :  { %v3297_v54 = vadd.f32 %v4025_v39, %v3608_v37  ;;  %v3291_v40 = vpop.f32.mrb[31].mxu0 }
0x19c5   :  { %v3292_v36 = vadd.f32 %v3608_v37, %v3291_v40 }
0x19c6   :  { %v3301_v41 = vadd.f32 %v3297_v54, %v5285_v11 }
0x19c7   :  { %v3300_v17 = vadd.f32 %v3292_v36, %v5278_v27  ;;  %v3609_v27 = vld [vmem:[%s5409_s8] ss:$0 sm:$0xff] }
0x19c8   :  { %v3306_v42 = vsel %vm156_vm0, %v3301_v41, 0.0 }
0x19c9   :  { %3307 = vadd.xlane.f32.xlu0 %v3306_v42  ;;  %v3303_v28 = vsel %vm156_vm0, %v3300_v17, 0.0 }
0x19ca   :  { %3304 = vadd.xlane.f32.xlu1 %v3303_v28 }
0x1a56   :  { %v3308_v7 = vpop.xlane.xlu0 %3307 }
0x1a57   :  { %v3310_v43 = vmul.f32 0.03125, %v3308_v7  ;;  %v3305_v45 = vpop.xlane.xlu1 %3304 }
0x1a58   :  { %v3309_v14 = vmul.f32 0.03125, %v3305_v45 }
0x1a59   :  { %v3312_v38 = vsub.f32 %v3301_v41, %v3310_v43 }
0x1a5a   :  { %v3311_v32 = vsub.f32 %v3300_v17, %v3309_v14 }
0x1a5b   :  { %v3314_v33 = vmul.f32 %v3312_v38, %v3312_v38 }
0x1a5c   :  { %v3313_v59 = vmul.f32 %v3311_v32, %v3311_v32 }
0x1a5d   :  { %v3318_v21 = vsel %vm156_vm0, %v3314_v33, 0.0 }
0x1a5e   :  { %3319 = vadd.xlane.f32.xlu1 %v3318_v21  ;;  %v3315_v11 = vsel %vm156_vm0, %v3313_v59, 0.0 }
0x1a5f   :  { %3316 = vadd.xlane.f32.xlu0 %v3315_v11 }
0x1a6f   :  { %3346 = vrot.lane.b32.xlu1 %v3609_v27, %s4582_s22 }
0x1a75   :  { %3337 = vrot.lane.b32.xlu0 %v3609_v27, %s4577_s20  ;;  %s3437_s20 = sshll.u32 %s4584_s9, 4  ;;  %s3438_s20 = int_to_ptr.vmem [resolvable:$true] %s3437_s20 }
0x1a76   :  { %s4536_s22 = scalar_lea.vmem %s3438_s20, 256  ;;  %p4541_p13 = scmp.lt.s32.totalorder %s3438_s20, %s3438_s20 }
0x1a77   :  { %p4537_p12 = scmp.ne.s32.totalorder %s3438_s20, %s4536_s22  ;;  %p4542_p0 = scmp.lt.s32.totalorder %s4536_s22, %s4536_s22 }
0x1a79   :  { %p4543_p1 = por %p4542_p0, %p4541_p13 }
0x1a7b   :  { %p4544_p2 = pnand %p4543_p1, %p4537_p12 }
0x1aeb   :  { %v3320_v49 = vpop.xlane.xlu1 %3319 }
0x1aec   :  { %v3322_v50 = vmul.f32 0.03125, %v3320_v49  ;;  %v3317_v51 = vpop.xlane.xlu0 %3316 }
0x1aed   :  { %v3321_v52 = vmul.f32 0.03125, %v3317_v51 }
0x1aee   :  { %v3324_v53 = vadd.f32 1e-05, %v3322_v50 }
0x1aef   :  { %v3323_v55 = vadd.f32 1e-05, %v3321_v52  ;;  %v3347_v8 = vpop.permute.xlu1 %3346 }
0x1af0   :  { %4420 = vrsqrt.f32 %v3324_v53  ;;  %v3338_v63 = vpop.permute.xlu0 %3337 }
0x1af1   :  { %4422 = vrsqrt.f32 %v3323_v55 }
0x1afa   :  { %v4421_v56 = vpop.eup %4420 }
0x1afb   :  { %v4423_v58 = vpop.eup %4422  ;;  %v3328_v61 = vmul.f32 %v4421_v56, %v3312_v38 }
0x1afc   :  { %v3327_v60 = vmul.f32 %v4423_v58, %v3311_v32 }
0x1afd   :  { %v3336_v57 = vmul.f32 %v3609_v27, %v3328_v61 }
0x1afe   :  { %v3335_v4 = vmul.f32 %v3609_v27, %v3327_v60 }
0x1aff   :  { %v3341_v62 = vadd.f32 %v3338_v63, %v3336_v57 }
0x1b00   :  { %v3340_v6 = vadd.f32 %v3338_v63, %v3335_v4 }
0x1b02   :  { %4034 = vmatprep.mubr.msk.f32.mxu0 %vm156_vm0, %v3340_v6 }
0x1b03   :  { %4035 = vmatmul.mubr.msk.f32.vlgmr.msra.gmra.mrb[32].mxu0 %vm156_vm0, %v3341_v62 }
0x1bd6   :  { %v4036_v3 = vpop.f32.mrb[32].mxu0 }
0x1bd7   :  { %v3427_v12 = vadd.f32 %v4036_v3, %v3347_v8  ;;  %v3421_v5 = vpop.f32.mrb[33].mxu0 }
0x1bd8   :  { %v3422_v2 = vadd.f32 %v3421_v5, %v3347_v8 }
0x1bd9   :  { %3431 = vst.msk [vmem:[#allocation14 + $0x8] sm:$0xff] %vm156_vm0, %v3427_v12 }
0x1bda   :  { %3430 = vst.msk [vmem:[#allocation14] sm:$0xff] %vm156_vm0, %v3422_v2 }
0x1bdb   :  { %4547 = shalt.err (!%p4544_p2)
}
0x1bdc   :  { %s4548_s27 = scalar_lea.hbm %s5411_s10, 256 }
0x1bdd   :  { %p4549_p3 = scmp.ne.s32.totalorder %s5411_s10, %s4548_s27  ;;  %p4552_p4 = scmp.lt.u32.totalorder %s4548_s27, %s5411_s10 }
0x1bdf   :  { %p4554_p5 = pnand %p4552_p4, %p4549_p3 }
0x1be1   :  { %4557 = shalt.err (!%p4554_p5)
}
0x1be2   :  { %3443 = dma.vmem_to_hbm [thread:$0]  %s3438_s20, 256, %s5411_s10, [#allocation7], %s4571_s14, %s4571_s14, %s4572_s19  }
0x1be3   :  { %4564 = dma.done.wait [#allocation7], 256  }
0x1be4   :  { %4565 = vsyncadd [#allocation7], 4294967040 }
0x1be5   :  { %3447 = vsyncpa [#allocation6], 1 }
0x1be6   :  { %3448 = vsyncpa [#allocation9], 1 }
0x1be7   :  { %3449 = vsyncpa [#allocation12], 1 }
0x1be8   :  { %3450 = vsyncpa [#allocation7], 1 }

</bundles_post_ra>
